<compile_context>
chip_gen: v7x
topology: tpu7x:2x2x1
jax: 0.10.0
libtpu: 0.0.40
codegen_flags: <defaults>
</compile_context>

<pallas_src>
import jax
import jax.numpy as jnp
from jax.experimental import pallas as pl
from jax.experimental.pallas import tpu as pltpu

NUM_HEADS = 4          # hardcoded in the reference: nn.MultiheadAttention(input_dim, 4, dropout)
LN_EPS = 1e-5


def _bedt_kernel(ids_ref,                                   # scalar prefetch (SMEM, (B*S,))
                 mask_ref, posseg_ref, ln_g_ref, ln_b_ref, tok_emb_hbm,
                 wq_ref, wk_ref, wv_ref, bq_ref, bk_ref, bv_ref,
                 wo_ref, bo_ref, wt_ref, bt_ref, wc_ref, bc_ref,
                 logp_ref, cls_ref,
                 emb_ref, dma_sem):
    rows, D = emb_ref.shape            # rows = Bb * S
    S = posseg_ref.shape[0]
    Bb = rows // S
    H = wq_ref.shape[0]
    i = pl.program_id(0)
    base = i * rows

    # ---------- 1) token embedding: issue DMA row gather from HBM (ids in SMEM) ----------
    copies = []
    for r in range(rows):
        tok_id = ids_ref[base + r]
        cp = pltpu.make_async_copy(
            tok_emb_hbm.at[pl.ds(tok_id, 1), :],
            emb_ref.at[pl.ds(r, 1), :],
            dma_sem.at[r])
        cp.start()
        copies.append(cp)

    # ---------- 2) work that does not depend on the gathered rows (hides DMA latency) ----
    key_bf = mask_ref[...].astype(jnp.bfloat16)
    khs = [jnp.dot(key_bf, wk_ref[h], preferred_element_type=jnp.float32) + bk_ref[h]
           for h in range(H)]                                 # per-head K projections
    posseg_rows = jnp.concatenate([posseg_ref[...]] * Bb, axis=0)   # (rows, D) sublane tile

    # ---------- 3) wait for the gather ----------
    for cp in copies:
        cp.wait()

    # ---------- 4) JointEmbeddingLayer: tok + (seg + pos) + LayerNorm (f32) ----------
    x = emb_ref[...] + posseg_rows
    mu = jnp.mean(x, axis=-1, keepdims=True)
    var = jnp.mean((x - mu) ** 2, axis=-1, keepdims=True)
    x = (x - mu) * jax.lax.rsqrt(var + LN_EPS)
    x = x * ln_g_ref[...] + ln_b_ref[...]
    x_bf = x.astype(jnp.bfloat16)

    # ---------- 5) MultiheadAttention(query=x, key=attention_mask, value=x) -------------
    # NOTE: 1/sqrt(head_dim) is already folded into wq/bq on the host.
    enc = jnp.zeros((rows, D), jnp.float32)
    for h in range(H):                                        # static unroll, 4 heads
        qh = jnp.dot(x_bf, wq_ref[h], preferred_element_type=jnp.float32) + bq_ref[h]
        vh = jnp.dot(x_bf, wv_ref[h], preferred_element_type=jnp.float32) + bv_ref[h]
        kh = khs[h]
        ctx_blocks = []
        for b in range(Bb):                                   # per-batch (S,S) softmax
            r0 = b * S
            qb = qh[r0:r0 + S].astype(jnp.bfloat16)
            kb = kh[r0:r0 + S].astype(jnp.bfloat16)
            vb = vh[r0:r0 + S].astype(jnp.bfloat16)
            s = jax.lax.dot_general(qb, kb, (((1,), (1,)), ((), ())),
                                    preferred_element_type=jnp.float32)
            s = s - jnp.max(s, axis=-1, keepdims=True)
            p = jnp.exp(s)
            p = p * pl.reciprocal(jnp.sum(p, axis=-1, keepdims=True), approx=True)
            ctx_blocks.append(jnp.dot(p.astype(jnp.bfloat16), vb,
                                      preferred_element_type=jnp.float32))
        ctx = jnp.concatenate(ctx_blocks, axis=0)             # (rows, HD) sublane concat
        enc = enc + jnp.dot(ctx.astype(jnp.bfloat16), wo_ref[h],
                            preferred_element_type=jnp.float32)
    enc = enc + bo_ref[...]

    # ---------- 6) token prediction head + log-softmax (lane-padded vocab) ----------
    tp = jnp.dot(enc.astype(jnp.bfloat16), wt_ref[...],
                 preferred_element_type=jnp.float32) + bt_ref[...]
    tp = tp - jnp.max(tp, axis=-1, keepdims=True)
    lse = jnp.log(jnp.sum(jnp.exp(tp), axis=-1, keepdims=True))
    logp_ref[...] = tp - lse

    # ---------- 7) classifier on the first token of each batch element ----------
    cls_in = jnp.concatenate([enc[b * S:b * S + 1, :] for b in range(Bb)], axis=0)
    cls_ref[...] = jnp.dot(cls_in.astype(jnp.bfloat16), wc_ref[...],
                           preferred_element_type=jnp.float32) + bc_ref[...]


def _sinusoidal_pe(S, D):
    pos = jnp.arange(S, dtype=jnp.float32)[:, None]
    d = jnp.arange(D, dtype=jnp.float32)[None, :]
    ang = pos / (10000.0 ** (2.0 * d / D))
    return jnp.where((jnp.arange(D)[None, :] % 2) == 0, jnp.sin(ang), jnp.cos(ang))


def bedt_forward(ids, attention_mask, params, *, block_b=None):
    B, S = ids.shape
    V, D = params["tok_emb"].shape
    C = params["wc"].shape[1]
    H = NUM_HEADS
    HD = D // H
    if block_b is None:
        block_b = B                       # whole batch per grid step for small B
    assert B % block_b == 0
    assert block_b == B or block_b % 8 == 0, "sub-batch blocks must be multiples of 8"
    nb = B // block_b
    rows_blk = block_b * S
    Vp = ((V + 127) // 128) * 128         # lane-dense logp output
    Cp = ((C + 127) // 128) * 128

    f32, bf16 = jnp.float32, jnp.bfloat16

    # ---- host-side grid-invariant prep: PE + segment rows, per-head weights, padding ----
    pe = _sinusoidal_pe(S, D)
    seg_mask = (jnp.arange(S) >= (S // 2 + 1))[:, None]
    seg = jnp.where(seg_mask, params["seg_emb"][1][None, :], params["seg_emb"][0][None, :])
    posseg = (pe + seg).astype(f32)                                     # (S, D)

    def per_head_w(w):                                                  # (D,D) -> (H,D,HD)
        return w.reshape(D, H, HD).transpose(1, 0, 2).astype(bf16)

    def per_head_b(b):                                                  # (1,D) -> (H,1,HD)
        return b.reshape(1, H, HD).transpose(1, 0, 2).astype(f32)

    scale = 1.0 / (HD ** 0.5)
    wq = per_head_w(params["wq"] * scale)        # torch MHA scales q: fold into Wq / bq
    bq = per_head_b(params["bq"] * scale)
    wk, wv = per_head_w(params["wk"]), per_head_w(params["wv"])
    bk, bv = per_head_b(params["bk"]), per_head_b(params["bv"])
    wo = params["wo"].reshape(H, HD, D).astype(bf16)                    # (H, HD, D)
    bo = params["bo"].astype(f32)
    wt = jnp.pad(params["wt"], ((0, 0), (0, Vp - V))).astype(bf16)
    bt = jnp.pad(params["bt"], ((0, 0), (0, Vp - V)), constant_values=-1e30).astype(f32)
    wc = jnp.pad(params["wc"], ((0, 0), (0, Cp - C))).astype(bf16)
    bc = jnp.pad(params["bc"], ((0, 0), (0, Cp - C))).astype(f32)

    ids_flat = ids.reshape(B * S).astype(jnp.int32)                     # scalar prefetch
    mask2d = attention_mask.reshape(B * S, D).astype(f32)

    def rep(shape):
        return pl.BlockSpec(tuple(shape), lambda i, ids_s, _n=len(shape): (0,) * _n)

    in_specs = [
        pl.BlockSpec((rows_blk, D), lambda i, ids_s: (i, 0)),           # attention_mask rows
        rep((S, D)),                                                    # posseg
        rep((1, D)), rep((1, D)),                                       # ln_g, ln_b
        pl.BlockSpec(memory_space=pl.ANY),                              # tok_emb stays in HBM
        rep((H, D, HD)), rep((H, D, HD)), rep((H, D, HD)),              # wq wk wv
        rep((H, 1, HD)), rep((H, 1, HD)), rep((H, 1, HD)),              # bq bk bv
        rep((H, HD, D)), rep((1, D)),                                   # wo bo
        rep((D, Vp)), rep((1, Vp)),                                     # wt bt
        rep((D, Cp)), rep((1, Cp)),                                     # wc bc
    ]
    out_specs = [
        pl.BlockSpec((rows_blk, Vp), lambda i, ids_s: (i, 0)),
        pl.BlockSpec((block_b, Cp), lambda i, ids_s: (i, 0)),
    ]
    out_shape = [
        jax.ShapeDtypeStruct((B * S, Vp), f32),
        jax.ShapeDtypeStruct((B, Cp), f32),
    ]

    logp, cls = pl.pallas_call(
        _bedt_kernel,
        out_shape=out_shape,
        grid_spec=pltpu.PrefetchScalarGridSpec(
            num_scalar_prefetch=1,
            grid=(nb,),
            in_specs=in_specs,
            out_specs=out_specs,
            scratch_shapes=[pltpu.VMEM((rows_blk, D), f32),
                            pltpu.SemaphoreType.DMA((rows_blk,))],
        ),
        compiler_params=pltpu.CompilerParams(dimension_semantics=("parallel",)),
    )(ids_flat, mask2d, posseg,
      params["ln_g"].astype(f32), params["ln_b"].astype(f32),
      params["tok_emb"].astype(f32),
      wq, wk, wv, bq, bk, bv, wo, bo, wt, bt, wc, bc)

    return logp[:, :V].reshape(B, S, V), cls[:, :C]


def bedt_reference(ids, mask, p):
    """Pure-JAX f32 reference (HIGHEST matmul precision) for numerical validation."""
    B, S = ids.shape
    V, D = p["tok_emb"].shape
    H = NUM_HEADS
    HD = D // H
    PH = jax.lax.Precision.HIGHEST
    pos = jnp.arange(S, dtype=jnp.float32)[:, None]
    i = jnp.arange(D, dtype=jnp.float32)[None, :]
    ang = pos / (10000.0 ** (2.0 * i / D))
    pe = jnp.where((jnp.arange(D)[None, :] % 2) == 0, jnp.sin(ang), jnp.cos(ang))
    seg_ids = (jnp.arange(S) >= (S // 2 + 1)).astype(jnp.int32)
    x = p["tok_emb"][ids] + p["seg_emb"][seg_ids][None] + pe[None]
    mu = x.mean(-1, keepdims=True)
    var = ((x - mu) ** 2).mean(-1, keepdims=True)
    x = (x - mu) / jnp.sqrt(var + LN_EPS) * p["ln_g"][0] + p["ln_b"][0]
    q = jnp.dot(x, p["wq"], precision=PH) + p["bq"][0]
    k = jnp.dot(mask, p["wk"], precision=PH) + p["bk"][0]
    v = jnp.dot(x, p["wv"], precision=PH) + p["bv"][0]
    qh = q.reshape(B, S, H, HD)
    kh = k.reshape(B, S, H, HD)
    vh = v.reshape(B, S, H, HD)
    sc = jnp.einsum("bqhd,bkhd->bhqk", qh, kh, precision=PH) / (HD ** 0.5)
    pr = jax.nn.softmax(sc, axis=-1)
    ctx = jnp.einsum("bhqk,bkhd->bqhd", pr, vh, precision=PH).reshape(B, S, D)
    enc = jnp.dot(ctx, p["wo"], precision=PH) + p["bo"][0]
    logp = jax.nn.log_softmax(jnp.dot(enc, p["wt"], precision=PH) + p["bt"][0], axis=-1)
    cls = jnp.dot(enc[:, 0, :], p["wc"], precision=PH) + p["bc"][0]
    return logp, cls


if __name__ == "__main__":
    B, S, D, V, C = 2, 8, 32, 64, 8

    key = jax.random.PRNGKey(0)
    keys = jax.random.split(key, 16)

    def lin(k, fan_in, shape):
        bound = 1.0 / (fan_in ** 0.5)
        return jax.random.uniform(k, shape, jnp.float32, -bound, bound)

    params = {
        "tok_emb": jax.random.normal(keys[0], (V, D), jnp.float32) * 0.1,
        "seg_emb": jax.random.normal(keys[1], (V, D), jnp.float32) * 0.1,
        "ln_g": jnp.ones((1, D), jnp.float32),
        "ln_b": jnp.zeros((1, D), jnp.float32),
        "wq": lin(keys[2], D, (D, D)),
        "wk": lin(keys[3], D, (D, D)),
        "wv": lin(keys[4], D, (D, D)),
        "bq": lin(keys[5], D, (1, D)),
        "bk": lin(keys[6], D, (1, D)),
        "bv": lin(keys[7], D, (1, D)),
        "wo": lin(keys[8], D, (D, D)),
        "bo": lin(keys[9], D, (1, D)),
        "wt": lin(keys[10], D, (D, V)),
        "bt": lin(keys[11], D, (1, V)),
        "wc": lin(keys[12], D, (D, C)),
        "bc": lin(keys[13], D, (1, C)),
    }

    ids = jax.random.randint(keys[14], (B, S), 0, V, dtype=jnp.int32)
    # The reference passes `attention_mask` directly as the MHA key tensor, so it is a
    # dense float tensor with the embedding dim.
    attention_mask = jax.random.normal(keys[15], (B, S, D), jnp.float32)

    logp, cls = jax.block_until_ready(bedt_forward(ids, attention_mask, params))
    logp_ref, cls_ref = bedt_reference(ids, attention_mask, params)

    err = max(float(jnp.max(jnp.abs(logp - logp_ref))),
              float(jnp.max(jnp.abs(cls - cls_ref))))
    assert logp.shape == (B, S, V) and cls.shape == (B, C)
    # Kernel uses bf16 MXU operands (f32 accumulation) + approx reciprocal, so the gap
    # vs the f32 reference is bounded by bf16 rounding (~1e-2); logic bugs would be O(0.3+).
    assert err < 8e-2, f"mismatch vs reference: {err}"
    print("KERNEL_OK")
</pallas_src>

<mosaic_0001>
module attributes {stable_mosaic.version = 11 : i64} {
  func.func @_bedt_kernel(%arg0: i32, %arg1: memref<16xi32, #tpu.memory_space<smem>>, %arg2: memref<16x32xf32, #tpu.memory_space<vmem>>, %arg3: memref<8x32xf32, #tpu.memory_space<vmem>>, %arg4: memref<1x32xf32, #tpu.memory_space<vmem>>, %arg5: memref<1x32xf32, #tpu.memory_space<vmem>>, %arg6: memref<64x32xf32, #tpu.memory_space<any>>, %arg7: memref<4x32x8xbf16, #tpu.memory_space<vmem>>, %arg8: memref<4x32x8xbf16, #tpu.memory_space<vmem>>, %arg9: memref<4x32x8xbf16, #tpu.memory_space<vmem>>, %arg10: memref<4x1x8xf32, #tpu.memory_space<vmem>>, %arg11: memref<4x1x8xf32, #tpu.memory_space<vmem>>, %arg12: memref<4x1x8xf32, #tpu.memory_space<vmem>>, %arg13: memref<4x8x32xbf16, #tpu.memory_space<vmem>>, %arg14: memref<1x32xf32, #tpu.memory_space<vmem>>, %arg15: memref<32x128xbf16, #tpu.memory_space<vmem>>, %arg16: memref<1x128xf32, #tpu.memory_space<vmem>>, %arg17: memref<32x128xbf16, #tpu.memory_space<vmem>>, %arg18: memref<1x128xf32, #tpu.memory_space<vmem>>, %arg19: memref<16x128xf32, #tpu.memory_space<vmem>>, %arg20: memref<2x128xf32, #tpu.memory_space<vmem>>, %arg21: memref<16x32xf32, #tpu.memory_space<vmem>>, %arg22: memref<16x!tpu.dma_semaphore, #tpu.memory_space<semaphore_mem>>) attributes {dimension_semantics = [#tpu.dimension_semantics<parallel>], iteration_bounds = array<i64: 1>, scalar_prefetch = 1 : i64, scratch_operands = 2 : i64, tpu.core_type = #tpu.core_type<tc>, window_params = [{transform_indices = @transform_0, window_bounds = array<i64: 16, 32>}, {pipeline_mode = #tpu.pipeline_mode<synchronous>, transform_indices = @transform_1, window_bounds = array<i64: 8, 32>}, {pipeline_mode = #tpu.pipeline_mode<synchronous>, transform_indices = @transform_2, window_bounds = array<i64: 1, 32>}, {pipeline_mode = #tpu.pipeline_mode<synchronous>, transform_indices = @transform_3, window_bounds = array<i64: 1, 32>}, {}, {pipeline_mode = #tpu.pipeline_mode<synchronous>, transform_indices = @transform_5, window_bounds = array<i64: 4, 32, 8>}, {pipeline_mode = #tpu.pipeline_mode<synchronous>, transform_indices = @transform_6, window_bounds = array<i64: 4, 32, 8>}, {pipeline_mode = #tpu.pipeline_mode<synchronous>, transform_indices = @transform_7, window_bounds = array<i64: 4, 32, 8>}, {pipeline_mode = #tpu.pipeline_mode<synchronous>, transform_indices = @transform_8, window_bounds = array<i64: 4, 1, 8>}, {pipeline_mode = #tpu.pipeline_mode<synchronous>, transform_indices = @transform_9, window_bounds = array<i64: 4, 1, 8>}, {pipeline_mode = #tpu.pipeline_mode<synchronous>, transform_indices = @transform_10, window_bounds = array<i64: 4, 1, 8>}, {pipeline_mode = #tpu.pipeline_mode<synchronous>, transform_indices = @transform_11, window_bounds = array<i64: 4, 8, 32>}, {pipeline_mode = #tpu.pipeline_mode<synchronous>, transform_indices = @transform_12, window_bounds = array<i64: 1, 32>}, {pipeline_mode = #tpu.pipeline_mode<synchronous>, transform_indices = @transform_13, window_bounds = array<i64: 32, 128>}, {pipeline_mode = #tpu.pipeline_mode<synchronous>, transform_indices = @transform_14, window_bounds = array<i64: 1, 128>}, {pipeline_mode = #tpu.pipeline_mode<synchronous>, transform_indices = @transform_15, window_bounds = array<i64: 32, 128>}, {pipeline_mode = #tpu.pipeline_mode<synchronous>, transform_indices = @transform_16, window_bounds = array<i64: 1, 128>}, {transform_indices = @transform_17, window_bounds = array<i64: 16, 128>}, {transform_indices = @transform_18, window_bounds = array<i64: 2, 128>}]} {
    %c16_i32 = arith.constant 16 : i32
    %0 = arith.muli %arg0, %c16_i32 : i32
    %c0_i32 = arith.constant 0 : i32
    %1 = arith.addi %0, %c0_i32 : i32
    %2 = arith.index_cast %1 : i32 to index
    %3 = memref.load %arg1[%2] : memref<16xi32, #tpu.memory_space<smem>>
    %c0_i32_0 = arith.constant 0 : i32
    %c0_i32_1 = arith.constant 0 : i32
    %4 = tpu.memref_slice %arg6[%3, %c0_i32_1] : memref<64x32xf32, #tpu.memory_space<any>> -> memref<1x32xf32, #tpu.memory_space<any>>
    %c0_i32_2 = arith.constant 0 : i32
    %c0_i32_3 = arith.constant 0 : i32
    %5 = tpu.memref_slice %arg21[%c0_i32_2, %c0_i32_3] : memref<16x32xf32, #tpu.memory_space<vmem>> -> memref<1x32xf32, #tpu.memory_space<vmem>>
    %6 = tpu.memref_slice %arg22[%c0_i32_0] : memref<16x!tpu.dma_semaphore, #tpu.memory_space<semaphore_mem>> -> memref<1x!tpu.dma_semaphore, #tpu.memory_space<semaphore_mem>>
    %7 = tpu.memref_squeeze %6 : memref<1x!tpu.dma_semaphore, #tpu.memory_space<semaphore_mem>> -> memref<!tpu.dma_semaphore, #tpu.memory_space<semaphore_mem>>
    tpu.enqueue_dma source(%4 : memref<1x32xf32, #tpu.memory_space<any>>) target(%5 : memref<1x32xf32, #tpu.memory_space<vmem>>) target_semaphore(%7 : memref<!tpu.dma_semaphore, #tpu.memory_space<semaphore_mem>>)
    %c1_i32 = arith.constant 1 : i32
    %8 = arith.addi %0, %c1_i32 : i32
    %9 = arith.index_cast %8 : i32 to index
    %10 = memref.load %arg1[%9] : memref<16xi32, #tpu.memory_space<smem>>
    %c1_i32_4 = arith.constant 1 : i32
    %c0_i32_5 = arith.constant 0 : i32
    %11 = tpu.memref_slice %arg6[%10, %c0_i32_5] : memref<64x32xf32, #tpu.memory_space<any>> -> memref<1x32xf32, #tpu.memory_space<any>>
    %c1_i32_6 = arith.constant 1 : i32
    %c0_i32_7 = arith.constant 0 : i32
    %12 = tpu.memref_slice %arg21[%c1_i32_6, %c0_i32_7] : memref<16x32xf32, #tpu.memory_space<vmem>> -> memref<1x32xf32, #tpu.memory_space<vmem>>
    %13 = tpu.memref_slice %arg22[%c1_i32_4] : memref<16x!tpu.dma_semaphore, #tpu.memory_space<semaphore_mem>> -> memref<1x!tpu.dma_semaphore, #tpu.memory_space<semaphore_mem>>
    %14 = tpu.memref_squeeze %13 : memref<1x!tpu.dma_semaphore, #tpu.memory_space<semaphore_mem>> -> memref<!tpu.dma_semaphore, #tpu.memory_space<semaphore_mem>>
    tpu.enqueue_dma source(%11 : memref<1x32xf32, #tpu.memory_space<any>>) target(%12 : memref<1x32xf32, #tpu.memory_space<vmem>>) target_semaphore(%14 : memref<!tpu.dma_semaphore, #tpu.memory_space<semaphore_mem>>)
    %c2_i32 = arith.constant 2 : i32
    %15 = arith.addi %0, %c2_i32 : i32
    %16 = arith.index_cast %15 : i32 to index
    %17 = memref.load %arg1[%16] : memref<16xi32, #tpu.memory_space<smem>>
    %c2_i32_8 = arith.constant 2 : i32
    %c0_i32_9 = arith.constant 0 : i32
    %18 = tpu.memref_slice %arg6[%17, %c0_i32_9] : memref<64x32xf32, #tpu.memory_space<any>> -> memref<1x32xf32, #tpu.memory_space<any>>
    %c2_i32_10 = arith.constant 2 : i32
    %c0_i32_11 = arith.constant 0 : i32
    %19 = tpu.memref_slice %arg21[%c2_i32_10, %c0_i32_11] : memref<16x32xf32, #tpu.memory_space<vmem>> -> memref<1x32xf32, #tpu.memory_space<vmem>>
    %20 = tpu.memref_slice %arg22[%c2_i32_8] : memref<16x!tpu.dma_semaphore, #tpu.memory_space<semaphore_mem>> -> memref<1x!tpu.dma_semaphore, #tpu.memory_space<semaphore_mem>>
    %21 = tpu.memref_squeeze %20 : memref<1x!tpu.dma_semaphore, #tpu.memory_space<semaphore_mem>> -> memref<!tpu.dma_semaphore, #tpu.memory_space<semaphore_mem>>
    tpu.enqueue_dma source(%18 : memref<1x32xf32, #tpu.memory_space<any>>) target(%19 : memref<1x32xf32, #tpu.memory_space<vmem>>) target_semaphore(%21 : memref<!tpu.dma_semaphore, #tpu.memory_space<semaphore_mem>>)
    %c3_i32 = arith.constant 3 : i32
    %22 = arith.addi %0, %c3_i32 : i32
    %23 = arith.index_cast %22 : i32 to index
    %24 = memref.load %arg1[%23] : memref<16xi32, #tpu.memory_space<smem>>
    %c3_i32_12 = arith.constant 3 : i32
    %c0_i32_13 = arith.constant 0 : i32
    %25 = tpu.memref_slice %arg6[%24, %c0_i32_13] : memref<64x32xf32, #tpu.memory_space<any>> -> memref<1x32xf32, #tpu.memory_space<any>>
    %c3_i32_14 = arith.constant 3 : i32
    %c0_i32_15 = arith.constant 0 : i32
    %26 = tpu.memref_slice %arg21[%c3_i32_14, %c0_i32_15] : memref<16x32xf32, #tpu.memory_space<vmem>> -> memref<1x32xf32, #tpu.memory_space<vmem>>
    %27 = tpu.memref_slice %arg22[%c3_i32_12] : memref<16x!tpu.dma_semaphore, #tpu.memory_space<semaphore_mem>> -> memref<1x!tpu.dma_semaphore, #tpu.memory_space<semaphore_mem>>
    %28 = tpu.memref_squeeze %27 : memref<1x!tpu.dma_semaphore, #tpu.memory_space<semaphore_mem>> -> memref<!tpu.dma_semaphore, #tpu.memory_space<semaphore_mem>>
    tpu.enqueue_dma source(%25 : memref<1x32xf32, #tpu.memory_space<any>>) target(%26 : memref<1x32xf32, #tpu.memory_space<vmem>>) target_semaphore(%28 : memref<!tpu.dma_semaphore, #tpu.memory_space<semaphore_mem>>)
    %c4_i32 = arith.constant 4 : i32
    %29 = arith.addi %0, %c4_i32 : i32
    %30 = arith.index_cast %29 : i32 to index
    %31 = memref.load %arg1[%30] : memref<16xi32, #tpu.memory_space<smem>>
    %c4_i32_16 = arith.constant 4 : i32
    %c0_i32_17 = arith.constant 0 : i32
    %32 = tpu.memref_slice %arg6[%31, %c0_i32_17] : memref<64x32xf32, #tpu.memory_space<any>> -> memref<1x32xf32, #tpu.memory_space<any>>
    %c4_i32_18 = arith.constant 4 : i32
    %c0_i32_19 = arith.constant 0 : i32
    %33 = tpu.memref_slice %arg21[%c4_i32_18, %c0_i32_19] : memref<16x32xf32, #tpu.memory_space<vmem>> -> memref<1x32xf32, #tpu.memory_space<vmem>>
    %34 = tpu.memref_slice %arg22[%c4_i32_16] : memref<16x!tpu.dma_semaphore, #tpu.memory_space<semaphore_mem>> -> memref<1x!tpu.dma_semaphore, #tpu.memory_space<semaphore_mem>>
    %35 = tpu.memref_squeeze %34 : memref<1x!tpu.dma_semaphore, #tpu.memory_space<semaphore_mem>> -> memref<!tpu.dma_semaphore, #tpu.memory_space<semaphore_mem>>
    tpu.enqueue_dma source(%32 : memref<1x32xf32, #tpu.memory_space<any>>) target(%33 : memref<1x32xf32, #tpu.memory_space<vmem>>) target_semaphore(%35 : memref<!tpu.dma_semaphore, #tpu.memory_space<semaphore_mem>>)
    %c5_i32 = arith.constant 5 : i32
    %36 = arith.addi %0, %c5_i32 : i32
    %37 = arith.index_cast %36 : i32 to index
    %38 = memref.load %arg1[%37] : memref<16xi32, #tpu.memory_space<smem>>
    %c5_i32_20 = arith.constant 5 : i32
    %c0_i32_21 = arith.constant 0 : i32
    %39 = tpu.memref_slice %arg6[%38, %c0_i32_21] : memref<64x32xf32, #tpu.memory_space<any>> -> memref<1x32xf32, #tpu.memory_space<any>>
    %c5_i32_22 = arith.constant 5 : i32
    %c0_i32_23 = arith.constant 0 : i32
    %40 = tpu.memref_slice %arg21[%c5_i32_22, %c0_i32_23] : memref<16x32xf32, #tpu.memory_space<vmem>> -> memref<1x32xf32, #tpu.memory_space<vmem>>
    %41 = tpu.memref_slice %arg22[%c5_i32_20] : memref<16x!tpu.dma_semaphore, #tpu.memory_space<semaphore_mem>> -> memref<1x!tpu.dma_semaphore, #tpu.memory_space<semaphore_mem>>
    %42 = tpu.memref_squeeze %41 : memref<1x!tpu.dma_semaphore, #tpu.memory_space<semaphore_mem>> -> memref<!tpu.dma_semaphore, #tpu.memory_space<semaphore_mem>>
    tpu.enqueue_dma source(%39 : memref<1x32xf32, #tpu.memory_space<any>>) target(%40 : memref<1x32xf32, #tpu.memory_space<vmem>>) target_semaphore(%42 : memref<!tpu.dma_semaphore, #tpu.memory_space<semaphore_mem>>)
    %c6_i32 = arith.constant 6 : i32
    %43 = arith.addi %0, %c6_i32 : i32
    %44 = arith.index_cast %43 : i32 to index
    %45 = memref.load %arg1[%44] : memref<16xi32, #tpu.memory_space<smem>>
    %c6_i32_24 = arith.constant 6 : i32
    %c0_i32_25 = arith.constant 0 : i32
    %46 = tpu.memref_slice %arg6[%45, %c0_i32_25] : memref<64x32xf32, #tpu.memory_space<any>> -> memref<1x32xf32, #tpu.memory_space<any>>
    %c6_i32_26 = arith.constant 6 : i32
    %c0_i32_27 = arith.constant 0 : i32
    %47 = tpu.memref_slice %arg21[%c6_i32_26, %c0_i32_27] : memref<16x32xf32, #tpu.memory_space<vmem>> -> memref<1x32xf32, #tpu.memory_space<vmem>>
    %48 = tpu.memref_slice %arg22[%c6_i32_24] : memref<16x!tpu.dma_semaphore, #tpu.memory_space<semaphore_mem>> -> memref<1x!tpu.dma_semaphore, #tpu.memory_space<semaphore_mem>>
    %49 = tpu.memref_squeeze %48 : memref<1x!tpu.dma_semaphore, #tpu.memory_space<semaphore_mem>> -> memref<!tpu.dma_semaphore, #tpu.memory_space<semaphore_mem>>
    tpu.enqueue_dma source(%46 : memref<1x32xf32, #tpu.memory_space<any>>) target(%47 : memref<1x32xf32, #tpu.memory_space<vmem>>) target_semaphore(%49 : memref<!tpu.dma_semaphore, #tpu.memory_space<semaphore_mem>>)
    %c7_i32 = arith.constant 7 : i32
    %50 = arith.addi %0, %c7_i32 : i32
    %51 = arith.index_cast %50 : i32 to index
    %52 = memref.load %arg1[%51] : memref<16xi32, #tpu.memory_space<smem>>
    %c7_i32_28 = arith.constant 7 : i32
    %c0_i32_29 = arith.constant 0 : i32
    %53 = tpu.memref_slice %arg6[%52, %c0_i32_29] : memref<64x32xf32, #tpu.memory_space<any>> -> memref<1x32xf32, #tpu.memory_space<any>>
    %c7_i32_30 = arith.constant 7 : i32
    %c0_i32_31 = arith.constant 0 : i32
    %54 = tpu.memref_slice %arg21[%c7_i32_30, %c0_i32_31] : memref<16x32xf32, #tpu.memory_space<vmem>> -> memref<1x32xf32, #tpu.memory_space<vmem>>
    %55 = tpu.memref_slice %arg22[%c7_i32_28] : memref<16x!tpu.dma_semaphore, #tpu.memory_space<semaphore_mem>> -> memref<1x!tpu.dma_semaphore, #tpu.memory_space<semaphore_mem>>
    %56 = tpu.memref_squeeze %55 : memref<1x!tpu.dma_semaphore, #tpu.memory_space<semaphore_mem>> -> memref<!tpu.dma_semaphore, #tpu.memory_space<semaphore_mem>>
    tpu.enqueue_dma source(%53 : memref<1x32xf32, #tpu.memory_space<any>>) target(%54 : memref<1x32xf32, #tpu.memory_space<vmem>>) target_semaphore(%56 : memref<!tpu.dma_semaphore, #tpu.memory_space<semaphore_mem>>)
    %c8_i32 = arith.constant 8 : i32
    %57 = arith.addi %0, %c8_i32 : i32
    %58 = arith.index_cast %57 : i32 to index
    %59 = memref.load %arg1[%58] : memref<16xi32, #tpu.memory_space<smem>>
    %c8_i32_32 = arith.constant 8 : i32
    %c0_i32_33 = arith.constant 0 : i32
    %60 = tpu.memref_slice %arg6[%59, %c0_i32_33] : memref<64x32xf32, #tpu.memory_space<any>> -> memref<1x32xf32, #tpu.memory_space<any>>
    %c8_i32_34 = arith.constant 8 : i32
    %c0_i32_35 = arith.constant 0 : i32
    %61 = tpu.memref_slice %arg21[%c8_i32_34, %c0_i32_35] : memref<16x32xf32, #tpu.memory_space<vmem>> -> memref<1x32xf32, #tpu.memory_space<vmem>>
    %62 = tpu.memref_slice %arg22[%c8_i32_32] : memref<16x!tpu.dma_semaphore, #tpu.memory_space<semaphore_mem>> -> memref<1x!tpu.dma_semaphore, #tpu.memory_space<semaphore_mem>>
    %63 = tpu.memref_squeeze %62 : memref<1x!tpu.dma_semaphore, #tpu.memory_space<semaphore_mem>> -> memref<!tpu.dma_semaphore, #tpu.memory_space<semaphore_mem>>
    tpu.enqueue_dma source(%60 : memref<1x32xf32, #tpu.memory_space<any>>) target(%61 : memref<1x32xf32, #tpu.memory_space<vmem>>) target_semaphore(%63 : memref<!tpu.dma_semaphore, #tpu.memory_space<semaphore_mem>>)
    %c9_i32 = arith.constant 9 : i32
    %64 = arith.addi %0, %c9_i32 : i32
    %65 = arith.index_cast %64 : i32 to index
    %66 = memref.load %arg1[%65] : memref<16xi32, #tpu.memory_space<smem>>
    %c9_i32_36 = arith.constant 9 : i32
    %c0_i32_37 = arith.constant 0 : i32
    %67 = tpu.memref_slice %arg6[%66, %c0_i32_37] : memref<64x32xf32, #tpu.memory_space<any>> -> memref<1x32xf32, #tpu.memory_space<any>>
    %c9_i32_38 = arith.constant 9 : i32
    %c0_i32_39 = arith.constant 0 : i32
    %68 = tpu.memref_slice %arg21[%c9_i32_38, %c0_i32_39] : memref<16x32xf32, #tpu.memory_space<vmem>> -> memref<1x32xf32, #tpu.memory_space<vmem>>
    %69 = tpu.memref_slice %arg22[%c9_i32_36] : memref<16x!tpu.dma_semaphore, #tpu.memory_space<semaphore_mem>> -> memref<1x!tpu.dma_semaphore, #tpu.memory_space<semaphore_mem>>
    %70 = tpu.memref_squeeze %69 : memref<1x!tpu.dma_semaphore, #tpu.memory_space<semaphore_mem>> -> memref<!tpu.dma_semaphore, #tpu.memory_space<semaphore_mem>>
    tpu.enqueue_dma source(%67 : memref<1x32xf32, #tpu.memory_space<any>>) target(%68 : memref<1x32xf32, #tpu.memory_space<vmem>>) target_semaphore(%70 : memref<!tpu.dma_semaphore, #tpu.memory_space<semaphore_mem>>)
    %c10_i32 = arith.constant 10 : i32
    %71 = arith.addi %0, %c10_i32 : i32
    %72 = arith.index_cast %71 : i32 to index
    %73 = memref.load %arg1[%72] : memref<16xi32, #tpu.memory_space<smem>>
    %c10_i32_40 = arith.constant 10 : i32
    %c0_i32_41 = arith.constant 0 : i32
    %74 = tpu.memref_slice %arg6[%73, %c0_i32_41] : memref<64x32xf32, #tpu.memory_space<any>> -> memref<1x32xf32, #tpu.memory_space<any>>
    %c10_i32_42 = arith.constant 10 : i32
    %c0_i32_43 = arith.constant 0 : i32
    %75 = tpu.memref_slice %arg21[%c10_i32_42, %c0_i32_43] : memref<16x32xf32, #tpu.memory_space<vmem>> -> memref<1x32xf32, #tpu.memory_space<vmem>>
    %76 = tpu.memref_slice %arg22[%c10_i32_40] : memref<16x!tpu.dma_semaphore, #tpu.memory_space<semaphore_mem>> -> memref<1x!tpu.dma_semaphore, #tpu.memory_space<semaphore_mem>>
    %77 = tpu.memref_squeeze %76 : memref<1x!tpu.dma_semaphore, #tpu.memory_space<semaphore_mem>> -> memref<!tpu.dma_semaphore, #tpu.memory_space<semaphore_mem>>
    tpu.enqueue_dma source(%74 : memref<1x32xf32, #tpu.memory_space<any>>) target(%75 : memref<1x32xf32, #tpu.memory_space<vmem>>) target_semaphore(%77 : memref<!tpu.dma_semaphore, #tpu.memory_space<semaphore_mem>>)
    %c11_i32 = arith.constant 11 : i32
    %78 = arith.addi %0, %c11_i32 : i32
    %79 = arith.index_cast %78 : i32 to index
    %80 = memref.load %arg1[%79] : memref<16xi32, #tpu.memory_space<smem>>
    %c11_i32_44 = arith.constant 11 : i32
    %c0_i32_45 = arith.constant 0 : i32
    %81 = tpu.memref_slice %arg6[%80, %c0_i32_45] : memref<64x32xf32, #tpu.memory_space<any>> -> memref<1x32xf32, #tpu.memory_space<any>>
    %c11_i32_46 = arith.constant 11 : i32
    %c0_i32_47 = arith.constant 0 : i32
    %82 = tpu.memref_slice %arg21[%c11_i32_46, %c0_i32_47] : memref<16x32xf32, #tpu.memory_space<vmem>> -> memref<1x32xf32, #tpu.memory_space<vmem>>
    %83 = tpu.memref_slice %arg22[%c11_i32_44] : memref<16x!tpu.dma_semaphore, #tpu.memory_space<semaphore_mem>> -> memref<1x!tpu.dma_semaphore, #tpu.memory_space<semaphore_mem>>
    %84 = tpu.memref_squeeze %83 : memref<1x!tpu.dma_semaphore, #tpu.memory_space<semaphore_mem>> -> memref<!tpu.dma_semaphore, #tpu.memory_space<semaphore_mem>>
    tpu.enqueue_dma source(%81 : memref<1x32xf32, #tpu.memory_space<any>>) target(%82 : memref<1x32xf32, #tpu.memory_space<vmem>>) target_semaphore(%84 : memref<!tpu.dma_semaphore, #tpu.memory_space<semaphore_mem>>)
    %c12_i32 = arith.constant 12 : i32
    %85 = arith.addi %0, %c12_i32 : i32
    %86 = arith.index_cast %85 : i32 to index
    %87 = memref.load %arg1[%86] : memref<16xi32, #tpu.memory_space<smem>>
    %c12_i32_48 = arith.constant 12 : i32
    %c0_i32_49 = arith.constant 0 : i32
    %88 = tpu.memref_slice %arg6[%87, %c0_i32_49] : memref<64x32xf32, #tpu.memory_space<any>> -> memref<1x32xf32, #tpu.memory_space<any>>
    %c12_i32_50 = arith.constant 12 : i32
    %c0_i32_51 = arith.constant 0 : i32
    %89 = tpu.memref_slice %arg21[%c12_i32_50, %c0_i32_51] : memref<16x32xf32, #tpu.memory_space<vmem>> -> memref<1x32xf32, #tpu.memory_space<vmem>>
    %90 = tpu.memref_slice %arg22[%c12_i32_48] : memref<16x!tpu.dma_semaphore, #tpu.memory_space<semaphore_mem>> -> memref<1x!tpu.dma_semaphore, #tpu.memory_space<semaphore_mem>>
    %91 = tpu.memref_squeeze %90 : memref<1x!tpu.dma_semaphore, #tpu.memory_space<semaphore_mem>> -> memref<!tpu.dma_semaphore, #tpu.memory_space<semaphore_mem>>
    tpu.enqueue_dma source(%88 : memref<1x32xf32, #tpu.memory_space<any>>) target(%89 : memref<1x32xf32, #tpu.memory_space<vmem>>) target_semaphore(%91 : memref<!tpu.dma_semaphore, #tpu.memory_space<semaphore_mem>>)
    %c13_i32 = arith.constant 13 : i32
    %92 = arith.addi %0, %c13_i32 : i32
    %93 = arith.index_cast %92 : i32 to index
    %94 = memref.load %arg1[%93] : memref<16xi32, #tpu.memory_space<smem>>
    %c13_i32_52 = arith.constant 13 : i32
    %c0_i32_53 = arith.constant 0 : i32
    %95 = tpu.memref_slice %arg6[%94, %c0_i32_53] : memref<64x32xf32, #tpu.memory_space<any>> -> memref<1x32xf32, #tpu.memory_space<any>>
    %c13_i32_54 = arith.constant 13 : i32
    %c0_i32_55 = arith.constant 0 : i32
    %96 = tpu.memref_slice %arg21[%c13_i32_54, %c0_i32_55] : memref<16x32xf32, #tpu.memory_space<vmem>> -> memref<1x32xf32, #tpu.memory_space<vmem>>
    %97 = tpu.memref_slice %arg22[%c13_i32_52] : memref<16x!tpu.dma_semaphore, #tpu.memory_space<semaphore_mem>> -> memref<1x!tpu.dma_semaphore, #tpu.memory_space<semaphore_mem>>
    %98 = tpu.memref_squeeze %97 : memref<1x!tpu.dma_semaphore, #tpu.memory_space<semaphore_mem>> -> memref<!tpu.dma_semaphore, #tpu.memory_space<semaphore_mem>>
    tpu.enqueue_dma source(%95 : memref<1x32xf32, #tpu.memory_space<any>>) target(%96 : memref<1x32xf32, #tpu.memory_space<vmem>>) target_semaphore(%98 : memref<!tpu.dma_semaphore, #tpu.memory_space<semaphore_mem>>)
    %c14_i32 = arith.constant 14 : i32
    %99 = arith.addi %0, %c14_i32 : i32
    %100 = arith.index_cast %99 : i32 to index
    %101 = memref.load %arg1[%100] : memref<16xi32, #tpu.memory_space<smem>>
    %c14_i32_56 = arith.constant 14 : i32
    %c0_i32_57 = arith.constant 0 : i32
    %102 = tpu.memref_slice %arg6[%101, %c0_i32_57] : memref<64x32xf32, #tpu.memory_space<any>> -> memref<1x32xf32, #tpu.memory_space<any>>
    %c14_i32_58 = arith.constant 14 : i32
    %c0_i32_59 = arith.constant 0 : i32
    %103 = tpu.memref_slice %arg21[%c14_i32_58, %c0_i32_59] : memref<16x32xf32, #tpu.memory_space<vmem>> -> memref<1x32xf32, #tpu.memory_space<vmem>>
    %104 = tpu.memref_slice %arg22[%c14_i32_56] : memref<16x!tpu.dma_semaphore, #tpu.memory_space<semaphore_mem>> -> memref<1x!tpu.dma_semaphore, #tpu.memory_space<semaphore_mem>>
    %105 = tpu.memref_squeeze %104 : memref<1x!tpu.dma_semaphore, #tpu.memory_space<semaphore_mem>> -> memref<!tpu.dma_semaphore, #tpu.memory_space<semaphore_mem>>
    tpu.enqueue_dma source(%102 : memref<1x32xf32, #tpu.memory_space<any>>) target(%103 : memref<1x32xf32, #tpu.memory_space<vmem>>) target_semaphore(%105 : memref<!tpu.dma_semaphore, #tpu.memory_space<semaphore_mem>>)
    %c15_i32 = arith.constant 15 : i32
    %106 = arith.addi %0, %c15_i32 : i32
    %107 = arith.index_cast %106 : i32 to index
    %108 = memref.load %arg1[%107] : memref<16xi32, #tpu.memory_space<smem>>
    %c15_i32_60 = arith.constant 15 : i32
    %c0_i32_61 = arith.constant 0 : i32
    %109 = tpu.memref_slice %arg6[%108, %c0_i32_61] : memref<64x32xf32, #tpu.memory_space<any>> -> memref<1x32xf32, #tpu.memory_space<any>>
    %c15_i32_62 = arith.constant 15 : i32
    %c0_i32_63 = arith.constant 0 : i32
    %110 = tpu.memref_slice %arg21[%c15_i32_62, %c0_i32_63] : memref<16x32xf32, #tpu.memory_space<vmem>> -> memref<1x32xf32, #tpu.memory_space<vmem>>
    %111 = tpu.memref_slice %arg22[%c15_i32_60] : memref<16x!tpu.dma_semaphore, #tpu.memory_space<semaphore_mem>> -> memref<1x!tpu.dma_semaphore, #tpu.memory_space<semaphore_mem>>
    %112 = tpu.memref_squeeze %111 : memref<1x!tpu.dma_semaphore, #tpu.memory_space<semaphore_mem>> -> memref<!tpu.dma_semaphore, #tpu.memory_space<semaphore_mem>>
    tpu.enqueue_dma source(%109 : memref<1x32xf32, #tpu.memory_space<any>>) target(%110 : memref<1x32xf32, #tpu.memory_space<vmem>>) target_semaphore(%112 : memref<!tpu.dma_semaphore, #tpu.memory_space<semaphore_mem>>)
    %c0 = arith.constant 0 : index
    %c0_64 = arith.constant 0 : index
    %113 = vector.load %arg2[%c0, %c0_64] : memref<16x32xf32, #tpu.memory_space<vmem>>, vector<16x32xf32>
    %114 = arith.truncf %113 : vector<16x32xf32> to vector<16x32xbf16>
    %c0_65 = arith.constant 0 : index
    %c0_66 = arith.constant 0 : index
    %c0_67 = arith.constant 0 : index
    %115 = vector.load %arg8[%c0_65, %c0_66, %c0_67] : memref<4x32x8xbf16, #tpu.memory_space<vmem>>, vector<1x32x8xbf16>
    %116 = vector.shape_cast %115 : vector<1x32x8xbf16> to vector<32x8xbf16>
    %cst = arith.constant dense<0.000000e+00> : vector<16x8xf32>
    %117 = tpu.matmul %114, %116, %cst {dimension_numbers = #tpu.dot_dimension_numbers<[1], [0], [0], [1], [0, 0, 1, 1], [], []>} : vector<16x32xbf16>, vector<32x8xbf16>, vector<16x8xf32> -> vector<16x8xf32>
    %c0_68 = arith.constant 0 : index
    %c0_69 = arith.constant 0 : index
    %c0_70 = arith.constant 0 : index
    %118 = vector.load %arg11[%c0_68, %c0_69, %c0_70] : memref<4x1x8xf32, #tpu.memory_space<vmem>>, vector<1x1x8xf32>
    %119 = vector.shape_cast %118 : vector<1x1x8xf32> to vector<1x8xf32>
    %120 = vector.broadcast %119 : vector<1x8xf32> to vector<16x8xf32>
    %121 = arith.addf %117, %120 : vector<16x8xf32>
    %c1 = arith.constant 1 : index
    %c0_71 = arith.constant 0 : index
    %c0_72 = arith.constant 0 : index
    %122 = vector.load %arg8[%c1, %c0_71, %c0_72] : memref<4x32x8xbf16, #tpu.memory_space<vmem>>, vector<1x32x8xbf16>
    %123 = vector.shape_cast %122 : vector<1x32x8xbf16> to vector<32x8xbf16>
    %cst_73 = arith.constant dense<0.000000e+00> : vector<16x8xf32>
    %124 = tpu.matmul %114, %123, %cst_73 {dimension_numbers = #tpu.dot_dimension_numbers<[1], [0], [0], [1], [0, 0, 1, 1], [], []>} : vector<16x32xbf16>, vector<32x8xbf16>, vector<16x8xf32> -> vector<16x8xf32>
    %c1_74 = arith.constant 1 : index
    %c0_75 = arith.constant 0 : index
    %c0_76 = arith.constant 0 : index
    %125 = vector.load %arg11[%c1_74, %c0_75, %c0_76] : memref<4x1x8xf32, #tpu.memory_space<vmem>>, vector<1x1x8xf32>
    %126 = vector.shape_cast %125 : vector<1x1x8xf32> to vector<1x8xf32>
    %127 = vector.broadcast %126 : vector<1x8xf32> to vector<16x8xf32>
    %128 = arith.addf %124, %127 : vector<16x8xf32>
    %c2 = arith.constant 2 : index
    %c0_77 = arith.constant 0 : index
    %c0_78 = arith.constant 0 : index
    %129 = vector.load %arg8[%c2, %c0_77, %c0_78] : memref<4x32x8xbf16, #tpu.memory_space<vmem>>, vector<1x32x8xbf16>
    %130 = vector.shape_cast %129 : vector<1x32x8xbf16> to vector<32x8xbf16>
    %cst_79 = arith.constant dense<0.000000e+00> : vector<16x8xf32>
    %131 = tpu.matmul %114, %130, %cst_79 {dimension_numbers = #tpu.dot_dimension_numbers<[1], [0], [0], [1], [0, 0, 1, 1], [], []>} : vector<16x32xbf16>, vector<32x8xbf16>, vector<16x8xf32> -> vector<16x8xf32>
    %c2_80 = arith.constant 2 : index
    %c0_81 = arith.constant 0 : index
    %c0_82 = arith.constant 0 : index
    %132 = vector.load %arg11[%c2_80, %c0_81, %c0_82] : memref<4x1x8xf32, #tpu.memory_space<vmem>>, vector<1x1x8xf32>
    %133 = vector.shape_cast %132 : vector<1x1x8xf32> to vector<1x8xf32>
    %134 = vector.broadcast %133 : vector<1x8xf32> to vector<16x8xf32>
    %135 = arith.addf %131, %134 : vector<16x8xf32>
    %c3 = arith.constant 3 : index
    %c0_83 = arith.constant 0 : index
    %c0_84 = arith.constant 0 : index
    %136 = vector.load %arg8[%c3, %c0_83, %c0_84] : memref<4x32x8xbf16, #tpu.memory_space<vmem>>, vector<1x32x8xbf16>
    %137 = vector.shape_cast %136 : vector<1x32x8xbf16> to vector<32x8xbf16>
    %cst_85 = arith.constant dense<0.000000e+00> : vector<16x8xf32>
    %138 = tpu.matmul %114, %137, %cst_85 {dimension_numbers = #tpu.dot_dimension_numbers<[1], [0], [0], [1], [0, 0, 1, 1], [], []>} : vector<16x32xbf16>, vector<32x8xbf16>, vector<16x8xf32> -> vector<16x8xf32>
    %c3_86 = arith.constant 3 : index
    %c0_87 = arith.constant 0 : index
    %c0_88 = arith.constant 0 : index
    %139 = vector.load %arg11[%c3_86, %c0_87, %c0_88] : memref<4x1x8xf32, #tpu.memory_space<vmem>>, vector<1x1x8xf32>
    %140 = vector.shape_cast %139 : vector<1x1x8xf32> to vector<1x8xf32>
    %141 = vector.broadcast %140 : vector<1x8xf32> to vector<16x8xf32>
    %142 = arith.addf %138, %141 : vector<16x8xf32>
    %c0_89 = arith.constant 0 : index
    %c0_90 = arith.constant 0 : index
    %143 = vector.load %arg3[%c0_89, %c0_90] : memref<8x32xf32, #tpu.memory_space<vmem>>, vector<8x32xf32>
    %144 = tpu.concatenate %143, %143 in 0 : vector<8x32xf32>, vector<8x32xf32> -> vector<16x32xf32>
    %c0_i32_91 = arith.constant 0 : i32
    %c0_i32_92 = arith.constant 0 : i32
    %145 = tpu.memref_slice %arg6[%3, %c0_i32_92] : memref<64x32xf32, #tpu.memory_space<any>> -> memref<1x32xf32, #tpu.memory_space<any>>
    %c0_i32_93 = arith.constant 0 : i32
    %c0_i32_94 = arith.constant 0 : i32
    %146 = tpu.memref_slice %arg21[%c0_i32_93, %c0_i32_94] : memref<16x32xf32, #tpu.memory_space<vmem>> -> memref<1x32xf32, #tpu.memory_space<vmem>>
    %147 = tpu.memref_slice %arg22[%c0_i32_91] : memref<16x!tpu.dma_semaphore, #tpu.memory_space<semaphore_mem>> -> memref<1x!tpu.dma_semaphore, #tpu.memory_space<semaphore_mem>>
    %148 = tpu.memref_squeeze %147 : memref<1x!tpu.dma_semaphore, #tpu.memory_space<semaphore_mem>> -> memref<!tpu.dma_semaphore, #tpu.memory_space<semaphore_mem>>
    tpu.wait_dma2 semaphore(%148 : memref<!tpu.dma_semaphore, #tpu.memory_space<semaphore_mem>>) src(%145 : memref<1x32xf32, #tpu.memory_space<any>>) dst(%146 : memref<1x32xf32, #tpu.memory_space<vmem>>)
    %c1_i32_95 = arith.constant 1 : i32
    %c0_i32_96 = arith.constant 0 : i32
    %149 = tpu.memref_slice %arg6[%10, %c0_i32_96] : memref<64x32xf32, #tpu.memory_space<any>> -> memref<1x32xf32, #tpu.memory_space<any>>
    %c1_i32_97 = arith.constant 1 : i32
    %c0_i32_98 = arith.constant 0 : i32
    %150 = tpu.memref_slice %arg21[%c1_i32_97, %c0_i32_98] : memref<16x32xf32, #tpu.memory_space<vmem>> -> memref<1x32xf32, #tpu.memory_space<vmem>>
    %151 = tpu.memref_slice %arg22[%c1_i32_95] : memref<16x!tpu.dma_semaphore, #tpu.memory_space<semaphore_mem>> -> memref<1x!tpu.dma_semaphore, #tpu.memory_space<semaphore_mem>>
    %152 = tpu.memref_squeeze %151 : memref<1x!tpu.dma_semaphore, #tpu.memory_space<semaphore_mem>> -> memref<!tpu.dma_semaphore, #tpu.memory_space<semaphore_mem>>
    tpu.wait_dma2 semaphore(%152 : memref<!tpu.dma_semaphore, #tpu.memory_space<semaphore_mem>>) src(%149 : memref<1x32xf32, #tpu.memory_space<any>>) dst(%150 : memref<1x32xf32, #tpu.memory_space<vmem>>)
    %c2_i32_99 = arith.constant 2 : i32
    %c0_i32_100 = arith.constant 0 : i32
    %153 = tpu.memref_slice %arg6[%17, %c0_i32_100] : memref<64x32xf32, #tpu.memory_space<any>> -> memref<1x32xf32, #tpu.memory_space<any>>
    %c2_i32_101 = arith.constant 2 : i32
    %c0_i32_102 = arith.constant 0 : i32
    %154 = tpu.memref_slice %arg21[%c2_i32_101, %c0_i32_102] : memref<16x32xf32, #tpu.memory_space<vmem>> -> memref<1x32xf32, #tpu.memory_space<vmem>>
    %155 = tpu.memref_slice %arg22[%c2_i32_99] : memref<16x!tpu.dma_semaphore, #tpu.memory_space<semaphore_mem>> -> memref<1x!tpu.dma_semaphore, #tpu.memory_space<semaphore_mem>>
    %156 = tpu.memref_squeeze %155 : memref<1x!tpu.dma_semaphore, #tpu.memory_space<semaphore_mem>> -> memref<!tpu.dma_semaphore, #tpu.memory_space<semaphore_mem>>
    tpu.wait_dma2 semaphore(%156 : memref<!tpu.dma_semaphore, #tpu.memory_space<semaphore_mem>>) src(%153 : memref<1x32xf32, #tpu.memory_space<any>>) dst(%154 : memref<1x32xf32, #tpu.memory_space<vmem>>)
    %c3_i32_103 = arith.constant 3 : i32
    %c0_i32_104 = arith.constant 0 : i32
    %157 = tpu.memref_slice %arg6[%24, %c0_i32_104] : memref<64x32xf32, #tpu.memory_space<any>> -> memref<1x32xf32, #tpu.memory_space<any>>
    %c3_i32_105 = arith.constant 3 : i32
    %c0_i32_106 = arith.constant 0 : i32
    %158 = tpu.memref_slice %arg21[%c3_i32_105, %c0_i32_106] : memref<16x32xf32, #tpu.memory_space<vmem>> -> memref<1x32xf32, #tpu.memory_space<vmem>>
    %159 = tpu.memref_slice %arg22[%c3_i32_103] : memref<16x!tpu.dma_semaphore, #tpu.memory_space<semaphore_mem>> -> memref<1x!tpu.dma_semaphore, #tpu.memory_space<semaphore_mem>>
    %160 = tpu.memref_squeeze %159 : memref<1x!tpu.dma_semaphore, #tpu.memory_space<semaphore_mem>> -> memref<!tpu.dma_semaphore, #tpu.memory_space<semaphore_mem>>
    tpu.wait_dma2 semaphore(%160 : memref<!tpu.dma_semaphore, #tpu.memory_space<semaphore_mem>>) src(%157 : memref<1x32xf32, #tpu.memory_space<any>>) dst(%158 : memref<1x32xf32, #tpu.memory_space<vmem>>)
    %c4_i32_107 = arith.constant 4 : i32
    %c0_i32_108 = arith.constant 0 : i32
    %161 = tpu.memref_slice %arg6[%31, %c0_i32_108] : memref<64x32xf32, #tpu.memory_space<any>> -> memref<1x32xf32, #tpu.memory_space<any>>
    %c4_i32_109 = arith.constant 4 : i32
    %c0_i32_110 = arith.constant 0 : i32
    %162 = tpu.memref_slice %arg21[%c4_i32_109, %c0_i32_110] : memref<16x32xf32, #tpu.memory_space<vmem>> -> memref<1x32xf32, #tpu.memory_space<vmem>>
    %163 = tpu.memref_slice %arg22[%c4_i32_107] : memref<16x!tpu.dma_semaphore, #tpu.memory_space<semaphore_mem>> -> memref<1x!tpu.dma_semaphore, #tpu.memory_space<semaphore_mem>>
    %164 = tpu.memref_squeeze %163 : memref<1x!tpu.dma_semaphore, #tpu.memory_space<semaphore_mem>> -> memref<!tpu.dma_semaphore, #tpu.memory_space<semaphore_mem>>
    tpu.wait_dma2 semaphore(%164 : memref<!tpu.dma_semaphore, #tpu.memory_space<semaphore_mem>>) src(%161 : memref<1x32xf32, #tpu.memory_space<any>>) dst(%162 : memref<1x32xf32, #tpu.memory_space<vmem>>)
    %c5_i32_111 = arith.constant 5 : i32
    %c0_i32_112 = arith.constant 0 : i32
    %165 = tpu.memref_slice %arg6[%38, %c0_i32_112] : memref<64x32xf32, #tpu.memory_space<any>> -> memref<1x32xf32, #tpu.memory_space<any>>
    %c5_i32_113 = arith.constant 5 : i32
    %c0_i32_114 = arith.constant 0 : i32
    %166 = tpu.memref_slice %arg21[%c5_i32_113, %c0_i32_114] : memref<16x32xf32, #tpu.memory_space<vmem>> -> memref<1x32xf32, #tpu.memory_space<vmem>>
    %167 = tpu.memref_slice %arg22[%c5_i32_111] : memref<16x!tpu.dma_semaphore, #tpu.memory_space<semaphore_mem>> -> memref<1x!tpu.dma_semaphore, #tpu.memory_space<semaphore_mem>>
    %168 = tpu.memref_squeeze %167 : memref<1x!tpu.dma_semaphore, #tpu.memory_space<semaphore_mem>> -> memref<!tpu.dma_semaphore, #tpu.memory_space<semaphore_mem>>
    tpu.wait_dma2 semaphore(%168 : memref<!tpu.dma_semaphore, #tpu.memory_space<semaphore_mem>>) src(%165 : memref<1x32xf32, #tpu.memory_space<any>>) dst(%166 : memref<1x32xf32, #tpu.memory_space<vmem>>)
    %c6_i32_115 = arith.constant 6 : i32
    %c0_i32_116 = arith.constant 0 : i32
    %169 = tpu.memref_slice %arg6[%45, %c0_i32_116] : memref<64x32xf32, #tpu.memory_space<any>> -> memref<1x32xf32, #tpu.memory_space<any>>
    %c6_i32_117 = arith.constant 6 : i32
    %c0_i32_118 = arith.constant 0 : i32
    %170 = tpu.memref_slice %arg21[%c6_i32_117, %c0_i32_118] : memref<16x32xf32, #tpu.memory_space<vmem>> -> memref<1x32xf32, #tpu.memory_space<vmem>>
    %171 = tpu.memref_slice %arg22[%c6_i32_115] : memref<16x!tpu.dma_semaphore, #tpu.memory_space<semaphore_mem>> -> memref<1x!tpu.dma_semaphore, #tpu.memory_space<semaphore_mem>>
    %172 = tpu.memref_squeeze %171 : memref<1x!tpu.dma_semaphore, #tpu.memory_space<semaphore_mem>> -> memref<!tpu.dma_semaphore, #tpu.memory_space<semaphore_mem>>
    tpu.wait_dma2 semaphore(%172 : memref<!tpu.dma_semaphore, #tpu.memory_space<semaphore_mem>>) src(%169 : memref<1x32xf32, #tpu.memory_space<any>>) dst(%170 : memref<1x32xf32, #tpu.memory_space<vmem>>)
    %c7_i32_119 = arith.constant 7 : i32
    %c0_i32_120 = arith.constant 0 : i32
    %173 = tpu.memref_slice %arg6[%52, %c0_i32_120] : memref<64x32xf32, #tpu.memory_space<any>> -> memref<1x32xf32, #tpu.memory_space<any>>
    %c7_i32_121 = arith.constant 7 : i32
    %c0_i32_122 = arith.constant 0 : i32
    %174 = tpu.memref_slice %arg21[%c7_i32_121, %c0_i32_122] : memref<16x32xf32, #tpu.memory_space<vmem>> -> memref<1x32xf32, #tpu.memory_space<vmem>>
    %175 = tpu.memref_slice %arg22[%c7_i32_119] : memref<16x!tpu.dma_semaphore, #tpu.memory_space<semaphore_mem>> -> memref<1x!tpu.dma_semaphore, #tpu.memory_space<semaphore_mem>>
    %176 = tpu.memref_squeeze %175 : memref<1x!tpu.dma_semaphore, #tpu.memory_space<semaphore_mem>> -> memref<!tpu.dma_semaphore, #tpu.memory_space<semaphore_mem>>
    tpu.wait_dma2 semaphore(%176 : memref<!tpu.dma_semaphore, #tpu.memory_space<semaphore_mem>>) src(%173 : memref<1x32xf32, #tpu.memory_space<any>>) dst(%174 : memref<1x32xf32, #tpu.memory_space<vmem>>)
    %c8_i32_123 = arith.constant 8 : i32
    %c0_i32_124 = arith.constant 0 : i32
    %177 = tpu.memref_slice %arg6[%59, %c0_i32_124] : memref<64x32xf32, #tpu.memory_space<any>> -> memref<1x32xf32, #tpu.memory_space<any>>
    %c8_i32_125 = arith.constant 8 : i32
    %c0_i32_126 = arith.constant 0 : i32
    %178 = tpu.memref_slice %arg21[%c8_i32_125, %c0_i32_126] : memref<16x32xf32, #tpu.memory_space<vmem>> -> memref<1x32xf32, #tpu.memory_space<vmem>>
    %179 = tpu.memref_slice %arg22[%c8_i32_123] : memref<16x!tpu.dma_semaphore, #tpu.memory_space<semaphore_mem>> -> memref<1x!tpu.dma_semaphore, #tpu.memory_space<semaphore_mem>>
    %180 = tpu.memref_squeeze %179 : memref<1x!tpu.dma_semaphore, #tpu.memory_space<semaphore_mem>> -> memref<!tpu.dma_semaphore, #tpu.memory_space<semaphore_mem>>
    tpu.wait_dma2 semaphore(%180 : memref<!tpu.dma_semaphore, #tpu.memory_space<semaphore_mem>>) src(%177 : memref<1x32xf32, #tpu.memory_space<any>>) dst(%178 : memref<1x32xf32, #tpu.memory_space<vmem>>)
    %c9_i32_127 = arith.constant 9 : i32
    %c0_i32_128 = arith.constant 0 : i32
    %181 = tpu.memref_slice %arg6[%66, %c0_i32_128] : memref<64x32xf32, #tpu.memory_space<any>> -> memref<1x32xf32, #tpu.memory_space<any>>
    %c9_i32_129 = arith.constant 9 : i32
    %c0_i32_130 = arith.constant 0 : i32
    %182 = tpu.memref_slice %arg21[%c9_i32_129, %c0_i32_130] : memref<16x32xf32, #tpu.memory_space<vmem>> -> memref<1x32xf32, #tpu.memory_space<vmem>>
    %183 = tpu.memref_slice %arg22[%c9_i32_127] : memref<16x!tpu.dma_semaphore, #tpu.memory_space<semaphore_mem>> -> memref<1x!tpu.dma_semaphore, #tpu.memory_space<semaphore_mem>>
    %184 = tpu.memref_squeeze %183 : memref<1x!tpu.dma_semaphore, #tpu.memory_space<semaphore_mem>> -> memref<!tpu.dma_semaphore, #tpu.memory_space<semaphore_mem>>
    tpu.wait_dma2 semaphore(%184 : memref<!tpu.dma_semaphore, #tpu.memory_space<semaphore_mem>>) src(%181 : memref<1x32xf32, #tpu.memory_space<any>>) dst(%182 : memref<1x32xf32, #tpu.memory_space<vmem>>)
    %c10_i32_131 = arith.constant 10 : i32
    %c0_i32_132 = arith.constant 0 : i32
    %185 = tpu.memref_slice %arg6[%73, %c0_i32_132] : memref<64x32xf32, #tpu.memory_space<any>> -> memref<1x32xf32, #tpu.memory_space<any>>
    %c10_i32_133 = arith.constant 10 : i32
    %c0_i32_134 = arith.constant 0 : i32
    %186 = tpu.memref_slice %arg21[%c10_i32_133, %c0_i32_134] : memref<16x32xf32, #tpu.memory_space<vmem>> -> memref<1x32xf32, #tpu.memory_space<vmem>>
    %187 = tpu.memref_slice %arg22[%c10_i32_131] : memref<16x!tpu.dma_semaphore, #tpu.memory_space<semaphore_mem>> -> memref<1x!tpu.dma_semaphore, #tpu.memory_space<semaphore_mem>>
    %188 = tpu.memref_squeeze %187 : memref<1x!tpu.dma_semaphore, #tpu.memory_space<semaphore_mem>> -> memref<!tpu.dma_semaphore, #tpu.memory_space<semaphore_mem>>
    tpu.wait_dma2 semaphore(%188 : memref<!tpu.dma_semaphore, #tpu.memory_space<semaphore_mem>>) src(%185 : memref<1x32xf32, #tpu.memory_space<any>>) dst(%186 : memref<1x32xf32, #tpu.memory_space<vmem>>)
    %c11_i32_135 = arith.constant 11 : i32
    %c0_i32_136 = arith.constant 0 : i32
    %189 = tpu.memref_slice %arg6[%80, %c0_i32_136] : memref<64x32xf32, #tpu.memory_space<any>> -> memref<1x32xf32, #tpu.memory_space<any>>
    %c11_i32_137 = arith.constant 11 : i32
    %c0_i32_138 = arith.constant 0 : i32
    %190 = tpu.memref_slice %arg21[%c11_i32_137, %c0_i32_138] : memref<16x32xf32, #tpu.memory_space<vmem>> -> memref<1x32xf32, #tpu.memory_space<vmem>>
    %191 = tpu.memref_slice %arg22[%c11_i32_135] : memref<16x!tpu.dma_semaphore, #tpu.memory_space<semaphore_mem>> -> memref<1x!tpu.dma_semaphore, #tpu.memory_space<semaphore_mem>>
    %192 = tpu.memref_squeeze %191 : memref<1x!tpu.dma_semaphore, #tpu.memory_space<semaphore_mem>> -> memref<!tpu.dma_semaphore, #tpu.memory_space<semaphore_mem>>
    tpu.wait_dma2 semaphore(%192 : memref<!tpu.dma_semaphore, #tpu.memory_space<semaphore_mem>>) src(%189 : memref<1x32xf32, #tpu.memory_space<any>>) dst(%190 : memref<1x32xf32, #tpu.memory_space<vmem>>)
    %c12_i32_139 = arith.constant 12 : i32
    %c0_i32_140 = arith.constant 0 : i32
    %193 = tpu.memref_slice %arg6[%87, %c0_i32_140] : memref<64x32xf32, #tpu.memory_space<any>> -> memref<1x32xf32, #tpu.memory_space<any>>
    %c12_i32_141 = arith.constant 12 : i32
    %c0_i32_142 = arith.constant 0 : i32
    %194 = tpu.memref_slice %arg21[%c12_i32_141, %c0_i32_142] : memref<16x32xf32, #tpu.memory_space<vmem>> -> memref<1x32xf32, #tpu.memory_space<vmem>>
    %195 = tpu.memref_slice %arg22[%c12_i32_139] : memref<16x!tpu.dma_semaphore, #tpu.memory_space<semaphore_mem>> -> memref<1x!tpu.dma_semaphore, #tpu.memory_space<semaphore_mem>>
    %196 = tpu.memref_squeeze %195 : memref<1x!tpu.dma_semaphore, #tpu.memory_space<semaphore_mem>> -> memref<!tpu.dma_semaphore, #tpu.memory_space<semaphore_mem>>
    tpu.wait_dma2 semaphore(%196 : memref<!tpu.dma_semaphore, #tpu.memory_space<semaphore_mem>>) src(%193 : memref<1x32xf32, #tpu.memory_space<any>>) dst(%194 : memref<1x32xf32, #tpu.memory_space<vmem>>)
    %c13_i32_143 = arith.constant 13 : i32
    %c0_i32_144 = arith.constant 0 : i32
    %197 = tpu.memref_slice %arg6[%94, %c0_i32_144] : memref<64x32xf32, #tpu.memory_space<any>> -> memref<1x32xf32, #tpu.memory_space<any>>
    %c13_i32_145 = arith.constant 13 : i32
    %c0_i32_146 = arith.constant 0 : i32
    %198 = tpu.memref_slice %arg21[%c13_i32_145, %c0_i32_146] : memref<16x32xf32, #tpu.memory_space<vmem>> -> memref<1x32xf32, #tpu.memory_space<vmem>>
    %199 = tpu.memref_slice %arg22[%c13_i32_143] : memref<16x!tpu.dma_semaphore, #tpu.memory_space<semaphore_mem>> -> memref<1x!tpu.dma_semaphore, #tpu.memory_space<semaphore_mem>>
    %200 = tpu.memref_squeeze %199 : memref<1x!tpu.dma_semaphore, #tpu.memory_space<semaphore_mem>> -> memref<!tpu.dma_semaphore, #tpu.memory_space<semaphore_mem>>
    tpu.wait_dma2 semaphore(%200 : memref<!tpu.dma_semaphore, #tpu.memory_space<semaphore_mem>>) src(%197 : memref<1x32xf32, #tpu.memory_space<any>>) dst(%198 : memref<1x32xf32, #tpu.memory_space<vmem>>)
    %c14_i32_147 = arith.constant 14 : i32
    %c0_i32_148 = arith.constant 0 : i32
    %201 = tpu.memref_slice %arg6[%101, %c0_i32_148] : memref<64x32xf32, #tpu.memory_space<any>> -> memref<1x32xf32, #tpu.memory_space<any>>
    %c14_i32_149 = arith.constant 14 : i32
    %c0_i32_150 = arith.constant 0 : i32
    %202 = tpu.memref_slice %arg21[%c14_i32_149, %c0_i32_150] : memref<16x32xf32, #tpu.memory_space<vmem>> -> memref<1x32xf32, #tpu.memory_space<vmem>>
    %203 = tpu.memref_slice %arg22[%c14_i32_147] : memref<16x!tpu.dma_semaphore, #tpu.memory_space<semaphore_mem>> -> memref<1x!tpu.dma_semaphore, #tpu.memory_space<semaphore_mem>>
    %204 = tpu.memref_squeeze %203 : memref<1x!tpu.dma_semaphore, #tpu.memory_space<semaphore_mem>> -> memref<!tpu.dma_semaphore, #tpu.memory_space<semaphore_mem>>
    tpu.wait_dma2 semaphore(%204 : memref<!tpu.dma_semaphore, #tpu.memory_space<semaphore_mem>>) src(%201 : memref<1x32xf32, #tpu.memory_space<any>>) dst(%202 : memref<1x32xf32, #tpu.memory_space<vmem>>)
    %c15_i32_151 = arith.constant 15 : i32
    %c0_i32_152 = arith.constant 0 : i32
    %205 = tpu.memref_slice %arg6[%108, %c0_i32_152] : memref<64x32xf32, #tpu.memory_space<any>> -> memref<1x32xf32, #tpu.memory_space<any>>
    %c15_i32_153 = arith.constant 15 : i32
    %c0_i32_154 = arith.constant 0 : i32
    %206 = tpu.memref_slice %arg21[%c15_i32_153, %c0_i32_154] : memref<16x32xf32, #tpu.memory_space<vmem>> -> memref<1x32xf32, #tpu.memory_space<vmem>>
    %207 = tpu.memref_slice %arg22[%c15_i32_151] : memref<16x!tpu.dma_semaphore, #tpu.memory_space<semaphore_mem>> -> memref<1x!tpu.dma_semaphore, #tpu.memory_space<semaphore_mem>>
    %208 = tpu.memref_squeeze %207 : memref<1x!tpu.dma_semaphore, #tpu.memory_space<semaphore_mem>> -> memref<!tpu.dma_semaphore, #tpu.memory_space<semaphore_mem>>
    tpu.wait_dma2 semaphore(%208 : memref<!tpu.dma_semaphore, #tpu.memory_space<semaphore_mem>>) src(%205 : memref<1x32xf32, #tpu.memory_space<any>>) dst(%206 : memref<1x32xf32, #tpu.memory_space<vmem>>)
    %c0_155 = arith.constant 0 : index
    %c0_156 = arith.constant 0 : index
    %209 = vector.load %arg21[%c0_155, %c0_156] : memref<16x32xf32, #tpu.memory_space<vmem>>, vector<16x32xf32>
    %210 = arith.addf %209, %144 : vector<16x32xf32>
    %cst_157 = arith.constant dense<0.000000e+00> : vector<16xf32>
    %211 = vector.multi_reduction <add>, %210, %cst_157 [1] : vector<16x32xf32> to vector<16xf32>
    %212 = vector.shape_cast %211 : vector<16xf32> to vector<16x1xf32>
    %cst_158 = arith.constant 3.200000e+01 : f32
    %213 = vector.broadcast %cst_158 : f32 to vector<16x1xf32>
    %214 = arith.divf %212, %213 : vector<16x1xf32>
    %215 = vector.broadcast %214 : vector<16x1xf32> to vector<16x32xf32>
    %216 = arith.subf %210, %215 : vector<16x32xf32>
    %217 = arith.mulf %216, %216 : vector<16x32xf32>
    %cst_159 = arith.constant dense<0.000000e+00> : vector<16xf32>
    %218 = vector.multi_reduction <add>, %217, %cst_159 [1] : vector<16x32xf32> to vector<16xf32>
    %219 = vector.shape_cast %218 : vector<16xf32> to vector<16x1xf32>
    %cst_160 = arith.constant 3.200000e+01 : f32
    %220 = vector.broadcast %cst_160 : f32 to vector<16x1xf32>
    %221 = arith.divf %219, %220 : vector<16x1xf32>
    %222 = vector.broadcast %214 : vector<16x1xf32> to vector<16x32xf32>
    %223 = arith.subf %210, %222 : vector<16x32xf32>
    %cst_161 = arith.constant 9.99999974E-6 : f32
    %224 = vector.broadcast %cst_161 : f32 to vector<16x1xf32>
    %225 = arith.addf %221, %224 : vector<16x1xf32>
    %226 = math.rsqrt %225 : vector<16x1xf32>
    %227 = vector.broadcast %226 : vector<16x1xf32> to vector<16x32xf32>
    %228 = arith.mulf %223, %227 : vector<16x32xf32>
    %c0_162 = arith.constant 0 : index
    %c0_163 = arith.constant 0 : index
    %229 = vector.load %arg4[%c0_162, %c0_163] : memref<1x32xf32, #tpu.memory_space<vmem>>, vector<1x32xf32>
    %230 = vector.broadcast %229 : vector<1x32xf32> to vector<16x32xf32>
    %231 = arith.mulf %228, %230 : vector<16x32xf32>
    %c0_164 = arith.constant 0 : index
    %c0_165 = arith.constant 0 : index
    %232 = vector.load %arg5[%c0_164, %c0_165] : memref<1x32xf32, #tpu.memory_space<vmem>>, vector<1x32xf32>
    %233 = vector.broadcast %232 : vector<1x32xf32> to vector<16x32xf32>
    %234 = arith.addf %231, %233 : vector<16x32xf32>
    %235 = arith.truncf %234 : vector<16x32xf32> to vector<16x32xbf16>
    %cst_166 = arith.constant 0.000000e+00 : f32
    %236 = vector.broadcast %cst_166 : f32 to vector<16x32xf32>
    %c0_167 = arith.constant 0 : index
    %c0_168 = arith.constant 0 : index
    %c0_169 = arith.constant 0 : index
    %237 = vector.load %arg7[%c0_167, %c0_168, %c0_169] : memref<4x32x8xbf16, #tpu.memory_space<vmem>>, vector<1x32x8xbf16>
    %238 = vector.shape_cast %237 : vector<1x32x8xbf16> to vector<32x8xbf16>
    %cst_170 = arith.constant dense<0.000000e+00> : vector<16x8xf32>
    %239 = tpu.matmul %235, %238, %cst_170 {dimension_numbers = #tpu.dot_dimension_numbers<[1], [0], [0], [1], [0, 0, 1, 1], [], []>} : vector<16x32xbf16>, vector<32x8xbf16>, vector<16x8xf32> -> vector<16x8xf32>
    %c0_171 = arith.constant 0 : index
    %c0_172 = arith.constant 0 : index
    %c0_173 = arith.constant 0 : index
    %240 = vector.load %arg10[%c0_171, %c0_172, %c0_173] : memref<4x1x8xf32, #tpu.memory_space<vmem>>, vector<1x1x8xf32>
    %241 = vector.shape_cast %240 : vector<1x1x8xf32> to vector<1x8xf32>
    %242 = vector.broadcast %241 : vector<1x8xf32> to vector<16x8xf32>
    %243 = arith.addf %239, %242 : vector<16x8xf32>
    %c0_174 = arith.constant 0 : index
    %c0_175 = arith.constant 0 : index
    %c0_176 = arith.constant 0 : index
    %244 = vector.load %arg9[%c0_174, %c0_175, %c0_176] : memref<4x32x8xbf16, #tpu.memory_space<vmem>>, vector<1x32x8xbf16>
    %245 = vector.shape_cast %244 : vector<1x32x8xbf16> to vector<32x8xbf16>
    %cst_177 = arith.constant dense<0.000000e+00> : vector<16x8xf32>
    %246 = tpu.matmul %235, %245, %cst_177 {dimension_numbers = #tpu.dot_dimension_numbers<[1], [0], [0], [1], [0, 0, 1, 1], [], []>} : vector<16x32xbf16>, vector<32x8xbf16>, vector<16x8xf32> -> vector<16x8xf32>
    %c0_178 = arith.constant 0 : index
    %c0_179 = arith.constant 0 : index
    %c0_180 = arith.constant 0 : index
    %247 = vector.load %arg12[%c0_178, %c0_179, %c0_180] : memref<4x1x8xf32, #tpu.memory_space<vmem>>, vector<1x1x8xf32>
    %248 = vector.shape_cast %247 : vector<1x1x8xf32> to vector<1x8xf32>
    %249 = vector.broadcast %248 : vector<1x8xf32> to vector<16x8xf32>
    %250 = arith.addf %246, %249 : vector<16x8xf32>
    %251 = vector.extract_strided_slice %243 {offsets = [0, 0], sizes = [8, 8], strides = [1, 1]} : vector<16x8xf32> to vector<8x8xf32>
    %252 = arith.truncf %251 : vector<8x8xf32> to vector<8x8xbf16>
    %253 = vector.extract_strided_slice %121 {offsets = [0, 0], sizes = [8, 8], strides = [1, 1]} : vector<16x8xf32> to vector<8x8xf32>
    %254 = arith.truncf %253 : vector<8x8xf32> to vector<8x8xbf16>
    %255 = vector.extract_strided_slice %250 {offsets = [0, 0], sizes = [8, 8], strides = [1, 1]} : vector<16x8xf32> to vector<8x8xf32>
    %256 = arith.truncf %255 : vector<8x8xf32> to vector<8x8xbf16>
    %cst_181 = arith.constant dense<0.000000e+00> : vector<8x8xf32>
    %257 = tpu.matmul %252, %254, %cst_181 {dimension_numbers = #tpu.dot_dimension_numbers<[1], [1], [0], [0], [0, 0, 1, 0], [], []>} : vector<8x8xbf16>, vector<8x8xbf16>, vector<8x8xf32> -> vector<8x8xf32>
    %cst_182 = arith.constant dense<0xFF800000> : vector<8xf32>
    %258 = vector.multi_reduction <maximumf>, %257, %cst_182 [1] : vector<8x8xf32> to vector<8xf32>
    %259 = vector.shape_cast %258 : vector<8xf32> to vector<8x1xf32>
    %260 = vector.broadcast %259 : vector<8x1xf32> to vector<8x8xf32>
    %261 = arith.subf %257, %260 : vector<8x8xf32>
    %262 = math.exp %261 : vector<8x8xf32>
    %cst_183 = arith.constant dense<0.000000e+00> : vector<8xf32>
    %263 = vector.multi_reduction <add>, %262, %cst_183 [1] : vector<8x8xf32> to vector<8xf32>
    %264 = vector.shape_cast %263 : vector<8xf32> to vector<8x1xf32>
    %265 = tpu.reciprocal %264 {approx = true} : vector<8x1xf32> -> vector<8x1xf32>
    %266 = vector.broadcast %265 : vector<8x1xf32> to vector<8x8xf32>
    %267 = arith.mulf %262, %266 : vector<8x8xf32>
    %268 = arith.truncf %267 : vector<8x8xf32> to vector<8x8xbf16>
    %cst_184 = arith.constant dense<0.000000e+00> : vector<8x8xf32>
    %269 = tpu.matmul %268, %256, %cst_184 {dimension_numbers = #tpu.dot_dimension_numbers<[1], [0], [0], [1], [0, 0, 1, 1], [], []>} : vector<8x8xbf16>, vector<8x8xbf16>, vector<8x8xf32> -> vector<8x8xf32>
    %270 = vector.extract_strided_slice %243 {offsets = [8, 0], sizes = [8, 8], strides = [1, 1]} : vector<16x8xf32> to vector<8x8xf32>
    %271 = arith.truncf %270 : vector<8x8xf32> to vector<8x8xbf16>
    %272 = vector.extract_strided_slice %121 {offsets = [8, 0], sizes = [8, 8], strides = [1, 1]} : vector<16x8xf32> to vector<8x8xf32>
    %273 = arith.truncf %272 : vector<8x8xf32> to vector<8x8xbf16>
    %274 = vector.extract_strided_slice %250 {offsets = [8, 0], sizes = [8, 8], strides = [1, 1]} : vector<16x8xf32> to vector<8x8xf32>
    %275 = arith.truncf %274 : vector<8x8xf32> to vector<8x8xbf16>
    %cst_185 = arith.constant dense<0.000000e+00> : vector<8x8xf32>
    %276 = tpu.matmul %271, %273, %cst_185 {dimension_numbers = #tpu.dot_dimension_numbers<[1], [1], [0], [0], [0, 0, 1, 0], [], []>} : vector<8x8xbf16>, vector<8x8xbf16>, vector<8x8xf32> -> vector<8x8xf32>
    %cst_186 = arith.constant dense<0xFF800000> : vector<8xf32>
    %277 = vector.multi_reduction <maximumf>, %276, %cst_186 [1] : vector<8x8xf32> to vector<8xf32>
    %278 = vector.shape_cast %277 : vector<8xf32> to vector<8x1xf32>
    %279 = vector.broadcast %278 : vector<8x1xf32> to vector<8x8xf32>
    %280 = arith.subf %276, %279 : vector<8x8xf32>
    %281 = math.exp %280 : vector<8x8xf32>
    %cst_187 = arith.constant dense<0.000000e+00> : vector<8xf32>
    %282 = vector.multi_reduction <add>, %281, %cst_187 [1] : vector<8x8xf32> to vector<8xf32>
    %283 = vector.shape_cast %282 : vector<8xf32> to vector<8x1xf32>
    %284 = tpu.reciprocal %283 {approx = true} : vector<8x1xf32> -> vector<8x1xf32>
    %285 = vector.broadcast %284 : vector<8x1xf32> to vector<8x8xf32>
    %286 = arith.mulf %281, %285 : vector<8x8xf32>
    %287 = arith.truncf %286 : vector<8x8xf32> to vector<8x8xbf16>
    %cst_188 = arith.constant dense<0.000000e+00> : vector<8x8xf32>
    %288 = tpu.matmul %287, %275, %cst_188 {dimension_numbers = #tpu.dot_dimension_numbers<[1], [0], [0], [1], [0, 0, 1, 1], [], []>} : vector<8x8xbf16>, vector<8x8xbf16>, vector<8x8xf32> -> vector<8x8xf32>
    %289 = tpu.concatenate %269, %288 in 0 : vector<8x8xf32>, vector<8x8xf32> -> vector<16x8xf32>
    %290 = arith.truncf %289 : vector<16x8xf32> to vector<16x8xbf16>
    %c0_189 = arith.constant 0 : index
    %c0_190 = arith.constant 0 : index
    %c0_191 = arith.constant 0 : index
    %291 = vector.load %arg13[%c0_189, %c0_190, %c0_191] : memref<4x8x32xbf16, #tpu.memory_space<vmem>>, vector<1x8x32xbf16>
    %292 = vector.shape_cast %291 : vector<1x8x32xbf16> to vector<8x32xbf16>
    %cst_192 = arith.constant dense<0.000000e+00> : vector<16x32xf32>
    %293 = tpu.matmul %290, %292, %cst_192 {dimension_numbers = #tpu.dot_dimension_numbers<[1], [0], [0], [1], [0, 0, 1, 1], [], []>} : vector<16x8xbf16>, vector<8x32xbf16>, vector<16x32xf32> -> vector<16x32xf32>
    %294 = arith.addf %236, %293 : vector<16x32xf32>
    %c1_193 = arith.constant 1 : index
    %c0_194 = arith.constant 0 : index
    %c0_195 = arith.constant 0 : index
    %295 = vector.load %arg7[%c1_193, %c0_194, %c0_195] : memref<4x32x8xbf16, #tpu.memory_space<vmem>>, vector<1x32x8xbf16>
    %296 = vector.shape_cast %295 : vector<1x32x8xbf16> to vector<32x8xbf16>
    %cst_196 = arith.constant dense<0.000000e+00> : vector<16x8xf32>
    %297 = tpu.matmul %235, %296, %cst_196 {dimension_numbers = #tpu.dot_dimension_numbers<[1], [0], [0], [1], [0, 0, 1, 1], [], []>} : vector<16x32xbf16>, vector<32x8xbf16>, vector<16x8xf32> -> vector<16x8xf32>
    %c1_197 = arith.constant 1 : index
    %c0_198 = arith.constant 0 : index
    %c0_199 = arith.constant 0 : index
    %298 = vector.load %arg10[%c1_197, %c0_198, %c0_199] : memref<4x1x8xf32, #tpu.memory_space<vmem>>, vector<1x1x8xf32>
    %299 = vector.shape_cast %298 : vector<1x1x8xf32> to vector<1x8xf32>
    %300 = vector.broadcast %299 : vector<1x8xf32> to vector<16x8xf32>
    %301 = arith.addf %297, %300 : vector<16x8xf32>
    %c1_200 = arith.constant 1 : index
    %c0_201 = arith.constant 0 : index
    %c0_202 = arith.constant 0 : index
    %302 = vector.load %arg9[%c1_200, %c0_201, %c0_202] : memref<4x32x8xbf16, #tpu.memory_space<vmem>>, vector<1x32x8xbf16>
    %303 = vector.shape_cast %302 : vector<1x32x8xbf16> to vector<32x8xbf16>
    %cst_203 = arith.constant dense<0.000000e+00> : vector<16x8xf32>
    %304 = tpu.matmul %235, %303, %cst_203 {dimension_numbers = #tpu.dot_dimension_numbers<[1], [0], [0], [1], [0, 0, 1, 1], [], []>} : vector<16x32xbf16>, vector<32x8xbf16>, vector<16x8xf32> -> vector<16x8xf32>
    %c1_204 = arith.constant 1 : index
    %c0_205 = arith.constant 0 : index
    %c0_206 = arith.constant 0 : index
    %305 = vector.load %arg12[%c1_204, %c0_205, %c0_206] : memref<4x1x8xf32, #tpu.memory_space<vmem>>, vector<1x1x8xf32>
    %306 = vector.shape_cast %305 : vector<1x1x8xf32> to vector<1x8xf32>
    %307 = vector.broadcast %306 : vector<1x8xf32> to vector<16x8xf32>
    %308 = arith.addf %304, %307 : vector<16x8xf32>
    %309 = vector.extract_strided_slice %301 {offsets = [0, 0], sizes = [8, 8], strides = [1, 1]} : vector<16x8xf32> to vector<8x8xf32>
    %310 = arith.truncf %309 : vector<8x8xf32> to vector<8x8xbf16>
    %311 = vector.extract_strided_slice %128 {offsets = [0, 0], sizes = [8, 8], strides = [1, 1]} : vector<16x8xf32> to vector<8x8xf32>
    %312 = arith.truncf %311 : vector<8x8xf32> to vector<8x8xbf16>
    %313 = vector.extract_strided_slice %308 {offsets = [0, 0], sizes = [8, 8], strides = [1, 1]} : vector<16x8xf32> to vector<8x8xf32>
    %314 = arith.truncf %313 : vector<8x8xf32> to vector<8x8xbf16>
    %cst_207 = arith.constant dense<0.000000e+00> : vector<8x8xf32>
    %315 = tpu.matmul %310, %312, %cst_207 {dimension_numbers = #tpu.dot_dimension_numbers<[1], [1], [0], [0], [0, 0, 1, 0], [], []>} : vector<8x8xbf16>, vector<8x8xbf16>, vector<8x8xf32> -> vector<8x8xf32>
    %cst_208 = arith.constant dense<0xFF800000> : vector<8xf32>
    %316 = vector.multi_reduction <maximumf>, %315, %cst_208 [1] : vector<8x8xf32> to vector<8xf32>
    %317 = vector.shape_cast %316 : vector<8xf32> to vector<8x1xf32>
    %318 = vector.broadcast %317 : vector<8x1xf32> to vector<8x8xf32>
    %319 = arith.subf %315, %318 : vector<8x8xf32>
    %320 = math.exp %319 : vector<8x8xf32>
    %cst_209 = arith.constant dense<0.000000e+00> : vector<8xf32>
    %321 = vector.multi_reduction <add>, %320, %cst_209 [1] : vector<8x8xf32> to vector<8xf32>
    %322 = vector.shape_cast %321 : vector<8xf32> to vector<8x1xf32>
    %323 = tpu.reciprocal %322 {approx = true} : vector<8x1xf32> -> vector<8x1xf32>
    %324 = vector.broadcast %323 : vector<8x1xf32> to vector<8x8xf32>
    %325 = arith.mulf %320, %324 : vector<8x8xf32>
    %326 = arith.truncf %325 : vector<8x8xf32> to vector<8x8xbf16>
    %cst_210 = arith.constant dense<0.000000e+00> : vector<8x8xf32>
    %327 = tpu.matmul %326, %314, %cst_210 {dimension_numbers = #tpu.dot_dimension_numbers<[1], [0], [0], [1], [0, 0, 1, 1], [], []>} : vector<8x8xbf16>, vector<8x8xbf16>, vector<8x8xf32> -> vector<8x8xf32>
    %328 = vector.extract_strided_slice %301 {offsets = [8, 0], sizes = [8, 8], strides = [1, 1]} : vector<16x8xf32> to vector<8x8xf32>
    %329 = arith.truncf %328 : vector<8x8xf32> to vector<8x8xbf16>
    %330 = vector.extract_strided_slice %128 {offsets = [8, 0], sizes = [8, 8], strides = [1, 1]} : vector<16x8xf32> to vector<8x8xf32>
    %331 = arith.truncf %330 : vector<8x8xf32> to vector<8x8xbf16>
    %332 = vector.extract_strided_slice %308 {offsets = [8, 0], sizes = [8, 8], strides = [1, 1]} : vector<16x8xf32> to vector<8x8xf32>
    %333 = arith.truncf %332 : vector<8x8xf32> to vector<8x8xbf16>
    %cst_211 = arith.constant dense<0.000000e+00> : vector<8x8xf32>
    %334 = tpu.matmul %329, %331, %cst_211 {dimension_numbers = #tpu.dot_dimension_numbers<[1], [1], [0], [0], [0, 0, 1, 0], [], []>} : vector<8x8xbf16>, vector<8x8xbf16>, vector<8x8xf32> -> vector<8x8xf32>
    %cst_212 = arith.constant dense<0xFF800000> : vector<8xf32>
    %335 = vector.multi_reduction <maximumf>, %334, %cst_212 [1] : vector<8x8xf32> to vector<8xf32>
    %336 = vector.shape_cast %335 : vector<8xf32> to vector<8x1xf32>
    %337 = vector.broadcast %336 : vector<8x1xf32> to vector<8x8xf32>
    %338 = arith.subf %334, %337 : vector<8x8xf32>
    %339 = math.exp %338 : vector<8x8xf32>
    %cst_213 = arith.constant dense<0.000000e+00> : vector<8xf32>
    %340 = vector.multi_reduction <add>, %339, %cst_213 [1] : vector<8x8xf32> to vector<8xf32>
    %341 = vector.shape_cast %340 : vector<8xf32> to vector<8x1xf32>
    %342 = tpu.reciprocal %341 {approx = true} : vector<8x1xf32> -> vector<8x1xf32>
    %343 = vector.broadcast %342 : vector<8x1xf32> to vector<8x8xf32>
    %344 = arith.mulf %339, %343 : vector<8x8xf32>
    %345 = arith.truncf %344 : vector<8x8xf32> to vector<8x8xbf16>
    %cst_214 = arith.constant dense<0.000000e+00> : vector<8x8xf32>
    %346 = tpu.matmul %345, %333, %cst_214 {dimension_numbers = #tpu.dot_dimension_numbers<[1], [0], [0], [1], [0, 0, 1, 1], [], []>} : vector<8x8xbf16>, vector<8x8xbf16>, vector<8x8xf32> -> vector<8x8xf32>
    %347 = tpu.concatenate %327, %346 in 0 : vector<8x8xf32>, vector<8x8xf32> -> vector<16x8xf32>
    %348 = arith.truncf %347 : vector<16x8xf32> to vector<16x8xbf16>
    %c1_215 = arith.constant 1 : index
    %c0_216 = arith.constant 0 : index
    %c0_217 = arith.constant 0 : index
    %349 = vector.load %arg13[%c1_215, %c0_216, %c0_217] : memref<4x8x32xbf16, #tpu.memory_space<vmem>>, vector<1x8x32xbf16>
    %350 = vector.shape_cast %349 : vector<1x8x32xbf16> to vector<8x32xbf16>
    %cst_218 = arith.constant dense<0.000000e+00> : vector<16x32xf32>
    %351 = tpu.matmul %348, %350, %cst_218 {dimension_numbers = #tpu.dot_dimension_numbers<[1], [0], [0], [1], [0, 0, 1, 1], [], []>} : vector<16x8xbf16>, vector<8x32xbf16>, vector<16x32xf32> -> vector<16x32xf32>
    %352 = arith.addf %294, %351 : vector<16x32xf32>
    %c2_219 = arith.constant 2 : index
    %c0_220 = arith.constant 0 : index
    %c0_221 = arith.constant 0 : index
    %353 = vector.load %arg7[%c2_219, %c0_220, %c0_221] : memref<4x32x8xbf16, #tpu.memory_space<vmem>>, vector<1x32x8xbf16>
    %354 = vector.shape_cast %353 : vector<1x32x8xbf16> to vector<32x8xbf16>
    %cst_222 = arith.constant dense<0.000000e+00> : vector<16x8xf32>
    %355 = tpu.matmul %235, %354, %cst_222 {dimension_numbers = #tpu.dot_dimension_numbers<[1], [0], [0], [1], [0, 0, 1, 1], [], []>} : vector<16x32xbf16>, vector<32x8xbf16>, vector<16x8xf32> -> vector<16x8xf32>
    %c2_223 = arith.constant 2 : index
    %c0_224 = arith.constant 0 : index
    %c0_225 = arith.constant 0 : index
    %356 = vector.load %arg10[%c2_223, %c0_224, %c0_225] : memref<4x1x8xf32, #tpu.memory_space<vmem>>, vector<1x1x8xf32>
    %357 = vector.shape_cast %356 : vector<1x1x8xf32> to vector<1x8xf32>
    %358 = vector.broadcast %357 : vector<1x8xf32> to vector<16x8xf32>
    %359 = arith.addf %355, %358 : vector<16x8xf32>
    %c2_226 = arith.constant 2 : index
    %c0_227 = arith.constant 0 : index
    %c0_228 = arith.constant 0 : index
    %360 = vector.load %arg9[%c2_226, %c0_227, %c0_228] : memref<4x32x8xbf16, #tpu.memory_space<vmem>>, vector<1x32x8xbf16>
    %361 = vector.shape_cast %360 : vector<1x32x8xbf16> to vector<32x8xbf16>
    %cst_229 = arith.constant dense<0.000000e+00> : vector<16x8xf32>
    %362 = tpu.matmul %235, %361, %cst_229 {dimension_numbers = #tpu.dot_dimension_numbers<[1], [0], [0], [1], [0, 0, 1, 1], [], []>} : vector<16x32xbf16>, vector<32x8xbf16>, vector<16x8xf32> -> vector<16x8xf32>
    %c2_230 = arith.constant 2 : index
    %c0_231 = arith.constant 0 : index
    %c0_232 = arith.constant 0 : index
    %363 = vector.load %arg12[%c2_230, %c0_231, %c0_232] : memref<4x1x8xf32, #tpu.memory_space<vmem>>, vector<1x1x8xf32>
    %364 = vector.shape_cast %363 : vector<1x1x8xf32> to vector<1x8xf32>
    %365 = vector.broadcast %364 : vector<1x8xf32> to vector<16x8xf32>
    %366 = arith.addf %362, %365 : vector<16x8xf32>
    %367 = vector.extract_strided_slice %359 {offsets = [0, 0], sizes = [8, 8], strides = [1, 1]} : vector<16x8xf32> to vector<8x8xf32>
    %368 = arith.truncf %367 : vector<8x8xf32> to vector<8x8xbf16>
    %369 = vector.extract_strided_slice %135 {offsets = [0, 0], sizes = [8, 8], strides = [1, 1]} : vector<16x8xf32> to vector<8x8xf32>
    %370 = arith.truncf %369 : vector<8x8xf32> to vector<8x8xbf16>
    %371 = vector.extract_strided_slice %366 {offsets = [0, 0], sizes = [8, 8], strides = [1, 1]} : vector<16x8xf32> to vector<8x8xf32>
    %372 = arith.truncf %371 : vector<8x8xf32> to vector<8x8xbf16>
    %cst_233 = arith.constant dense<0.000000e+00> : vector<8x8xf32>
    %373 = tpu.matmul %368, %370, %cst_233 {dimension_numbers = #tpu.dot_dimension_numbers<[1], [1], [0], [0], [0, 0, 1, 0], [], []>} : vector<8x8xbf16>, vector<8x8xbf16>, vector<8x8xf32> -> vector<8x8xf32>
    %cst_234 = arith.constant dense<0xFF800000> : vector<8xf32>
    %374 = vector.multi_reduction <maximumf>, %373, %cst_234 [1] : vector<8x8xf32> to vector<8xf32>
    %375 = vector.shape_cast %374 : vector<8xf32> to vector<8x1xf32>
    %376 = vector.broadcast %375 : vector<8x1xf32> to vector<8x8xf32>
    %377 = arith.subf %373, %376 : vector<8x8xf32>
    %378 = math.exp %377 : vector<8x8xf32>
    %cst_235 = arith.constant dense<0.000000e+00> : vector<8xf32>
    %379 = vector.multi_reduction <add>, %378, %cst_235 [1] : vector<8x8xf32> to vector<8xf32>
    %380 = vector.shape_cast %379 : vector<8xf32> to vector<8x1xf32>
    %381 = tpu.reciprocal %380 {approx = true} : vector<8x1xf32> -> vector<8x1xf32>
    %382 = vector.broadcast %381 : vector<8x1xf32> to vector<8x8xf32>
    %383 = arith.mulf %378, %382 : vector<8x8xf32>
    %384 = arith.truncf %383 : vector<8x8xf32> to vector<8x8xbf16>
    %cst_236 = arith.constant dense<0.000000e+00> : vector<8x8xf32>
    %385 = tpu.matmul %384, %372, %cst_236 {dimension_numbers = #tpu.dot_dimension_numbers<[1], [0], [0], [1], [0, 0, 1, 1], [], []>} : vector<8x8xbf16>, vector<8x8xbf16>, vector<8x8xf32> -> vector<8x8xf32>
    %386 = vector.extract_strided_slice %359 {offsets = [8, 0], sizes = [8, 8], strides = [1, 1]} : vector<16x8xf32> to vector<8x8xf32>
    %387 = arith.truncf %386 : vector<8x8xf32> to vector<8x8xbf16>
    %388 = vector.extract_strided_slice %135 {offsets = [8, 0], sizes = [8, 8], strides = [1, 1]} : vector<16x8xf32> to vector<8x8xf32>
    %389 = arith.truncf %388 : vector<8x8xf32> to vector<8x8xbf16>
    %390 = vector.extract_strided_slice %366 {offsets = [8, 0], sizes = [8, 8], strides = [1, 1]} : vector<16x8xf32> to vector<8x8xf32>
    %391 = arith.truncf %390 : vector<8x8xf32> to vector<8x8xbf16>
    %cst_237 = arith.constant dense<0.000000e+00> : vector<8x8xf32>
    %392 = tpu.matmul %387, %389, %cst_237 {dimension_numbers = #tpu.dot_dimension_numbers<[1], [1], [0], [0], [0, 0, 1, 0], [], []>} : vector<8x8xbf16>, vector<8x8xbf16>, vector<8x8xf32> -> vector<8x8xf32>
    %cst_238 = arith.constant dense<0xFF800000> : vector<8xf32>
    %393 = vector.multi_reduction <maximumf>, %392, %cst_238 [1] : vector<8x8xf32> to vector<8xf32>
    %394 = vector.shape_cast %393 : vector<8xf32> to vector<8x1xf32>
    %395 = vector.broadcast %394 : vector<8x1xf32> to vector<8x8xf32>
    %396 = arith.subf %392, %395 : vector<8x8xf32>
    %397 = math.exp %396 : vector<8x8xf32>
    %cst_239 = arith.constant dense<0.000000e+00> : vector<8xf32>
    %398 = vector.multi_reduction <add>, %397, %cst_239 [1] : vector<8x8xf32> to vector<8xf32>
    %399 = vector.shape_cast %398 : vector<8xf32> to vector<8x1xf32>
    %400 = tpu.reciprocal %399 {approx = true} : vector<8x1xf32> -> vector<8x1xf32>
    %401 = vector.broadcast %400 : vector<8x1xf32> to vector<8x8xf32>
    %402 = arith.mulf %397, %401 : vector<8x8xf32>
    %403 = arith.truncf %402 : vector<8x8xf32> to vector<8x8xbf16>
    %cst_240 = arith.constant dense<0.000000e+00> : vector<8x8xf32>
    %404 = tpu.matmul %403, %391, %cst_240 {dimension_numbers = #tpu.dot_dimension_numbers<[1], [0], [0], [1], [0, 0, 1, 1], [], []>} : vector<8x8xbf16>, vector<8x8xbf16>, vector<8x8xf32> -> vector<8x8xf32>
    %405 = tpu.concatenate %385, %404 in 0 : vector<8x8xf32>, vector<8x8xf32> -> vector<16x8xf32>
    %406 = arith.truncf %405 : vector<16x8xf32> to vector<16x8xbf16>
    %c2_241 = arith.constant 2 : index
    %c0_242 = arith.constant 0 : index
    %c0_243 = arith.constant 0 : index
    %407 = vector.load %arg13[%c2_241, %c0_242, %c0_243] : memref<4x8x32xbf16, #tpu.memory_space<vmem>>, vector<1x8x32xbf16>
    %408 = vector.shape_cast %407 : vector<1x8x32xbf16> to vector<8x32xbf16>
    %cst_244 = arith.constant dense<0.000000e+00> : vector<16x32xf32>
    %409 = tpu.matmul %406, %408, %cst_244 {dimension_numbers = #tpu.dot_dimension_numbers<[1], [0], [0], [1], [0, 0, 1, 1], [], []>} : vector<16x8xbf16>, vector<8x32xbf16>, vector<16x32xf32> -> vector<16x32xf32>
    %410 = arith.addf %352, %409 : vector<16x32xf32>
    %c3_245 = arith.constant 3 : index
    %c0_246 = arith.constant 0 : index
    %c0_247 = arith.constant 0 : index
    %411 = vector.load %arg7[%c3_245, %c0_246, %c0_247] : memref<4x32x8xbf16, #tpu.memory_space<vmem>>, vector<1x32x8xbf16>
    %412 = vector.shape_cast %411 : vector<1x32x8xbf16> to vector<32x8xbf16>
    %cst_248 = arith.constant dense<0.000000e+00> : vector<16x8xf32>
    %413 = tpu.matmul %235, %412, %cst_248 {dimension_numbers = #tpu.dot_dimension_numbers<[1], [0], [0], [1], [0, 0, 1, 1], [], []>} : vector<16x32xbf16>, vector<32x8xbf16>, vector<16x8xf32> -> vector<16x8xf32>
    %c3_249 = arith.constant 3 : index
    %c0_250 = arith.constant 0 : index
    %c0_251 = arith.constant 0 : index
    %414 = vector.load %arg10[%c3_249, %c0_250, %c0_251] : memref<4x1x8xf32, #tpu.memory_space<vmem>>, vector<1x1x8xf32>
    %415 = vector.shape_cast %414 : vector<1x1x8xf32> to vector<1x8xf32>
    %416 = vector.broadcast %415 : vector<1x8xf32> to vector<16x8xf32>
    %417 = arith.addf %413, %416 : vector<16x8xf32>
    %c3_252 = arith.constant 3 : index
    %c0_253 = arith.constant 0 : index
    %c0_254 = arith.constant 0 : index
    %418 = vector.load %arg9[%c3_252, %c0_253, %c0_254] : memref<4x32x8xbf16, #tpu.memory_space<vmem>>, vector<1x32x8xbf16>
    %419 = vector.shape_cast %418 : vector<1x32x8xbf16> to vector<32x8xbf16>
    %cst_255 = arith.constant dense<0.000000e+00> : vector<16x8xf32>
    %420 = tpu.matmul %235, %419, %cst_255 {dimension_numbers = #tpu.dot_dimension_numbers<[1], [0], [0], [1], [0, 0, 1, 1], [], []>} : vector<16x32xbf16>, vector<32x8xbf16>, vector<16x8xf32> -> vector<16x8xf32>
    %c3_256 = arith.constant 3 : index
    %c0_257 = arith.constant 0 : index
    %c0_258 = arith.constant 0 : index
    %421 = vector.load %arg12[%c3_256, %c0_257, %c0_258] : memref<4x1x8xf32, #tpu.memory_space<vmem>>, vector<1x1x8xf32>
    %422 = vector.shape_cast %421 : vector<1x1x8xf32> to vector<1x8xf32>
    %423 = vector.broadcast %422 : vector<1x8xf32> to vector<16x8xf32>
    %424 = arith.addf %420, %423 : vector<16x8xf32>
    %425 = vector.extract_strided_slice %417 {offsets = [0, 0], sizes = [8, 8], strides = [1, 1]} : vector<16x8xf32> to vector<8x8xf32>
    %426 = arith.truncf %425 : vector<8x8xf32> to vector<8x8xbf16>
    %427 = vector.extract_strided_slice %142 {offsets = [0, 0], sizes = [8, 8], strides = [1, 1]} : vector<16x8xf32> to vector<8x8xf32>
    %428 = arith.truncf %427 : vector<8x8xf32> to vector<8x8xbf16>
    %429 = vector.extract_strided_slice %424 {offsets = [0, 0], sizes = [8, 8], strides = [1, 1]} : vector<16x8xf32> to vector<8x8xf32>
    %430 = arith.truncf %429 : vector<8x8xf32> to vector<8x8xbf16>
    %cst_259 = arith.constant dense<0.000000e+00> : vector<8x8xf32>
    %431 = tpu.matmul %426, %428, %cst_259 {dimension_numbers = #tpu.dot_dimension_numbers<[1], [1], [0], [0], [0, 0, 1, 0], [], []>} : vector<8x8xbf16>, vector<8x8xbf16>, vector<8x8xf32> -> vector<8x8xf32>
    %cst_260 = arith.constant dense<0xFF800000> : vector<8xf32>
    %432 = vector.multi_reduction <maximumf>, %431, %cst_260 [1] : vector<8x8xf32> to vector<8xf32>
    %433 = vector.shape_cast %432 : vector<8xf32> to vector<8x1xf32>
    %434 = vector.broadcast %433 : vector<8x1xf32> to vector<8x8xf32>
    %435 = arith.subf %431, %434 : vector<8x8xf32>
    %436 = math.exp %435 : vector<8x8xf32>
    %cst_261 = arith.constant dense<0.000000e+00> : vector<8xf32>
    %437 = vector.multi_reduction <add>, %436, %cst_261 [1] : vector<8x8xf32> to vector<8xf32>
    %438 = vector.shape_cast %437 : vector<8xf32> to vector<8x1xf32>
    %439 = tpu.reciprocal %438 {approx = true} : vector<8x1xf32> -> vector<8x1xf32>
    %440 = vector.broadcast %439 : vector<8x1xf32> to vector<8x8xf32>
    %441 = arith.mulf %436, %440 : vector<8x8xf32>
    %442 = arith.truncf %441 : vector<8x8xf32> to vector<8x8xbf16>
    %cst_262 = arith.constant dense<0.000000e+00> : vector<8x8xf32>
    %443 = tpu.matmul %442, %430, %cst_262 {dimension_numbers = #tpu.dot_dimension_numbers<[1], [0], [0], [1], [0, 0, 1, 1], [], []>} : vector<8x8xbf16>, vector<8x8xbf16>, vector<8x8xf32> -> vector<8x8xf32>
    %444 = vector.extract_strided_slice %417 {offsets = [8, 0], sizes = [8, 8], strides = [1, 1]} : vector<16x8xf32> to vector<8x8xf32>
    %445 = arith.truncf %444 : vector<8x8xf32> to vector<8x8xbf16>
    %446 = vector.extract_strided_slice %142 {offsets = [8, 0], sizes = [8, 8], strides = [1, 1]} : vector<16x8xf32> to vector<8x8xf32>
    %447 = arith.truncf %446 : vector<8x8xf32> to vector<8x8xbf16>
    %448 = vector.extract_strided_slice %424 {offsets = [8, 0], sizes = [8, 8], strides = [1, 1]} : vector<16x8xf32> to vector<8x8xf32>
    %449 = arith.truncf %448 : vector<8x8xf32> to vector<8x8xbf16>
    %cst_263 = arith.constant dense<0.000000e+00> : vector<8x8xf32>
    %450 = tpu.matmul %445, %447, %cst_263 {dimension_numbers = #tpu.dot_dimension_numbers<[1], [1], [0], [0], [0, 0, 1, 0], [], []>} : vector<8x8xbf16>, vector<8x8xbf16>, vector<8x8xf32> -> vector<8x8xf32>
    %cst_264 = arith.constant dense<0xFF800000> : vector<8xf32>
    %451 = vector.multi_reduction <maximumf>, %450, %cst_264 [1] : vector<8x8xf32> to vector<8xf32>
    %452 = vector.shape_cast %451 : vector<8xf32> to vector<8x1xf32>
    %453 = vector.broadcast %452 : vector<8x1xf32> to vector<8x8xf32>
    %454 = arith.subf %450, %453 : vector<8x8xf32>
    %455 = math.exp %454 : vector<8x8xf32>
    %cst_265 = arith.constant dense<0.000000e+00> : vector<8xf32>
    %456 = vector.multi_reduction <add>, %455, %cst_265 [1] : vector<8x8xf32> to vector<8xf32>
    %457 = vector.shape_cast %456 : vector<8xf32> to vector<8x1xf32>
    %458 = tpu.reciprocal %457 {approx = true} : vector<8x1xf32> -> vector<8x1xf32>
    %459 = vector.broadcast %458 : vector<8x1xf32> to vector<8x8xf32>
    %460 = arith.mulf %455, %459 : vector<8x8xf32>
    %461 = arith.truncf %460 : vector<8x8xf32> to vector<8x8xbf16>
    %cst_266 = arith.constant dense<0.000000e+00> : vector<8x8xf32>
    %462 = tpu.matmul %461, %449, %cst_266 {dimension_numbers = #tpu.dot_dimension_numbers<[1], [0], [0], [1], [0, 0, 1, 1], [], []>} : vector<8x8xbf16>, vector<8x8xbf16>, vector<8x8xf32> -> vector<8x8xf32>
    %463 = tpu.concatenate %443, %462 in 0 : vector<8x8xf32>, vector<8x8xf32> -> vector<16x8xf32>
    %464 = arith.truncf %463 : vector<16x8xf32> to vector<16x8xbf16>
    %c3_267 = arith.constant 3 : index
    %c0_268 = arith.constant 0 : index
    %c0_269 = arith.constant 0 : index
    %465 = vector.load %arg13[%c3_267, %c0_268, %c0_269] : memref<4x8x32xbf16, #tpu.memory_space<vmem>>, vector<1x8x32xbf16>
    %466 = vector.shape_cast %465 : vector<1x8x32xbf16> to vector<8x32xbf16>
    %cst_270 = arith.constant dense<0.000000e+00> : vector<16x32xf32>
    %467 = tpu.matmul %464, %466, %cst_270 {dimension_numbers = #tpu.dot_dimension_numbers<[1], [0], [0], [1], [0, 0, 1, 1], [], []>} : vector<16x8xbf16>, vector<8x32xbf16>, vector<16x32xf32> -> vector<16x32xf32>
    %468 = arith.addf %410, %467 : vector<16x32xf32>
    %c0_271 = arith.constant 0 : index
    %c0_272 = arith.constant 0 : index
    %469 = vector.load %arg14[%c0_271, %c0_272] : memref<1x32xf32, #tpu.memory_space<vmem>>, vector<1x32xf32>
    %470 = vector.broadcast %469 : vector<1x32xf32> to vector<16x32xf32>
    %471 = arith.addf %468, %470 : vector<16x32xf32>
    %472 = arith.truncf %471 : vector<16x32xf32> to vector<16x32xbf16>
    %c0_273 = arith.constant 0 : index
    %c0_274 = arith.constant 0 : index
    %473 = vector.load %arg15[%c0_273, %c0_274] : memref<32x128xbf16, #tpu.memory_space<vmem>>, vector<32x128xbf16>
    %cst_275 = arith.constant dense<0.000000e+00> : vector<16x128xf32>
    %474 = tpu.matmul %472, %473, %cst_275 {dimension_numbers = #tpu.dot_dimension_numbers<[1], [0], [0], [1], [0, 0, 1, 1], [], []>} : vector<16x32xbf16>, vector<32x128xbf16>, vector<16x128xf32> -> vector<16x128xf32>
    %c0_276 = arith.constant 0 : index
    %c0_277 = arith.constant 0 : index
    %475 = vector.load %arg16[%c0_276, %c0_277] : memref<1x128xf32, #tpu.memory_space<vmem>>, vector<1x128xf32>
    %476 = vector.broadcast %475 : vector<1x128xf32> to vector<16x128xf32>
    %477 = arith.addf %474, %476 : vector<16x128xf32>
    %cst_278 = arith.constant dense<0xFF800000> : vector<16xf32>
    %478 = vector.multi_reduction <maximumf>, %477, %cst_278 [1] : vector<16x128xf32> to vector<16xf32>
    %479 = vector.shape_cast %478 : vector<16xf32> to vector<16x1xf32>
    %480 = vector.broadcast %479 : vector<16x1xf32> to vector<16x128xf32>
    %481 = arith.subf %477, %480 : vector<16x128xf32>
    %482 = math.exp %481 : vector<16x128xf32>
    %cst_279 = arith.constant dense<0.000000e+00> : vector<16xf32>
    %483 = vector.multi_reduction <add>, %482, %cst_279 [1] : vector<16x128xf32> to vector<16xf32>
    %484 = vector.shape_cast %483 : vector<16xf32> to vector<16x1xf32>
    %485 = math.log %484 : vector<16x1xf32>
    %486 = vector.broadcast %485 : vector<16x1xf32> to vector<16x128xf32>
    %487 = arith.subf %481, %486 : vector<16x128xf32>
    %c0_280 = arith.constant 0 : index
    %c0_281 = arith.constant 0 : index
    %488 = vector.load %arg19[%c0_280, %c0_281] : memref<16x128xf32, #tpu.memory_space<vmem>>, vector<16x128xf32>
    tpu.vector_store %arg19[%c0_280, %c0_281], %487 {strides = array<i32>} : memref<16x128xf32, #tpu.memory_space<vmem>>, vector<16x128xf32>,
    %489 = vector.extract_strided_slice %471 {offsets = [0, 0], sizes = [1, 32], strides = [1, 1]} : vector<16x32xf32> to vector<1x32xf32>
    %490 = vector.extract_strided_slice %471 {offsets = [8, 0], sizes = [1, 32], strides = [1, 1]} : vector<16x32xf32> to vector<1x32xf32>
    %491 = tpu.concatenate %489, %490 in 0 : vector<1x32xf32>, vector<1x32xf32> -> vector<2x32xf32>
    %492 = arith.truncf %491 : vector<2x32xf32> to vector<2x32xbf16>
    %c0_282 = arith.constant 0 : index
    %c0_283 = arith.constant 0 : index
    %493 = vector.load %arg17[%c0_282, %c0_283] : memref<32x128xbf16, #tpu.memory_space<vmem>>, vector<32x128xbf16>
    %cst_284 = arith.constant dense<0.000000e+00> : vector<2x128xf32>
    %494 = tpu.matmul %492, %493, %cst_284 {dimension_numbers = #tpu.dot_dimension_numbers<[1], [0], [0], [1], [0, 0, 1, 1], [], []>} : vector<2x32xbf16>, vector<32x128xbf16>, vector<2x128xf32> -> vector<2x128xf32>
    %c0_285 = arith.constant 0 : index
    %c0_286 = arith.constant 0 : index
    %495 = vector.load %arg18[%c0_285, %c0_286] : memref<1x128xf32, #tpu.memory_space<vmem>>, vector<1x128xf32>
    %496 = vector.broadcast %495 : vector<1x128xf32> to vector<2x128xf32>
    %497 = arith.addf %494, %496 : vector<2x128xf32>
    %c0_287 = arith.constant 0 : index
    %c0_288 = arith.constant 0 : index
    %498 = vector.load %arg20[%c0_287, %c0_288] : memref<2x128xf32, #tpu.memory_space<vmem>>, vector<2x128xf32>
    tpu.vector_store %arg20[%c0_287, %c0_288], %497 {strides = array<i32>} : memref<2x128xf32, #tpu.memory_space<vmem>>, vector<2x128xf32>,
    return
  }
  func.func @transform_0(%arg0: i32, %arg1: memref<16xi32, #tpu.memory_space<smem>>) -> (i32, i32) {
    %c0_i32 = arith.constant 0 : i32
    %c0_i32_0 = arith.constant 0 : i32
    return %arg0, %c0_i32 : i32, i32
  }
  func.func @transform_1(%arg0: i32, %arg1: memref<16xi32, #tpu.memory_space<smem>>) -> (i32, i32) {
    %c0_i32 = arith.constant 0 : i32
    %c0_i32_0 = arith.constant 0 : i32
    %c0_i32_1 = arith.constant 0 : i32
    return %c0_i32, %c0_i32_0 : i32, i32
  }
  func.func @transform_2(%arg0: i32, %arg1: memref<16xi32, #tpu.memory_space<smem>>) -> (i32, i32) {
    %c0_i32 = arith.constant 0 : i32
    %c0_i32_0 = arith.constant 0 : i32
    %c0_i32_1 = arith.constant 0 : i32
    return %c0_i32, %c0_i32_0 : i32, i32
  }
  func.func @transform_3(%arg0: i32, %arg1: memref<16xi32, #tpu.memory_space<smem>>) -> (i32, i32) {
    %c0_i32 = arith.constant 0 : i32
    %c0_i32_0 = arith.constant 0 : i32
    %c0_i32_1 = arith.constant 0 : i32
    return %c0_i32, %c0_i32_0 : i32, i32
  }
  func.func @transform_5(%arg0: i32, %arg1: memref<16xi32, #tpu.memory_space<smem>>) -> (i32, i32, i32) {
    %c0_i32 = arith.constant 0 : i32
    %c0_i32_0 = arith.constant 0 : i32
    %c0_i32_1 = arith.constant 0 : i32
    %c0_i32_2 = arith.constant 0 : i32
    return %c0_i32, %c0_i32_0, %c0_i32_1 : i32, i32, i32
  }
  func.func @transform_6(%arg0: i32, %arg1: memref<16xi32, #tpu.memory_space<smem>>) -> (i32, i32, i32) {
    %c0_i32 = arith.constant 0 : i32
    %c0_i32_0 = arith.constant 0 : i32
    %c0_i32_1 = arith.constant 0 : i32
    %c0_i32_2 = arith.constant 0 : i32
    return %c0_i32, %c0_i32_0, %c0_i32_1 : i32, i32, i32
  }
  func.func @transform_7(%arg0: i32, %arg1: memref<16xi32, #tpu.memory_space<smem>>) -> (i32, i32, i32) {
    %c0_i32 = arith.constant 0 : i32
    %c0_i32_0 = arith.constant 0 : i32
    %c0_i32_1 = arith.constant 0 : i32
    %c0_i32_2 = arith.constant 0 : i32
    return %c0_i32, %c0_i32_0, %c0_i32_1 : i32, i32, i32
  }
  func.func @transform_8(%arg0: i32, %arg1: memref<16xi32, #tpu.memory_space<smem>>) -> (i32, i32, i32) {
    %c0_i32 = arith.constant 0 : i32
    %c0_i32_0 = arith.constant 0 : i32
    %c0_i32_1 = arith.constant 0 : i32
    %c0_i32_2 = arith.constant 0 : i32
    return %c0_i32, %c0_i32_0, %c0_i32_1 : i32, i32, i32
  }
  func.func @transform_9(%arg0: i32, %arg1: memref<16xi32, #tpu.memory_space<smem>>) -> (i32, i32, i32) {
    %c0_i32 = arith.constant 0 : i32
    %c0_i32_0 = arith.constant 0 : i32
    %c0_i32_1 = arith.constant 0 : i32
    %c0_i32_2 = arith.constant 0 : i32
    return %c0_i32, %c0_i32_0, %c0_i32_1 : i32, i32, i32
  }
  func.func @transform_10(%arg0: i32, %arg1: memref<16xi32, #tpu.memory_space<smem>>) -> (i32, i32, i32) {
    %c0_i32 = arith.constant 0 : i32
    %c0_i32_0 = arith.constant 0 : i32
    %c0_i32_1 = arith.constant 0 : i32
    %c0_i32_2 = arith.constant 0 : i32
    return %c0_i32, %c0_i32_0, %c0_i32_1 : i32, i32, i32
  }
  func.func @transform_11(%arg0: i32, %arg1: memref<16xi32, #tpu.memory_space<smem>>) -> (i32, i32, i32) {
    %c0_i32 = arith.constant 0 : i32
    %c0_i32_0 = arith.constant 0 : i32
    %c0_i32_1 = arith.constant 0 : i32
    %c0_i32_2 = arith.constant 0 : i32
    return %c0_i32, %c0_i32_0, %c0_i32_1 : i32, i32, i32
  }
  func.func @transform_12(%arg0: i32, %arg1: memref<16xi32, #tpu.memory_space<smem>>) -> (i32, i32) {
    %c0_i32 = arith.constant 0 : i32
    %c0_i32_0 = arith.constant 0 : i32
    %c0_i32_1 = arith.constant 0 : i32
    return %c0_i32, %c0_i32_0 : i32, i32
  }
  func.func @transform_13(%arg0: i32, %arg1: memref<16xi32, #tpu.memory_space<smem>>) -> (i32, i32) {
    %c0_i32 = arith.constant 0 : i32
    %c0_i32_0 = arith.constant 0 : i32
    %c0_i32_1 = arith.constant 0 : i32
    return %c0_i32, %c0_i32_0 : i32, i32
  }
  func.func @transform_14(%arg0: i32, %arg1: memref<16xi32, #tpu.memory_space<smem>>) -> (i32, i32) {
    %c0_i32 = arith.constant 0 : i32
    %c0_i32_0 = arith.constant 0 : i32
    %c0_i32_1 = arith.constant 0 : i32
    return %c0_i32, %c0_i32_0 : i32, i32
  }
  func.func @transform_15(%arg0: i32, %arg1: memref<16xi32, #tpu.memory_space<smem>>) -> (i32, i32) {
    %c0_i32 = arith.constant 0 : i32
    %c0_i32_0 = arith.constant 0 : i32
    %c0_i32_1 = arith.constant 0 : i32
    return %c0_i32, %c0_i32_0 : i32, i32
  }
  func.func @transform_16(%arg0: i32, %arg1: memref<16xi32, #tpu.memory_space<smem>>) -> (i32, i32) {
    %c0_i32 = arith.constant 0 : i32
    %c0_i32_0 = arith.constant 0 : i32
    %c0_i32_1 = arith.constant 0 : i32
    return %c0_i32, %c0_i32_0 : i32, i32
  }
  func.func @transform_17(%arg0: i32, %arg1: memref<16xi32, #tpu.memory_space<smem>>) -> (i32, i32) {
    %c0_i32 = arith.constant 0 : i32
    %c0_i32_0 = arith.constant 0 : i32
    return %arg0, %c0_i32 : i32, i32
  }
  func.func @transform_18(%arg0: i32, %arg1: memref<16xi32, #tpu.memory_space<smem>>) -> (i32, i32) {
    %c0_i32 = arith.constant 0 : i32
    %c0_i32_0 = arith.constant 0 : i32
    return %arg0, %c0_i32 : i32, i32
  }
}

</mosaic_0001>

<bundles_post_ra>
// kernel: tpu_custom_call.1
= control target key start
LH: loop header
LB: loop body
LE: loop exit
PB: predicated region body
PF: predicated region fallthrough
CT: control target
= control target key end

     0   :  { %s4532_s0 = inlined_call_operand.vmem [shape: s32[16], index: 0, kind: input, shape index: {}]   ;;  %s4533_s1 = inlined_call_operand.vmem [shape: f32[16,32], index: 1, kind: input, shape index: {}]   ;;  %s4534_s2 = inlined_call_operand.vmem [shape: f32[8,32], index: 2, kind: input, shape index: {}]   ;;  %s4535_s3 = inlined_call_operand.vmem [shape: f32[1,32], index: 3, kind: input, shape index: {}]   ;;  %s4536_s4 = inlined_call_operand.vmem [shape: f32[1,32], index: 4, kind: input, shape index: {}]   ;;  %s4537_s5 = inlined_call_operand.vmem [shape: f32[64,32], index: 5, kind: input, shape index: {}]   ;;  %s4538_s6 = inlined_call_operand.vmem [shape: bf16[4,32,8], index: 6, kind: input, shape index: {}]   ;;  %s4539_s7 = inlined_call_operand.vmem [shape: bf16[4,32,8], index: 7, kind: input, shape index: {}]   ;;  %s4540_s8 = inlined_call_operand.vmem [shape: bf16[4,32,8], index: 8, kind: input, shape index: {}]   ;;  %s4541_s9 = inlined_call_operand.vmem [shape: f32[4,1,8], index: 9, kind: input, shape index: {}]   ;;  %s4542_s10 = inlined_call_operand.vmem [shape: f32[4,1,8], index: 10, kind: input, shape index: {}]   ;;  %s4543_s11 = inlined_call_operand.vmem [shape: f32[4,1,8], index: 11, kind: input, shape index: {}]   ;;  %s4544_s12 = inlined_call_operand.vmem [shape: bf16[4,8,32], index: 12, kind: input, shape index: {}]   ;;  %s4545_s13 = inlined_call_operand.vmem [shape: f32[1,32], index: 13, kind: input, shape index: {}]   ;;  %s4546_s14 = inlined_call_operand.vmem [shape: bf16[32,128], index: 14, kind: input, shape index: {}]   ;;  %s4547_s15 = inlined_call_operand.vmem [shape: f32[1,128], index: 15, kind: input, shape index: {}]   ;;  %s4548_s16 = inlined_call_operand.vmem [shape: bf16[32,128], index: 16, kind: input, shape index: {}]   ;;  %s4549_s17 = inlined_call_operand.vmem [shape: f32[1,128], index: 17, kind: input, shape index: {}]   ;;  %s4550_s18 = inlined_call_operand.hbm [shape: f32[16,128], index: 18, kind: output, shape index: {0}]   ;;  %s4551_s19 = inlined_call_operand.hbm [shape: f32[2,128], index: 19, kind: output, shape index: {1}]  }
   0x1   :  { %4553 = sst [smem:[#allocation45_spill]] %s4532_s0 }
   0x2   :  { %4554 = sst [smem:[#allocation46_spill]] %s4533_s1  ;;  %s4558_s20 = sld [smem:[#allocation45_spill]] }
   0x3   :  { %4555 = sst [smem:[#allocation47_spill]] %s4534_s2 }
   0x4   :  { %4556 = sst [smem:[#allocation48_spill]] %s4535_s3 }
   0x5   :  { %4557 = sst [smem:[#allocation49_spill]] %s4545_s13 }
   0x8   :  { %s25_s13 = sshll.u32 %s4558_s20, 4  ;;  %s26_s13 = int_to_ptr.vmem [resolvable:$true] %s25_s13 }
   0x9   :  { %s3844_s21 = scalar_lea.vmem %s26_s13, 16  ;;  %p3849_p1 = scmp.lt.s32.totalorder %s26_s13, %s26_s13 }
   0xa   :  { %p3845_p0 = scmp.ne.s32.totalorder %s26_s13, %s3844_s21  ;;  %p3850_p2 = scmp.lt.s32.totalorder %s3844_s21, %s3844_s21 }
   0xc   :  { %p3851_p3 = por %p3850_p2, %p3849_p1 }
   0xe   :  { %p3852_p4 = pnand %p3851_p3, %p3845_p0 }
  0x10   :  { %3855 = shalt.err (!%p3852_p4)  }
  0x11   :  { %s3938_s1 = smov [#allocation5]  }
  0x12   :  { %28 = dma.vmem_to_smem %s26_s13, 16, %s3938_s1, [#allocation4] }
  0x13   :  { %3900 = dma.done.wait [#allocation4], 16 }
  0x14   :  { %3901 = vsyncadd [#allocation4], 4294967280 }
  0x15   :  { %30 = sfence }
  0x16   :  { %31 = vsyncpa [#allocation7], 0 }
  0x17   :  { %32 = vsyncpa [#allocation9], 0  ;;  %s67_s22 = sld [smem:[#allocation5]] }
  0x1d   :  { %s68_s24 = scalar_lea.vmem %s4537_s5, %s67_s22 }
  0x1e   :  { %v86_v0 = vld [vmem:[%s68_s24] sm:$0x1] }
  0x1f   :  { %87 = vst [vmem:[#allocation2] sm:$0x1] %v86_v0 }
  0x20   :  { %112 = vsyncadd [#allocation3], 16  ;;  %s3293_s25 = sld [smem:[#allocation5 + $0x1]] }
  0x26   :  { %s115_s27 = scalar_lea.vmem %s4537_s5, %s3293_s25 }
  0x27   :  { %v135_v1 = vld [vmem:[%s115_s27] sm:$0x1] }
  0x28   :  { %136 = vst [vmem:[#allocation2 + $0x1] sm:$0x1] %v135_v1 }
  0x29   :  { %161 = vsyncadd [#allocation3 + $0x1], 16  ;;  %s3294_s13 = sld [smem:[#allocation5 + $0x2]] }
  0x2f   :  { %s164_s0 = scalar_lea.vmem %s4537_s5, %s3294_s13 }
  0x30   :  { %v184_v2 = vld [vmem:[%s164_s0] sm:$0x1] }
  0x31   :  { %185 = vst [vmem:[#allocation2 + $0x2] sm:$0x1] %v184_v2 }
  0x32   :  { %210 = vsyncadd [#allocation3 + $0x2], 16  ;;  %s3295_s30 = sld [smem:[#allocation5 + $0x3]] }
  0x38   :  { %s213_s1 = scalar_lea.vmem %s4537_s5, %s3295_s30 }
  0x39   :  { %v233_v3 = vld [vmem:[%s213_s1] sm:$0x1] }
  0x3a   :  { %234 = vst [vmem:[#allocation2 + $0x3] sm:$0x1] %v233_v3 }
  0x3b   :  { %259 = vsyncadd [#allocation3 + $0x3], 16  ;;  %s3296_s22 = sld [smem:[#allocation5 + $0x4]] }
  0x41   :  { %s262_s24 = scalar_lea.vmem %s4537_s5, %s3296_s22 }
  0x42   :  { %v282_v4 = vld [vmem:[%s262_s24] sm:$0x1] }
  0x43   :  { %283 = vst [vmem:[#allocation2 + $0x4] sm:$0x1] %v282_v4 }
  0x44   :  { %308 = vsyncadd [#allocation3 + $0x4], 16  ;;  %s3297_s25 = sld [smem:[#allocation5 + $0x5]] }
  0x4a   :  { %s311_s27 = scalar_lea.vmem %s4537_s5, %s3297_s25 }
  0x4b   :  { %v331_v5 = vld [vmem:[%s311_s27] sm:$0x1] }
  0x4c   :  { %332 = vst [vmem:[#allocation2 + $0x5] sm:$0x1] %v331_v5 }
  0x4d   :  { %357 = vsyncadd [#allocation3 + $0x5], 16  ;;  %s3298_s13 = sld [smem:[#allocation5 + $0x6]] }
  0x53   :  { %s360_s0 = scalar_lea.vmem %s4537_s5, %s3298_s13 }
  0x54   :  { %v380_v6 = vld [vmem:[%s360_s0] sm:$0x1] }
  0x55   :  { %381 = vst [vmem:[#allocation2 + $0x6] sm:$0x1] %v380_v6 }
  0x56   :  { %406 = vsyncadd [#allocation3 + $0x6], 16  ;;  %s3299_s30 = sld [smem:[#allocation5 + $0x7]] }
  0x5c   :  { %s409_s1 = scalar_lea.vmem %s4537_s5, %s3299_s30 }
  0x5d   :  { %v429_v7 = vld [vmem:[%s409_s1] sm:$0x1] }
  0x5e   :  { %430 = vst [vmem:[#allocation2 + $0x7] sm:$0x1] %v429_v7 }
  0x5f   :  { %455 = vsyncadd [#allocation3 + $0x7], 16  ;;  %s3300_s22 = sld [smem:[#allocation5 + $0x8]] }
  0x65   :  { %s458_s24 = scalar_lea.vmem %s4537_s5, %s3300_s22 }
  0x66   :  { %v478_v8 = vld [vmem:[%s458_s24] sm:$0x1] }
  0x67   :  { %479 = vst [vmem:[#allocation2 + $0x8] sm:$0x1] %v478_v8 }
  0x68   :  { %504 = vsyncadd [#allocation3 + $0x8], 16  ;;  %s3301_s25 = sld [smem:[#allocation5 + $0x9]] }
  0x6e   :  { %s507_s27 = scalar_lea.vmem %s4537_s5, %s3301_s25 }
  0x6f   :  { %v527_v9 = vld [vmem:[%s507_s27] sm:$0x1] }
  0x70   :  { %528 = vst [vmem:[#allocation2 + $0x9] sm:$0x1] %v527_v9 }
  0x71   :  { %553 = vsyncadd [#allocation3 + $0x9], 16  ;;  %s3302_s13 = sld [smem:[#allocation5 + $0xa]] }
  0x77   :  { %s556_s0 = scalar_lea.vmem %s4537_s5, %s3302_s13 }
  0x78   :  { %v576_v10 = vld [vmem:[%s556_s0] sm:$0x1] }
  0x79   :  { %577 = vst [vmem:[#allocation2 + $0xa] sm:$0x1] %v576_v10 }
  0x7a   :  { %602 = vsyncadd [#allocation3 + $0xa], 16  ;;  %s3303_s30 = sld [smem:[#allocation5 + $0xb]] }
  0x80   :  { %s605_s1 = scalar_lea.vmem %s4537_s5, %s3303_s30 }
  0x81   :  { %v625_v11 = vld [vmem:[%s605_s1] sm:$0x1] }
  0x82   :  { %626 = vst [vmem:[#allocation2 + $0xb] sm:$0x1] %v625_v11 }
  0x83   :  { %651 = vsyncadd [#allocation3 + $0xb], 16  ;;  %s3304_s22 = sld [smem:[#allocation5 + $0xc]] }
  0x89   :  { %s654_s24 = scalar_lea.vmem %s4537_s5, %s3304_s22 }
  0x8a   :  { %v674_v12 = vld [vmem:[%s654_s24] sm:$0x1] }
  0x8b   :  { %675 = vst [vmem:[#allocation2 + $0xc] sm:$0x1] %v674_v12 }
  0x8c   :  { %700 = vsyncadd [#allocation3 + $0xc], 16  ;;  %s3305_s25 = sld [smem:[#allocation5 + $0xd]] }
  0x92   :  { %s703_s27 = scalar_lea.vmem %s4537_s5, %s3305_s25 }
  0x93   :  { %v723_v13 = vld [vmem:[%s703_s27] sm:$0x1] }
  0x94   :  { %724 = vst [vmem:[#allocation2 + $0xd] sm:$0x1] %v723_v13 }
  0x95   :  { %749 = vsyncadd [#allocation3 + $0xd], 16  ;;  %s3306_s13 = sld [smem:[#allocation5 + $0xe]] }
  0x9b   :  { %s752_s0 = scalar_lea.vmem %s4537_s5, %s3306_s13 }
  0x9c   :  { %v772_v14 = vld [vmem:[%s752_s0] sm:$0x1] }
  0x9d   :  { %773 = vst [vmem:[#allocation2 + $0xe] sm:$0x1] %v772_v14 }
  0x9e   :  { %798 = vsyncadd [#allocation3 + $0xe], 16  ;;  %s3307_s30 = sld [smem:[#allocation5 + $0xf]] }
  0xa4   :  { %s801_s1 = scalar_lea.vmem %s4537_s5, %s3307_s30 }
  0xa5   :  { %v821_v15 = vld [vmem:[%s801_s1] sm:$0x1] }
  0xa6   :  { %822 = vst [vmem:[#allocation2 + $0xf] sm:$0x1] %v821_v15 }
  0xa7   :  { %847 = vsyncadd [#allocation3 + $0xf], 16  ;;  %v3772_v16 = vld [vmem:[%s4539_s7] sm:$0xff]   ;;  %v3939_v17 = vmov 0.0   ;;  %v3773_v18 = vld [vmem:[%s4539_s7 + $0x10] sm:$0xff]   ;;  %vm3940_vm0 = vmmov 0  }
  0xa8   :  { %3533 = vmatprep.subr.bf16.mxu0 %v3939_v17  ;;  %3541 = vmatprep.subr.bf16.mxu1 %v3939_v17  ;;  %v3774_v19 = vld [vmem:[%s4539_s7 + $0x8] sm:$0xff]   ;;  %v3775_v20 = vld [vmem:[%s4539_s7 + $0x18] sm:$0xff]   ;;  %s4559_s28 = sld [smem:[#allocation46_spill]]  ;;  %vm874_vm1 = vcmask 261120   ;;  %v3776_v24 = vld [vmem:[%s4539_s7 + $0x20] sm:$0xff]   ;;  %s4560_s3 = sld [smem:[#allocation47_spill]] }
  0xa9   :  { %3534 = vmatpush3.bf16.msra.mxu0 %v3772_v16  ;;  %3537 = vmatprep.mubr.msk.bf16.mxu0 %vm3940_vm0, %v3939_v17  ;;  %v3777_v25 = vld [vmem:[%s4539_s7 + $0x30] sm:$0xff]   ;;  %v3778_v26 = vld [vmem:[%s4539_s7 + $0x28] sm:$0xff]   ;;  %v3779_v27 = vld [vmem:[%s4539_s7 + $0x38] sm:$0xff]  }
  0xaa   :  { %3535 = vmatprep.subr.bf16.mxu0 %v3939_v17  ;;  %3542 = vmatpush3.bf16.msra.mxu1 %v3773_v18  ;;  %v3308_v29 = vld [vmem:[%s4542_s10] ss:$0 sm:$0xff]  ;;  %v3317_v31 = vld [vmem:[%s4542_s10 + $0x1] ss:$0 sm:$0xff]  ;;  %v3326_v43 = vld [vmem:[%s4542_s10 + $0x2] ss:$0 sm:$0xff] }
  0xab   :  { %3545 = vmatprep.mubr.msk.bf16.mxu1 %vm3940_vm0, %v3939_v17  ;;  %3543 = vmatprep.subr.bf16.mxu1 %v3939_v17  ;;  %v3335_v45 = vld [vmem:[%s4542_s10 + $0x3] ss:$0 sm:$0xff] }
  0xad   :  { %3536 = vmatpush3.bf16.msra.mxu0 %v3774_v19 }
  0xae   :  { %v848_v21 = vld [vmem:[%s4559_s28] sm:$0xff]  ;;  %v849_v22 = vld [vmem:[%s4559_s28 + $0x8] sm:$0xff]  ;;  %3549 = vmatprep.subr.bf16.mxu0 %v3939_v17  ;;  %3544 = vmatpush3.bf16.msra.mxu1 %v3775_v20 }
  0xaf   :  { %v850_v23 = vpack.c.bf16 %v849_v22, %v848_v21  ;;  %3557 = vmatprep.subr.bf16.mxu1 %v3939_v17  ;;  %v4149_v28 = vld [vmem:[%s4560_s3] sm:$0xff] }
  0xb1   :  { %3538 = vmatmul.mubr.msk.bf16.vlgmr.msra.gmra.mrb[0].mxu0 %vm874_vm1, %v850_v23  ;;  %3546 = vmatmul.mubr.msk.bf16.vlgmr.msra.gmra.mrb[0].mxu1 %vm874_vm1, %v850_v23 }
  0xb2   :  { %3550 = vmatpush3.bf16.msra.mxu0 %v3776_v24  ;;  %3553 = vmatprep.mubr.msk.bf16.mxu0 %vm3940_vm0, %v3939_v17 }
  0xb3   :  { %3551 = vmatprep.subr.bf16.mxu0 %v3939_v17  ;;  %3558 = vmatpush3.bf16.msra.mxu1 %v3777_v25 }
  0xb4   :  { %3561 = vmatprep.mubr.msk.bf16.mxu1 %vm3940_vm0, %v3939_v17  ;;  %3559 = vmatprep.subr.bf16.mxu1 %v3939_v17 }
  0xb6   :  { %3552 = vmatpush3.bf16.msra.mxu0 %v3778_v26 }
  0xb7   :  { %3560 = vmatpush3.bf16.msra.mxu1 %v3779_v27 }
  0xb9   :  { %3554 = vmatmul.mubr.msk.bf16.vlgmr.msra.gmra.mrb[4].mxu0 %vm874_vm1, %v850_v23 }
  0xba   :  { %3562 = vmatmul.mubr.msk.bf16.vlgmr.msra.gmra.mrb[4].mxu1 %vm874_vm1, %v850_v23 }
 0x184   :  { %v912_v30 = vpop.f32.mrb[0].mxu0  ;;  %v978_v34 = vpop.f32.mrb[0].mxu1 }
 0x185   :  { %v4157_v32 = vadd.f32 %v3308_v29, %v912_v30  ;;  %v3539_v33 = vpop.f32.mrb[1].mxu0  ;;  %v4159_v36 = vadd.f32 %v3317_v31, %v978_v34  ;;  %v3547_v37 = vpop.f32.mrb[1].mxu1 }
 0x186   :  { %v915_v35 = vpop.f32.mrb[2].mxu0  ;;  %v981_v40 = vpop.f32.mrb[2].mxu1 }
 0x187   :  { %v4161_v38 = vadd.f32 %v3308_v29, %v915_v35  ;;  %v3540_v39 = vpop.f32.mrb[3].mxu0  ;;  %v4163_v41 = vadd.f32 %v3317_v31, %v981_v40  ;;  %v3548_v42 = vpop.f32.mrb[3].mxu1 }
 0x18c   :  { %v1044_v44 = vpop.f32.mrb[4].mxu0 }
 0x18d   :  { %v4171_v46 = vadd.f32 %v3326_v43, %v1044_v44  ;;  %v3555_v47 = vpop.f32.mrb[5].mxu0  ;;  %v1110_v48 = vpop.f32.mrb[4].mxu1 }
 0x18e   :  { %v1047_v49 = vpop.f32.mrb[6].mxu0  ;;  %v4173_v50 = vadd.f32 %v3335_v45, %v1110_v48  ;;  %v3563_v51 = vpop.f32.mrb[5].mxu1 }
 0x18f   :  { %v4175_v52 = vadd.f32 %v3326_v43, %v1047_v49  ;;  %v3556_v53 = vpop.f32.mrb[7].mxu0  ;;  %v1113_v54 = vpop.f32.mrb[6].mxu1 }
 0x190   :  { %v4177_v55 = vadd.f32 %v3335_v45, %v1113_v54  ;;  %v3564_v56 = vpop.f32.mrb[7].mxu1 }
 0x191   :  { %3902 = dma.done.wait [#allocation3], 16 }
 0x192   :  { %3903 = vsyncadd [#allocation3], 4294967280 }
 0x193   :  { %3904 = dma.done.wait [#allocation3 + $0x1], 16 }
 0x194   :  { %3905 = vsyncadd [#allocation3 + $0x1], 4294967280 }
 0x195   :  { %3906 = dma.done.wait [#allocation3 + $0x2], 16 }
 0x196   :  { %3907 = vsyncadd [#allocation3 + $0x2], 4294967280 }
 0x197   :  { %3908 = dma.done.wait [#allocation3 + $0x3], 16 }
 0x198   :  { %3909 = vsyncadd [#allocation3 + $0x3], 4294967280 }
 0x199   :  { %3910 = dma.done.wait [#allocation3 + $0x4], 16 }
 0x19a   :  { %3911 = vsyncadd [#allocation3 + $0x4], 4294967280 }
 0x19b   :  { %3912 = dma.done.wait [#allocation3 + $0x5], 16 }
 0x19c   :  { %3913 = vsyncadd [#allocation3 + $0x5], 4294967280 }
 0x19d   :  { %3914 = dma.done.wait [#allocation3 + $0x6], 16 }
 0x19e   :  { %3915 = vsyncadd [#allocation3 + $0x6], 4294967280 }
 0x19f   :  { %3916 = dma.done.wait [#allocation3 + $0x7], 16 }
 0x1a0   :  { %3917 = vsyncadd [#allocation3 + $0x7], 4294967280 }
 0x1a1   :  { %3918 = dma.done.wait [#allocation3 + $0x8], 16 }
 0x1a2   :  { %3919 = vsyncadd [#allocation3 + $0x8], 4294967280 }
 0x1a3   :  { %3920 = dma.done.wait [#allocation3 + $0x9], 16 }
 0x1a4   :  { %3921 = vsyncadd [#allocation3 + $0x9], 4294967280 }
 0x1a5   :  { %3922 = dma.done.wait [#allocation3 + $0xa], 16 }
 0x1a6   :  { %3923 = vsyncadd [#allocation3 + $0xa], 4294967280 }
 0x1a7   :  { %3924 = dma.done.wait [#allocation3 + $0xb], 16 }
 0x1a8   :  { %3925 = vsyncadd [#allocation3 + $0xb], 4294967280 }
 0x1a9   :  { %3926 = dma.done.wait [#allocation3 + $0xc], 16 }
 0x1aa   :  { %3927 = vsyncadd [#allocation3 + $0xc], 4294967280 }
 0x1ab   :  { %3928 = dma.done.wait [#allocation3 + $0xd], 16 }
 0x1ac   :  { %3929 = vsyncadd [#allocation3 + $0xd], 4294967280 }
 0x1ad   :  { %3930 = dma.done.wait [#allocation3 + $0xe], 16 }
 0x1ae   :  { %3931 = vsyncadd [#allocation3 + $0xe], 4294967280 }
 0x1af   :  { %3932 = dma.done.wait [#allocation3 + $0xf], 16 }
 0x1b0   :  { %3933 = vsyncadd [#allocation3 + $0xf], 4294967280  ;;  %3565 = vmatprep.subr.bf16.mxu0 %v3939_v17  ;;  %3573 = vmatprep.subr.bf16.mxu1 %v3939_v17  ;;  %v1151_v57 = vld [vmem:[#allocation2] sm:$0xff]  ;;  %v1152_v58 = vld [vmem:[#allocation2 + $0x8] sm:$0xff]  ;;  %s4561_s3 = sld [smem:[#allocation48_spill]]  ;;  %vm1335_vm2 = vcmask 64512   ;;  %v1442_v35 = vpack.c.bf16 %v4161_v38, %v4161_v38 }
 0x1b1   :  { %3569 = vmatprep.mubr.msk.bf16.mxu0 %vm3940_vm0, %v3939_v17  ;;  %3577 = vmatprep.mubr.msk.bf16.mxu1 %vm3940_vm0, %v3939_v17  ;;  %v1153_v59 = vadd.f32 %v1151_v57, %v4149_v28  ;;  %v1154_v60 = vadd.f32 %v1152_v58, %v4149_v28  ;;  %v3780_v9 = vld [vmem:[%s4538_s6] sm:$0xff]   ;;  %v3782_v11 = vld [vmem:[%s4538_s6 + $0x8] sm:$0xff]   ;;  %v1333_v28 = vpack.c.bf16 %v4157_v32, %v4157_v32  ;;  %vm1397_vm3 = vcmask 1043456   ;;  %v3784_v58 = vld [vmem:[%s4538_s6 + $0x10] sm:$0xff]   ;;  %s4562_s23 = sld [smem:[#allocation49_spill]] }
 0x1b2   :  { %v3781_v10 = vld [vmem:[%s4540_s8] sm:$0xff]   ;;  %3566 = vmatpush3.bf16.msra.mxu0 %v3780_v9  ;;  %v3783_v12 = vld [vmem:[%s4540_s8 + $0x8] sm:$0xff]   ;;  %v1448_v56 = vsel %vm1335_vm2, %v1442_v35, 0  ;;  %v1790_v9 = vpack.c.bf16 %v4163_v41, %v4163_v41  ;;  %vm2891_vm4 = vcmask 1040384  }
 0x1b3   :  { %v1155_v61 = vsel %vm874_vm1, %v1153_v59, 0.0  ;;  %v1158_v62 = vsel %vm874_vm1, %v1154_v60, 0.0  ;;  %3574 = vmatpush3.bf16.msra.mxu1 %v3781_v10  ;;  %3567 = vmatprep.subr.bf16.mxu0 %v3939_v17  ;;  %v3340_v26 = vld [vmem:[%s4536_s4] ss:$0 sm:$0xff]  ;;  %v1340_v33 = vsel %vm1335_vm2, %v1333_v28, 0 }
 0x1b4   :  { %1156 = vadd.xlane.f32.xlu0 %v1155_v61  ;;  %3575 = vmatprep.subr.bf16.mxu1 %v3939_v17  ;;  %v3341_v32 = vld [vmem:[%s4541_s9] ss:$0 sm:$0xff]  ;;  %v1683_v61 = vpack.c.bf16 %v4159_v36, %v4159_v36  ;;  %v3358_v36 = vld [vmem:[%s4541_s9 + $0x1] ss:$0 sm:$0xff] }
 0x1b5   :  { %v3345_v34 = vld [vmem:[%s4543_s11] ss:$0 sm:$0xff] }
 0x1b6   :  { %3568 = vmatpush3.bf16.msra.mxu0 %v3782_v11  ;;  %v3339_v22 = vld [vmem:[%s4561_s3] ss:$0 sm:$0xff] }
 0x1b7   :  { %3576 = vmatpush3.bf16.msra.mxu1 %v3783_v12  ;;  %3581 = vmatprep.subr.bf16.mxu0 %v3939_v17 }
 0x1b8   :  { %1159 = vadd.xlane.f32.xlu0 %v1158_v62  ;;  %3587 = vmatprep.subr.bf16.mxu1 %v3939_v17  ;;  %v1689_v62 = vsel %vm1335_vm2, %v1683_v61, 0 }
 0x241   :  { %v1157_v63 = vpop.xlane.xlu0 %1156 }
 0x242   :  { %v1162_v0 = vmul.f32 0.03125, %v1157_v63 }
 0x244   :  { %v1164_v1 = vsub.f32 %v1153_v59, %v1162_v0 }
 0x245   :  { %v1160_v2 = vpop.xlane.xlu0 %1159 }
 0x246   :  { %v1163_v3 = vmul.f32 0.03125, %v1160_v2  ;;  %v1166_v4 = vmul.f32 %v1164_v1, %v1164_v1 }
 0x248   :  { %v1165_v5 = vsub.f32 %v1154_v60, %v1163_v3  ;;  %v1168_v6 = vsel %vm874_vm1, %v1166_v4, 0.0  ;;  %v3785_v60 = vld [vmem:[%s4538_s6 + $0x18] sm:$0xff]  }
 0x249   :  { %1169 = vadd.xlane.f32.xlu1 %v1168_v6 }
 0x24a   :  { %v1167_v7 = vmul.f32 %v1165_v5, %v1165_v5 }
 0x24c   :  { %v1171_v8 = vsel %vm874_vm1, %v1167_v7, 0.0 }
 0x24d   :  { %1172 = vadd.xlane.f32.xlu1 %v1171_v8 }
 0x2d6   :  { %v1170_v13 = vpop.xlane.xlu1 %1169 }
 0x2d7   :  { %v1174_v14 = vmul.f32 0.03125, %v1170_v13 }
 0x2d9   :  { %v1176_v15 = vadd.f32 1e-05, %v1174_v14 }
 0x2da   :  { %v1173_v16 = vpop.xlane.xlu1 %1172 }
 0x2db   :  { %3800 = vrsqrt.f32 %v1176_v15  ;;  %v1175_v18 = vmul.f32 0.03125, %v1173_v16  ;;  %v1796_v16 = vsel %vm1335_vm2, %v1790_v9, 0 }
 0x2dd   :  { %v1177_v19 = vadd.f32 1e-05, %v1175_v18 }
 0x2df   :  { %3802 = vrsqrt.f32 %v1177_v19 }
 0x2e5   :  { %v3801_v20 = vpop.eup %3800 }
 0x2e6   :  { %v1180_v21 = vmul.f32 %v3801_v20, %v1164_v1 }
 0x2e8   :  { %v1189_v24 = vmul.f32 %v3339_v22, %v1180_v21 }
 0x2e9   :  { %v3803_v23 = vpop.eup %3802 }
 0x2ea   :  { %v1181_v25 = vmul.f32 %v3803_v23, %v1165_v5  ;;  %v1198_v29 = vadd.f32 %v3340_v26, %v1189_v24 }
 0x2ec   :  { %v1190_v27 = vmul.f32 %v3339_v22, %v1181_v25 }
 0x2ee   :  { %v1199_v30 = vadd.f32 %v3340_v26, %v1190_v27 }
 0x2f0   :  { %v4215_v31 = vpack.c.bf16 %v1199_v30, %v1198_v29 }
 0x2f2   :  { %3570 = vmatmul.mubr.msk.bf16.vlgmr.msra.gmra.mrb[8].mxu0 %vm874_vm1, %v4215_v31  ;;  %3578 = vmatmul.mubr.msk.bf16.vlgmr.msra.gmra.mrb[8].mxu1 %vm874_vm1, %v4215_v31 }
 0x2f3   :  { %3582 = vmatpush3.bf16.xpose.msra.mxu0 %v1340_v33  ;;  %3583 = vmatprep.mubr.msk.bf16.mxu0 %vm3940_vm0, %v3939_v17 }
 0x2f4   :  { %3593 = vmatprep.subr.bf16.mxu0 %v3939_v17  ;;  %3589 = vmatprep.mubr.msk.bf16.mxu1 %vm3940_vm0, %v3939_v17 }
 0x3c5   :  { %v1261_v37 = vpop.f32.mrb[8].mxu0  ;;  %v1325_v39 = vpop.f32.mrb[8].mxu1 }
 0x3c6   :  { %v1262_v40 = vadd.f32 %v3341_v32, %v1261_v37  ;;  %v1326_v42 = vadd.f32 %v3345_v34, %v1325_v39  ;;  %v3571_v43 = vpop.f32.mrb[9].mxu0  ;;  %v3579_v44 = vpop.f32.mrb[9].mxu1 }
 0x3c7   :  { %v1264_v45 = vpop.f32.mrb[10].mxu0  ;;  %v1328_v47 = vpop.f32.mrb[10].mxu1 }
 0x3c8   :  { %v1332_v48 = vpack.c.bf16 %v1262_v40, %v1262_v40  ;;  %v1334_v49 = vpack.c.bf16 %v1326_v42, %v1326_v42  ;;  %v4235_v51 = vadd.f32 %v3345_v34, %v1328_v47  ;;  %v3572_v53 = vpop.f32.mrb[11].mxu0  ;;  %v3580_v54 = vpop.f32.mrb[11].mxu1  ;;  %v1265_v38 = vadd.f32 %v3341_v32, %v1264_v45 }
 0x3ca   :  { %v1399_v57 = vsel %vm1397_vm3, %v1334_v49, 0  ;;  %3584 = vmatmul.mubr.msk.bf16.vlgmr.msra.gmra.mrb[12].mxu0 %vm1335_vm2, %v1332_v48  ;;  %v1441_v59 = vpack.c.bf16 %v1265_v38, %v1265_v38  ;;  %v1443_v47 = vpack.c.bf16 %v4235_v51, %v4235_v51  ;;  %v3787_v51 = vld [vmem:[%s4540_s8 + $0x18] sm:$0xff]  }
 0x3cb   :  { %3588 = vmatpush3.bf16.msra.mxu1 %v1399_v57  ;;  %3594 = vmatpush3.bf16.xpose.msra.mxu0 %v1448_v56  ;;  %v3786_v57 = vld [vmem:[%s4540_s8 + $0x10] sm:$0xff]  }
 0x3cc   :  { %3595 = vmatprep.mubr.msk.bf16.mxu0 %vm3940_vm0, %v3939_v17  ;;  %3605 = vmatprep.subr.bf16.mxu0 %v3939_v17  ;;  %v1506_v53 = vsel %vm1397_vm3, %v1443_v47, 0  ;;  %v3790_v47 = vld [vmem:[%s4538_s6 + $0x20] sm:$0xff]  }
 0x3cd   :  { %3599 = vmatprep.subr.bf16.mxu1 %v3939_v17 }
 0x3d2   :  { %3596 = vmatmul.mubr.msk.bf16.vlgmr.msra.gmra.mrb[16].mxu0 %vm1335_vm2, %v1441_v59 }
 0x3d3   :  { %3606 = vmatpush3.bf16.msra.mxu0 %v3784_v58  ;;  %3609 = vmatprep.mubr.msk.bf16.mxu0 %vm3940_vm0, %v3939_v17 }
 0x3d4   :  { %3607 = vmatprep.subr.bf16.mxu0 %v3939_v17 }
 0x3d7   :  { %3608 = vmatpush3.bf16.msra.mxu0 %v3785_v60 }
 0x3d8   :  { %3621 = vmatprep.subr.bf16.mxu0 %v3939_v17 }
 0x3da   :  { %3610 = vmatmul.mubr.msk.bf16.vlgmr.msra.gmra.mrb[20].mxu0 %vm874_vm1, %v4215_v31 }
 0x3db   :  { %3623 = vmatprep.mubr.msk.bf16.mxu0 %vm3940_vm0, %v3939_v17 }
 0x3e0   :  { %3622 = vmatpush3.bf16.xpose.msra.mxu0 %v1689_v62 }
 0x3e1   :  { %3633 = vmatprep.subr.bf16.mxu0 %v3939_v17 }
 0x49d   :  { %v1376_v63 = vpop.f32.mrb[12].mxu0 }
 0x49e   :  { %v3585_v0 = vpop.f32.mrb[13].mxu0  ;;  %v1382_v1 = vsel %vm1335_vm2, %v1376_v63, -inf }
 0x49f   :  { %1383 = vmax.xlane.f32.xlu0 %v1382_v1  ;;  %v1379_v2 = vpop.f32.mrb[14].mxu0 }
 0x4a0   :  { %v3586_v3 = vpop.f32.mrb[15].mxu0 }
 0x4a5   :  { %v1484_v4 = vpop.f32.mrb[16].mxu0 }
 0x4a6   :  { %v3597_v5 = vpop.f32.mrb[17].mxu0  ;;  %v1490_v6 = vsel %vm1335_vm2, %v1484_v4, -inf }
 0x4a7   :  { %1491 = vmax.xlane.f32.xlu1 %v1490_v6  ;;  %v1487_v7 = vpop.f32.mrb[18].mxu0 }
 0x4a8   :  { %v3598_v8 = vpop.f32.mrb[19].mxu0 }
 0x4ad   :  { %v1609_v10 = vpop.f32.mrb[20].mxu0 }
 0x4ae   :  { %v1610_v11 = vadd.f32 %v3358_v36, %v1609_v10  ;;  %v3611_v12 = vpop.f32.mrb[21].mxu0 }
 0x4af   :  { %v1612_v13 = vpop.f32.mrb[22].mxu0 }
 0x4b0   :  { %v1682_v14 = vpack.c.bf16 %v1610_v11, %v1610_v11  ;;  %v3612_v15 = vpop.f32.mrb[23].mxu0  ;;  %v1613_v18 = vadd.f32 %v3358_v36, %v1612_v13 }
 0x4b2   :  { %3624 = vmatmul.mubr.msk.bf16.vlgmr.msra.gmra.mrb[24].mxu0 %vm1335_vm2, %v1682_v14  ;;  %v1789_v19 = vpack.c.bf16 %v1613_v18, %v1613_v18  ;;  %v3367_v14 = vld [vmem:[%s4543_s11 + $0x1] ss:$0 sm:$0xff] }
 0x4b3   :  { %3634 = vmatpush3.bf16.xpose.msra.mxu0 %v1796_v16  ;;  %3635 = vmatprep.mubr.msk.bf16.mxu0 %vm3940_vm0, %v3939_v17 }
 0x4b4   :  { %3645 = vmatprep.subr.bf16.mxu0 %v3939_v17 }
 0x4ba   :  { %3636 = vmatmul.mubr.msk.bf16.vlgmr.msra.gmra.mrb[28].mxu0 %vm1335_vm2, %v1789_v19 }
 0x4bb   :  { %3647 = vmatprep.mubr.msk.bf16.mxu0 %vm3940_vm0, %v3939_v17 }
 0x52c   :  { %v1384_v41 = vpop.xlane.xlu0 %1383 }
 0x52d   :  { %v1385_v20 = vsub.f32 %v1376_v63, %v1384_v41 }
 0x52f   :  { %v1386_v21 = vmul.f32 1.442695, %v1385_v20 }
 0x531   :  { %3804 = vpow2.f32 %v1386_v21 }
 0x534   :  { %v1492_v22 = vpop.xlane.xlu1 %1491 }
 0x535   :  { %v1493_v23 = vsub.f32 %v1484_v4, %v1492_v22 }
 0x537   :  { %v1494_v24 = vmul.f32 1.442695, %v1493_v23 }
 0x539   :  { %3806 = vpow2.f32 %v1494_v24 }
 0x53b   :  { %v3805_v25 = vpop.eup %3804 }
 0x53c   :  { %v1388_v26 = vsel %vm1335_vm2, %v3805_v25, 0.0 }
 0x53d   :  { %1389 = vadd.xlane.f32.xlu0 %v1388_v26 }
 0x543   :  { %v3807_v27 = vpop.eup %3806 }
 0x544   :  { %v1496_v28 = vsel %vm1335_vm2, %v3807_v27, 0.0 }
 0x545   :  { %1497 = vadd.xlane.f32.xlu1 %v1496_v28 }
 0x585   :  { %v1725_v29 = vpop.f32.mrb[24].mxu0 }
 0x586   :  { %v3625_v30 = vpop.f32.mrb[25].mxu0  ;;  %v1731_v33 = vsel %vm1335_vm2, %v1725_v29, -inf }
 0x587   :  { %1732 = vmax.xlane.f32.xlu0 %v1731_v33  ;;  %v1728_v32 = vpop.f32.mrb[26].mxu0  ;;  %v1549_v30 = vld [vmem:[%s4544_s12] sm:$0xf] }
 0x588   :  { %v3626_v34 = vpop.f32.mrb[27].mxu0  ;;  %v1950_v32 = vsel %vm1397_vm3, %v1549_v30, 0 }
 0x589   :  { %v3788_v34 = vld [vmem:[%s4540_s8 + $0x20] sm:$0xff]  }
 0x58d   :  { %v1832_v35 = vpop.f32.mrb[28].mxu0 }
 0x58e   :  { %v3637_v37 = vpop.f32.mrb[29].mxu0  ;;  %v1838_v39 = vsel %vm1335_vm2, %v1832_v35, -inf }
 0x58f   :  { %1839 = vmax.xlane.f32.xlu1 %v1838_v39  ;;  %v1835_v40 = vpop.f32.mrb[30].mxu0  ;;  %v3375_v37 = vld [vmem:[%s4544_s12 + $0x4] sm:$0xf] }
 0x590   :  { %v3638_v42 = vpop.f32.mrb[31].mxu0  ;;  %v1903_v39 = vsel %vm1397_vm3, %v3375_v37, 0 }
 0x591   :  { %3646 = vmatpush3.bf16.msra.mxu0 %v1903_v39 }
 0x592   :  { %3657 = vmatprep.subr.bf16.mxu0 %v3939_v17 }
 0x5ca   :  { %v1390_v43 = vpop.xlane.xlu0 %1389 }
 0x5cb   :  { %3808 = vrcp.f32 %v1390_v43 }
 0x5d2   :  { %v1498_v44 = vpop.xlane.xlu1 %1497 }
 0x5d3   :  { %3810 = vrcp.f32 %v1498_v44 }
 0x5d5   :  { %v3809_v45 = vpop.eup %3808 }
 0x5d6   :  { %v1392_v48 = vmul.f32 %v3809_v45, %v3805_v25 }
 0x5d8   :  { %v1393_v49 = vpack.c.bf16 %v1392_v48, %v1392_v48 }
 0x5da   :  { %3590 = vmatmul.mubr.msk.bf16.vlgmr.msra.gmra.mrb[12].mxu1 %vm1335_vm2, %v1393_v49 }
 0x5db   :  { %3600 = vmatpush3.bf16.msra.mxu1 %v1506_v53  ;;  %3601 = vmatprep.mubr.msk.bf16.mxu1 %vm3940_vm0, %v3939_v17 }
 0x5dc   :  { %3613 = vmatprep.subr.bf16.mxu1 %v3939_v17 }
 0x5dd   :  { %v3811_v54 = vpop.eup %3810 }
 0x5de   :  { %v1500_v56 = vmul.f32 %v3811_v54, %v3807_v27 }
 0x5e0   :  { %v1501_v38 = vpack.c.bf16 %v1500_v56, %v1500_v56  ;;  %v3791_v56 = vld [vmem:[%s4538_s6 + $0x28] sm:$0xff]  }
 0x5e2   :  { %3602 = vmatmul.mubr.msk.bf16.vlgmr.msra.gmra.mrb[16].mxu1 %vm1335_vm2, %v1501_v38 }
 0x5e3   :  { %3614 = vmatpush3.bf16.msra.mxu1 %v3786_v57  ;;  %3617 = vmatprep.mubr.msk.bf16.mxu1 %vm3940_vm0, %v3939_v17 }
 0x5e4   :  { %3615 = vmatprep.subr.bf16.mxu1 %v3939_v17 }
 0x5e7   :  { %3616 = vmatpush3.bf16.msra.mxu1 %v3787_v51 }
 0x5e8   :  { %3627 = vmatprep.subr.bf16.mxu1 %v3939_v17 }
 0x5ea   :  { %3618 = vmatmul.mubr.msk.bf16.vlgmr.msra.gmra.mrb[20].mxu1 %vm874_vm1, %v4215_v31 }
 0x5eb   :  { %3629 = vmatprep.mubr.msk.bf16.mxu1 %vm3940_vm0, %v3939_v17 }
 0x614   :  { %v1733_v58 = vpop.xlane.xlu0 %1732 }
 0x615   :  { %v1734_v59 = vsub.f32 %v1725_v29, %v1733_v58 }
 0x617   :  { %v1735_v60 = vmul.f32 1.442695, %v1734_v59  ;;  %v3392_v59 = vld [vmem:[%s4543_s11 + $0x2] ss:$0 sm:$0xff] }
 0x619   :  { %3812 = vpow2.f32 %v1735_v60 }
 0x61c   :  { %v1840_v61 = vpop.xlane.xlu1 %1839 }
 0x61d   :  { %v1841_v62 = vsub.f32 %v1832_v35, %v1840_v61  ;;  %v3789_v35 = vld [vmem:[%s4540_s8 + $0x28] sm:$0xff]  }
 0x61f   :  { %v1842_v63 = vmul.f32 1.442695, %v1841_v62 }
 0x621   :  { %3814 = vpow2.f32 %v1842_v63 }
 0x623   :  { %v3813_v0 = vpop.eup %3812 }
 0x624   :  { %v1737_v1 = vsel %vm1335_vm2, %v3813_v0, 0.0 }
 0x625   :  { %1738 = vadd.xlane.f32.xlu0 %v1737_v1 }
 0x62b   :  { %v3815_v2 = vpop.eup %3814 }
 0x62c   :  { %v1844_v3 = vsel %vm1335_vm2, %v3815_v2, 0.0 }
 0x62d   :  { %1845 = vadd.xlane.f32.xlu1 %v1844_v3 }
 0x6ad   :  { %v1435_v4 = vpop.f32.mrb[12].mxu1 }
 0x6ae   :  { %v3591_v5 = vpop.f32.mrb[13].mxu1 }
 0x6af   :  { %v1438_v6 = vpop.f32.mrb[14].mxu1 }
 0x6b0   :  { %v3592_v7 = vpop.f32.mrb[15].mxu1 }
 0x6b2   :  { %v1739_v8 = vpop.xlane.xlu0 %1738 }
 0x6b3   :  { %3816 = vrcp.f32 %v1739_v8 }
 0x6b5   :  { %v1542_v36 = vpop.f32.mrb[16].mxu1 }
 0x6b6   :  { %v1548_v9 = vpack.c.bf16 %v1542_v36, %v1435_v4  ;;  %v3603_v10 = vpop.f32.mrb[17].mxu1  ;;  %v2126_v4 = vpack.c.bf16 %v4171_v46, %v4171_v46  ;;  %v2233_v46 = vpack.c.bf16 %v4175_v52, %v4175_v52 }
 0x6b7   :  { %v1545_v11 = vpop.f32.mrb[18].mxu1 }
 0x6b8   :  { %v3604_v12 = vpop.f32.mrb[19].mxu1  ;;  %v2132_v5 = vsel %vm1335_vm2, %v2126_v4, 0  ;;  %v3383_v11 = vld [vmem:[%s4541_s9 + $0x2] ss:$0 sm:$0xff]  ;;  %v3794_v4 = vld [vmem:[%s4540_s8 + $0x30] sm:$0xff]  }
 0x6ba   :  { %v1846_v13 = vpop.xlane.xlu1 %1845 }
 0x6bb   :  { %3818 = vrcp.f32 %v1846_v13 }
 0x6bd   :  { %v3817_v15 = vpop.eup %3816  ;;  %v1675_v16 = vpop.f32.mrb[20].mxu1 }
 0x6be   :  { %v1676_v18 = vadd.f32 %v3367_v14, %v1675_v16  ;;  %v3619_v19 = vpop.f32.mrb[21].mxu1  ;;  %v1741_v20 = vmul.f32 %v3817_v15, %v3813_v0 }
 0x6bf   :  { %v1678_v41 = vpop.f32.mrb[22].mxu1  ;;  %v2239_v19 = vsel %vm1335_vm2, %v2233_v46, 0 }
 0x6c0   :  { %v1684_v21 = vpack.c.bf16 %v1676_v18, %v1676_v18  ;;  %v1679_v22 = vadd.f32 %v3367_v14, %v1678_v41  ;;  %v3620_v23 = vpop.f32.mrb[23].mxu1  ;;  %v1742_v26 = vpack.c.bf16 %v1741_v20, %v1741_v20 }
 0x6c2   :  { %v1747_v24 = vsel %vm1397_vm3, %v1684_v21, 0  ;;  %v1791_v25 = vpack.c.bf16 %v1679_v22, %v1679_v22 }
 0x6c3   :  { %3628 = vmatpush3.bf16.msra.mxu1 %v1747_v24 }
 0x6c4   :  { %3639 = vmatprep.subr.bf16.mxu1 %v3939_v17  ;;  %v1854_v28 = vsel %vm1397_vm3, %v1791_v25, 0 }
 0x6c5   :  { %v3819_v27 = vpop.eup %3818 }
 0x6c6   :  { %3630 = vmatmul.mubr.msk.bf16.vlgmr.msra.gmra.mrb[24].mxu1 %vm1335_vm2, %v1742_v26  ;;  %v1848_v29 = vmul.f32 %v3819_v27, %v3815_v2 }
 0x6c7   :  { %3640 = vmatpush3.bf16.msra.mxu1 %v1854_v28  ;;  %3641 = vmatprep.mubr.msk.bf16.mxu1 %vm3940_vm0, %v3939_v17 }
 0x6c8   :  { %3651 = vmatprep.subr.bf16.mxu1 %v3939_v17  ;;  %v1849_v33 = vpack.c.bf16 %v1848_v29, %v1848_v29 }
 0x6ce   :  { %3642 = vmatmul.mubr.msk.bf16.vlgmr.msra.gmra.mrb[28].mxu1 %vm1335_vm2, %v1849_v33 }
 0x6cf   :  { %3652 = vmatpush3.bf16.msra.mxu1 %v1950_v32  ;;  %3653 = vmatprep.mubr.msk.bf16.mxu1 %vm3940_vm0, %v3939_v17 }
 0x6d0   :  { %3665 = vmatprep.subr.bf16.mxu1 %v3939_v17 }
 0x6d6   :  { %3654 = vmatmul.mubr.msk.bf16.vlgmr.msra.gmra.mrb[32].mxu1 %vm1335_vm2, %v1548_v9 }
 0x6d7   :  { %3666 = vmatpush3.bf16.msra.mxu1 %v3788_v34  ;;  %3669 = vmatprep.mubr.msk.bf16.mxu1 %vm3940_vm0, %v3939_v17 }
 0x6d8   :  { %3667 = vmatprep.subr.bf16.mxu1 %v3939_v17 }
 0x6db   :  { %3668 = vmatpush3.bf16.msra.mxu1 %v3789_v35 }
 0x6dc   :  { %3679 = vmatprep.subr.bf16.mxu1 %v3939_v17 }
 0x6de   :  { %3670 = vmatmul.mubr.msk.bf16.vlgmr.msra.gmra.mrb[36].mxu1 %vm874_vm1, %v4215_v31 }
 0x6df   :  { %3681 = vmatprep.mubr.msk.bf16.mxu1 %vm3940_vm0, %v3939_v17 }
 0x799   :  { %v1783_v40 = vpop.f32.mrb[24].mxu1 }
 0x79a   :  { %v3631_v42 = vpop.f32.mrb[25].mxu1 }
 0x79b   :  { %v1786_v43 = vpop.f32.mrb[26].mxu1 }
 0x79c   :  { %v3632_v44 = vpop.f32.mrb[27].mxu1 }
 0x7a1   :  { %v1890_v45 = vpop.f32.mrb[28].mxu1 }
 0x7a2   :  { %v1896_v48 = vpack.c.bf16 %v1890_v45, %v1783_v40  ;;  %v3643_v49 = vpop.f32.mrb[29].mxu1 }
 0x7a3   :  { %v1893_v53 = vpop.f32.mrb[30].mxu1 }
 0x7a4   :  { %v3644_v54 = vpop.f32.mrb[31].mxu1  ;;  %3648 = vmatmul.mubr.msk.bf16.vlgmr.msra.gmra.mrb[32].mxu0 %vm1335_vm2, %v1896_v48 }
 0x7a5   :  { %3658 = vmatpush3.bf16.msra.mxu0 %v3790_v47  ;;  %3661 = vmatprep.mubr.msk.bf16.mxu0 %vm3940_vm0, %v3939_v17 }
 0x7a6   :  { %3659 = vmatprep.subr.bf16.mxu0 %v3939_v17 }
 0x7a9   :  { %v1986_v57 = vpop.f32.mrb[32].mxu1  ;;  %3660 = vmatpush3.bf16.msra.mxu0 %v3791_v56 }
 0x7aa   :  { %v3655_v38 = vpop.f32.mrb[33].mxu1  ;;  %3673 = vmatprep.subr.bf16.mxu0 %v3939_v17 }
 0x7ab   :  { %v1989_v51 = vpop.f32.mrb[34].mxu1  ;;  %v3792_v38 = vld [vmem:[%s4538_s6 + $0x30] sm:$0xff]  }
 0x7ac   :  { %v3656_v58 = vpop.f32.mrb[35].mxu1  ;;  %3662 = vmatmul.mubr.msk.bf16.vlgmr.msra.gmra.mrb[36].mxu0 %vm874_vm1, %v4215_v31 }
 0x7ad   :  { %3675 = vmatprep.mubr.msk.bf16.mxu0 %vm3940_vm0, %v3939_v17  ;;  %v3793_v58 = vld [vmem:[%s4538_s6 + $0x38] sm:$0xff]  }
 0x7b1   :  { %v2118_v60 = vpop.f32.mrb[36].mxu1 }
 0x7b2   :  { %v2119_v61 = vadd.f32 %v3392_v59, %v2118_v60  ;;  %v3671_v62 = vpop.f32.mrb[37].mxu1  ;;  %3674 = vmatpush3.bf16.xpose.msra.mxu0 %v2132_v5 }
 0x7b3   :  { %v2121_v63 = vpop.f32.mrb[38].mxu1  ;;  %3685 = vmatprep.subr.bf16.mxu0 %v3939_v17 }
 0x7b4   :  { %v2127_v0 = vpack.c.bf16 %v2119_v61, %v2119_v61  ;;  %v4362_v1 = vadd.f32 %v3392_v59, %v2121_v63  ;;  %v3672_v2 = vpop.f32.mrb[39].mxu1  ;;  %v3400_v59 = vld [vmem:[%s4544_s12 + $0x8] sm:$0xf]  ;;  %v2524_v61 = vpack.c.bf16 %v4173_v50, %v4173_v50  ;;  %v3795_v50 = vld [vmem:[%s4540_s8 + $0x38] sm:$0xff]  }
 0x7b5   :  { %v2346_v60 = vsel %vm1397_vm3, %v3400_v59, 0 }
 0x7b6   :  { %v2190_v3 = vsel %vm1397_vm3, %v2127_v0, 0  ;;  %v2234_v48 = vpack.c.bf16 %v4362_v1, %v4362_v1  ;;  %v2530_v62 = vsel %vm1335_vm2, %v2524_v61, 0 }
 0x7b7   :  { %3680 = vmatpush3.bf16.msra.mxu1 %v2190_v3 }
 0x7b8   :  { %3691 = vmatprep.subr.bf16.mxu1 %v3939_v17  ;;  %v2297_v54 = vsel %vm1397_vm3, %v2234_v48, 0 }
 0x877   :  { %v1939_v6 = vpop.f32.mrb[32].mxu0 }
 0x878   :  { %v4370_v7 = vadd.f32 %v1986_v57, %v1939_v6  ;;  %v3649_v8 = vpop.f32.mrb[33].mxu0 }
 0x879   :  { %v1942_v36 = vpop.f32.mrb[34].mxu0 }
 0x87a   :  { %v4372_v9 = vadd.f32 %v1989_v51, %v1942_v36  ;;  %v3650_v10 = vpop.f32.mrb[35].mxu0 }
 0x87b   :  { %v3407_v10 = vld [vmem:[%s4541_s9 + $0x3] ss:$0 sm:$0xff] }
 0x87f   :  { %v2052_v12 = vpop.f32.mrb[36].mxu0 }
 0x880   :  { %v2053_v13 = vadd.f32 %v3383_v11, %v2052_v12  ;;  %v3663_v14 = vpop.f32.mrb[37].mxu0 }
 0x881   :  { %v2055_v15 = vpop.f32.mrb[38].mxu0 }
 0x882   :  { %v2125_v16 = vpack.c.bf16 %v2053_v13, %v2053_v13  ;;  %v3664_v18 = vpop.f32.mrb[39].mxu0  ;;  %v2056_v41 = vadd.f32 %v3383_v11, %v2055_v15  ;;  %v2631_v11 = vpack.c.bf16 %v4177_v55, %v4177_v55 }
 0x884   :  { %3676 = vmatmul.mubr.msk.bf16.vlgmr.msra.gmra.mrb[40].mxu0 %vm1335_vm2, %v2125_v16  ;;  %v2232_v20 = vpack.c.bf16 %v2056_v41, %v2056_v41  ;;  %v2637_v18 = vsel %vm1335_vm2, %v2631_v11, 0 }
 0x885   :  { %3686 = vmatpush3.bf16.xpose.msra.mxu0 %v2239_v19  ;;  %3687 = vmatprep.mubr.msk.bf16.mxu0 %vm3940_vm0, %v3939_v17 }
 0x886   :  { %3697 = vmatprep.subr.bf16.mxu0 %v3939_v17 }
 0x88c   :  { %3688 = vmatmul.mubr.msk.bf16.vlgmr.msra.gmra.mrb[44].mxu0 %vm1335_vm2, %v2232_v20 }
 0x88d   :  { %3699 = vmatprep.mubr.msk.bf16.mxu0 %vm3940_vm0, %v3939_v17  ;;  %3698 = vmatpush3.bf16.msra.mxu0 %v2346_v60 }
 0x88e   :  { %3711 = vmatprep.subr.bf16.mxu0 %v3939_v17 }
 0x957   :  { %v2168_v52 = vpop.f32.mrb[40].mxu0 }
 0x958   :  { %v3677_v21 = vpop.f32.mrb[41].mxu0  ;;  %v2174_v22 = vsel %vm1335_vm2, %v2168_v52, -inf }
 0x959   :  { %2175 = vmax.xlane.f32.xlu0 %v2174_v22  ;;  %v2171_v23 = vpop.f32.mrb[42].mxu0 }
 0x95a   :  { %v3678_v24 = vpop.f32.mrb[43].mxu0  ;;  %v3416_v23 = vld [vmem:[%s4543_s11 + $0x3] ss:$0 sm:$0xff] }
 0x95f   :  { %v2275_v25 = vpop.f32.mrb[44].mxu0 }
 0x960   :  { %v3689_v26 = vpop.f32.mrb[45].mxu0  ;;  %v2281_v27 = vsel %vm1335_vm2, %v2275_v25, -inf }
 0x961   :  { %2282 = vmax.xlane.f32.xlu1 %v2281_v27  ;;  %v2278_v28 = vpop.f32.mrb[46].mxu0 }
 0x962   :  { %v3690_v29 = vpop.f32.mrb[47].mxu0 }
 0x9e6   :  { %v2176_v30 = vpop.xlane.xlu0 %2175 }
 0x9e7   :  { %v2177_v33 = vsub.f32 %v2168_v52, %v2176_v30 }
 0x9e9   :  { %v2178_v32 = vmul.f32 1.442695, %v2177_v33 }
 0x9eb   :  { %3820 = vpow2.f32 %v2178_v32 }
 0x9ee   :  { %v2283_v34 = vpop.xlane.xlu1 %2282 }
 0x9ef   :  { %v2284_v35 = vsub.f32 %v2275_v25, %v2283_v34 }
 0x9f1   :  { %v2285_v37 = vmul.f32 1.442695, %v2284_v35 }
 0x9f3   :  { %3822 = vpow2.f32 %v2285_v37 }
 0x9f5   :  { %v3821_v39 = vpop.eup %3820 }
 0x9f6   :  { %v2180_v40 = vsel %vm1335_vm2, %v3821_v39, 0.0 }
 0x9f7   :  { %2181 = vadd.xlane.f32.xlu0 %v2180_v40 }
 0x9fd   :  { %v3823_v42 = vpop.eup %3822 }
 0x9fe   :  { %v2287_v43 = vsel %vm1335_vm2, %v3823_v42, 0.0 }
 0x9ff   :  { %2288 = vadd.xlane.f32.xlu1 %v2287_v43 }
 0xa84   :  { %v2182_v44 = vpop.xlane.xlu0 %2181 }
 0xa85   :  { %3824 = vrcp.f32 %v2182_v44 }
 0xa8c   :  { %v2289_v45 = vpop.xlane.xlu1 %2288 }
 0xa8d   :  { %3826 = vrcp.f32 %v2289_v45 }
 0xa8f   :  { %v3825_v47 = vpop.eup %3824 }
 0xa90   :  { %v2184_v49 = vmul.f32 %v3825_v47, %v3821_v39 }
 0xa92   :  { %v2185_v53 = vpack.c.bf16 %v2184_v49, %v2184_v49 }
 0xa94   :  { %3682 = vmatmul.mubr.msk.bf16.vlgmr.msra.gmra.mrb[40].mxu1 %vm1335_vm2, %v2185_v53 }
 0xa95   :  { %3692 = vmatpush3.bf16.msra.mxu1 %v2297_v54  ;;  %3693 = vmatprep.mubr.msk.bf16.mxu1 %vm3940_vm0, %v3939_v17 }
 0xa96   :  { %3703 = vmatprep.subr.bf16.mxu1 %v3939_v17 }
 0xa97   :  { %v3827_v56 = vpop.eup %3826 }
 0xa98   :  { %v2291_v57 = vmul.f32 %v3827_v56, %v3823_v42 }
 0xa9a   :  { %v2292_v51 = vpack.c.bf16 %v2291_v57, %v2291_v57 }
 0xa9c   :  { %3694 = vmatmul.mubr.msk.bf16.vlgmr.msra.gmra.mrb[44].mxu1 %vm1335_vm2, %v2292_v51 }
 0xa9d   :  { %3704 = vmatpush3.bf16.msra.mxu1 %v3792_v38  ;;  %3707 = vmatprep.mubr.msk.bf16.mxu1 %vm3940_vm0, %v3939_v17 }
 0xa9e   :  { %3705 = vmatprep.subr.bf16.mxu1 %v3939_v17 }
 0xaa1   :  { %3706 = vmatpush3.bf16.msra.mxu1 %v3793_v58 }
 0xaa2   :  { %3719 = vmatprep.subr.bf16.mxu1 %v3939_v17 }
 0xaa4   :  { %3708 = vmatmul.mubr.msk.bf16.vlgmr.msra.gmra.mrb[48].mxu1 %vm874_vm1, %v4215_v31 }
 0xaa5   :  { %3721 = vmatprep.mubr.msk.bf16.mxu1 %vm3940_vm0, %v3939_v17 }
 0xaaa   :  { %3720 = vmatpush3.bf16.xpose.msra.mxu1 %v2530_v62 }
 0xaab   :  { %3731 = vmatprep.subr.bf16.mxu1 %v3939_v17 }
 0xb67   :  { %v2226_v63 = vpop.f32.mrb[40].mxu1 }
 0xb68   :  { %v3683_v0 = vpop.f32.mrb[41].mxu1 }
 0xb69   :  { %v2229_v1 = vpop.f32.mrb[42].mxu1 }
 0xb6a   :  { %v3684_v2 = vpop.f32.mrb[43].mxu1 }
 0xb6f   :  { %v2333_v3 = vpop.f32.mrb[44].mxu1 }
 0xb70   :  { %v2339_v5 = vpack.c.bf16 %v2333_v3, %v2226_v63  ;;  %v3695_v6 = vpop.f32.mrb[45].mxu1  ;;  %v3424_v3 = vld [vmem:[%s4544_s12 + $0xc] sm:$0xf] }
 0xb71   :  { %v2336_v8 = vpop.f32.mrb[46].mxu1 }
 0xb72   :  { %v3696_v36 = vpop.f32.mrb[47].mxu1  ;;  %3700 = vmatmul.mubr.msk.bf16.vlgmr.msra.gmra.mrb[48].mxu0 %vm1335_vm2, %v2339_v5 }
 0xb73   :  { %3712 = vmatpush3.bf16.msra.mxu0 %v3794_v4  ;;  %3715 = vmatprep.mubr.msk.bf16.mxu0 %vm3940_vm0, %v3939_v17  ;;  %v2744_v4 = vsel %vm1397_vm3, %v3424_v3, 0 }
 0xb74   :  { %3713 = vmatprep.subr.bf16.mxu0 %v3939_v17 }
 0xb77   :  { %v2450_v46 = vpop.f32.mrb[48].mxu1  ;;  %3714 = vmatpush3.bf16.msra.mxu0 %v3795_v50 }
 0xb78   :  { %v2451_v12 = vadd.f32 %v3407_v10, %v2450_v46  ;;  %v3709_v13 = vpop.f32.mrb[49].mxu1  ;;  %3725 = vmatprep.subr.bf16.mxu0 %v3939_v17 }
 0xb79   :  { %v2453_v14 = vpop.f32.mrb[50].mxu1  ;;  %v3796_v13 = vld [vmem:[%s4546_s14] sm:$0xff]  }
 0xb7a   :  { %v2523_v15 = vpack.c.bf16 %v2451_v12, %v2451_v12  ;;  %v3710_v16 = vpop.f32.mrb[51].mxu1  ;;  %3716 = vmatmul.mubr.msk.bf16.vlgmr.msra.gmra.mrb[52].mxu0 %vm874_vm1, %v4215_v31  ;;  %v2454_v55 = vadd.f32 %v3407_v10, %v2453_v14  ;;  %v3797_v14 = vld [vmem:[%s4548_s16] sm:$0xff]  }
 0xb7b   :  { %3727 = vmatprep.mubr.msk.bf16.mxu0 %vm3940_vm0, %v3939_v17  ;;  %v3799_v16 = vld [vmem:[%s4548_s16 + $0x8] sm:$0xff]  }
 0xb7c   :  { %3722 = vmatmul.mubr.msk.bf16.vlgmr.msra.gmra.mrb[52].mxu1 %vm1335_vm2, %v2523_v15  ;;  %v2630_v19 = vpack.c.bf16 %v2454_v55, %v2454_v55  ;;  %v3798_v15 = vld [vmem:[%s4546_s14 + $0x8] sm:$0xff]  }
 0xb7d   :  { %3732 = vmatpush3.bf16.xpose.msra.mxu1 %v2637_v18  ;;  %3733 = vmatprep.mubr.msk.bf16.mxu1 %vm3940_vm0, %v3939_v17 }
 0xb7e   :  { %3743 = vmatprep.subr.bf16.mxu1 %v3939_v17 }
 0xb84   :  { %3734 = vmatmul.mubr.msk.bf16.vlgmr.msra.gmra.mrb[56].mxu1 %vm1335_vm2, %v2630_v19 }
 0xb85   :  { %3745 = vmatprep.mubr.msk.bf16.mxu1 %vm3940_vm0, %v3939_v17  ;;  %3744 = vmatpush3.bf16.msra.mxu1 %v2744_v4 }
 0xb86   :  { %3757 = vmatprep.subr.bf16.mxu1 %v3939_v17 }
 0xc45   :  { %v2382_v31 = vpop.f32.mrb[48].mxu0 }
 0xc46   :  { %v4451_v41 = vadd.f32 %v2382_v31, %v4370_v7  ;;  %v3701_v20 = vpop.f32.mrb[49].mxu0  ;;  %v3426_v31 = vld [vmem:[%s4562_s23] ss:$0 sm:$0xff] }
 0xc47   :  { %v2385_v52 = vpop.f32.mrb[50].mxu0 }
 0xc48   :  { %v4454_v21 = vadd.f32 %v2385_v52, %v4372_v9  ;;  %v3702_v22 = vpop.f32.mrb[51].mxu0 }
 0xc4d   :  { %v2516_v24 = vpop.f32.mrb[52].mxu0 }
 0xc4e   :  { %v2517_v25 = vadd.f32 %v3416_v23, %v2516_v24  ;;  %v3717_v26 = vpop.f32.mrb[53].mxu0 }
 0xc4f   :  { %v2519_v27 = vpop.f32.mrb[54].mxu0  ;;  %v2566_v28 = vpop.f32.mrb[52].mxu1 }
 0xc50   :  { %v2525_v29 = vpack.c.bf16 %v2517_v25, %v2517_v25  ;;  %v2520_v30 = vadd.f32 %v3416_v23, %v2519_v27  ;;  %v3718_v33 = vpop.f32.mrb[55].mxu0  ;;  %v3723_v7 = vpop.f32.mrb[53].mxu1  ;;  %v2572_v32 = vsel %vm1335_vm2, %v2566_v28, -inf }
 0xc51   :  { %2573 = vmax.xlane.f32.xlu0 %v2572_v32  ;;  %v2569_v34 = vpop.f32.mrb[54].mxu1 }
 0xc52   :  { %v2588_v9 = vsel %vm1397_vm3, %v2525_v29, 0  ;;  %v3724_v35 = vpop.f32.mrb[55].mxu1  ;;  %v2632_v60 = vpack.c.bf16 %v2520_v30, %v2520_v30 }
 0xc53   :  { %3726 = vmatpush3.bf16.msra.mxu0 %v2588_v9 }
 0xc54   :  { %3737 = vmatprep.subr.bf16.mxu0 %v3939_v17  ;;  %v2695_v63 = vsel %vm1397_vm3, %v2632_v60, 0 }
 0xc57   :  { %v2673_v37 = vpop.f32.mrb[56].mxu1 }
 0xc58   :  { %v3735_v39 = vpop.f32.mrb[57].mxu1  ;;  %v2679_v40 = vsel %vm1335_vm2, %v2673_v37, -inf }
 0xc59   :  { %2680 = vmax.xlane.f32.xlu1 %v2679_v40  ;;  %v2676_v42 = vpop.f32.mrb[58].mxu1 }
 0xc5a   :  { %v3736_v43 = vpop.f32.mrb[59].mxu1 }
 0xcde   :  { %v2574_v44 = vpop.xlane.xlu0 %2573 }
 0xcdf   :  { %v2575_v45 = vsub.f32 %v2566_v28, %v2574_v44 }
 0xce1   :  { %v2576_v47 = vmul.f32 1.442695, %v2575_v45 }
 0xce3   :  { %3828 = vpow2.f32 %v2576_v47 }
 0xce6   :  { %v2681_v48 = vpop.xlane.xlu1 %2680 }
 0xce7   :  { %v2682_v49 = vsub.f32 %v2673_v37, %v2681_v48 }
 0xce9   :  { %v2683_v53 = vmul.f32 1.442695, %v2682_v49 }
 0xceb   :  { %3830 = vpow2.f32 %v2683_v53 }
 0xced   :  { %v3829_v54 = vpop.eup %3828 }
 0xcee   :  { %v2578_v56 = vsel %vm1335_vm2, %v3829_v54, 0.0 }
 0xcef   :  { %2579 = vadd.xlane.f32.xlu0 %v2578_v56 }
 0xcf5   :  { %v3831_v57 = vpop.eup %3830 }
 0xcf6   :  { %v2685_v38 = vsel %vm1335_vm2, %v3831_v57, 0.0 }
 0xcf7   :  { %2686 = vadd.xlane.f32.xlu1 %v2685_v38 }
 0xd7c   :  { %v2580_v51 = vpop.xlane.xlu0 %2579 }
 0xd7d   :  { %3832 = vrcp.f32 %v2580_v51 }
 0xd84   :  { %v2687_v58 = vpop.xlane.xlu1 %2686 }
 0xd85   :  { %3834 = vrcp.f32 %v2687_v58 }
 0xd87   :  { %v3833_v59 = vpop.eup %3832 }
 0xd88   :  { %v2582_v61 = vmul.f32 %v3833_v59, %v3829_v54 }
 0xd8a   :  { %v2583_v62 = vpack.c.bf16 %v2582_v61, %v2582_v61 }
 0xd8c   :  { %3728 = vmatmul.mubr.msk.bf16.vlgmr.msra.gmra.mrb[56].mxu0 %vm1335_vm2, %v2583_v62 }
 0xd8d   :  { %3738 = vmatpush3.bf16.msra.mxu0 %v2695_v63  ;;  %3739 = vmatprep.mubr.msk.bf16.mxu0 %vm3940_vm0, %v3939_v17 }
 0xd8e   :  { %3749 = vmatprep.subr.bf16.mxu0 %v3939_v17 }
 0xd8f   :  { %v3835_v0 = vpop.eup %3834 }
 0xd90   :  { %v2689_v1 = vmul.f32 %v3835_v0, %v3831_v57 }
 0xd92   :  { %v2690_v2 = vpack.c.bf16 %v2689_v1, %v2689_v1 }
 0xd94   :  { %3740 = vmatmul.mubr.msk.bf16.vlgmr.msra.gmra.mrb[60].mxu0 %vm1335_vm2, %v2690_v2 }
 0xd95   :  { %3753 = vmatprep.mubr.msk.bf16.mxu0 %vm3940_vm0, %v3939_v17  ;;  %3750 = vmatpush3.bf16.msra.mxu0 %v3796_v13 }
 0xd96   :  { %3751 = vmatprep.subr.bf16.mxu0 %v3939_v17 }
 0xd99   :  { %3752 = vmatpush3.bf16.msra.mxu0 %v3798_v15 }
 0xe5f   :  { %v2624_v5 = vpop.f32.mrb[56].mxu0 }
 0xe60   :  { %v3729_v6 = vpop.f32.mrb[57].mxu0 }
 0xe61   :  { %v2627_v8 = vpop.f32.mrb[58].mxu0 }
 0xe62   :  { %v3730_v36 = vpop.f32.mrb[59].mxu0 }
 0xe67   :  { %v2731_v50 = vpop.f32.mrb[60].mxu0 }
 0xe68   :  { %v2737_v10 = vpack.c.bf16 %v2731_v50, %v2624_v5  ;;  %v3741_v11 = vpop.f32.mrb[61].mxu0 }
 0xe69   :  { %v2734_v46 = vpop.f32.mrb[62].mxu0 }
 0xe6a   :  { %v3742_v12 = vpop.f32.mrb[63].mxu0  ;;  %3746 = vmatmul.mubr.msk.bf16.vlgmr.msra.gmra.mrb[60].mxu1 %vm1335_vm2, %v2737_v10 }
 0xe6b   :  { %3761 = vmatprep.mubr.msk.bf16.mxu1 %vm3940_vm0, %v3939_v17  ;;  %3758 = vmatpush3.bf16.msra.mxu1 %v3797_v14 }
 0xe6c   :  { %3759 = vmatprep.subr.bf16.mxu1 %v3939_v17 }
 0xe6f   :  { %3760 = vmatpush3.bf16.msra.mxu1 %v3799_v16 }
 0xf3d   :  { %v2780_v18 = vpop.f32.mrb[60].mxu1 }
 0xf3e   :  { %v2787_v55 = vadd.f32 %v2780_v18, %v4451_v41  ;;  %v3747_v19 = vpop.f32.mrb[61].mxu1  ;;  %v3427_v41 = vld [vmem:[%s4547_s15] ss:$0 sm:$0xff]  ;;  %s3941_s15 = smov [#allocation8]  }
 0xf3f   :  { %v2783_v20 = vpop.f32.mrb[62].mxu1 }
 0xf40   :  { %v2788_v52 = vadd.f32 %v2783_v20, %v4454_v21  ;;  %v3748_v22 = vpop.f32.mrb[63].mxu1  ;;  %v2796_v23 = vadd.f32 %v3426_v31, %v2787_v55  ;;  %v3431_v21 = vld [vmem:[%s4549_s17] ss:$0 sm:$0xff]  ;;  %s2979_s17 = sshll.u32 %s3941_s15, 4  ;;  %s2980_s17 = int_to_ptr.vmem [resolvable:$true] %s2979_s17 }
 0xf41   :  { %s3856_s25 = scalar_lea.vmem %s2980_s17, 32  ;;  %p3861_p6 = scmp.lt.s32.totalorder %s2980_s17, %s2980_s17 }
 0xf42   :  { %v2797_v24 = vadd.f32 %v3426_v31, %v2788_v52  ;;  %p3857_p5 = scmp.ne.s32.totalorder %s2980_s17, %s3856_s25  ;;  %p3862_p7 = scmp.lt.s32.totalorder %s3856_s25, %s3856_s25 }
 0xf44   :  { %v2798_v17 = vpack.c.bf16 %v2797_v24, %v2796_v23  ;;  %v2889_v25 = vrot.slane %v2797_v24, 7  ;;  %p3863_p8 = por %p3862_p7, %p3861_p6 }
 0xf46   :  { %3754 = vmatmul.mubr.msk.bf16.vlgmr.msra.gmra.mrb[64].mxu0 %vm874_vm1, %v2798_v17  ;;  %v2892_v26 = vsel %vm2891_vm4, %v2796_v23, %v2889_v25  ;;  %p3864_p9 = pnand %p3863_p8, %p3857_p5 }
 0xf47   :  { %v2893_v27 = vpack.c.bf16 %v2892_v26, %v2892_v26 }
 0xf49   :  { %3762 = vmatmul.mubr.msk.bf16.vlgmr.msra.gmra.mrb[64].mxu1 %vm874_vm1, %v2893_v27 }
0x1019   :  { %v2859_v28 = vpop.f32.mrb[64].mxu0 }
0x101a   :  { %v2860_v29 = vadd.f32 %v3427_v41, %v2859_v28  ;;  %v3755_v30 = vpop.f32.mrb[65].mxu0 }
0x101b   :  { %v2862_v33 = vpop.f32.mrb[66].mxu0 }
0x101c   :  { %v2863_v7 = vadd.f32 %v3427_v41, %v2862_v33  ;;  %v2954_v32 = vpop.f32.mrb[64].mxu1  ;;  %2866 = vmax.xlane.f32.xlu0 %v2860_v29  ;;  %v3756_v34 = vpop.f32.mrb[67].mxu0 }
0x101d   :  { %v2955_v9 = vadd.f32 %v3431_v21, %v2954_v32  ;;  %v3763_v35 = vpop.f32.mrb[65].mxu1 }
0x101e   :  { %v2957_v37 = vpop.f32.mrb[66].mxu1  ;;  %2868 = vmax.xlane.f32.xlu1 %v2863_v7 }
0x101f   :  { %2960 = vst [vmem:[#allocation8] sm:$0x3] %v2955_v9  ;;  %v3764_v39 = vpop.f32.mrb[67].mxu1 }
0x10a9   :  { %v2867_v40 = vpop.xlane.xlu0 %2866 }
0x10aa   :  { %v2870_v42 = vsub.f32 %v2860_v29, %v2867_v40 }
0x10ab   :  { %v2869_v43 = vpop.xlane.xlu1 %2868 }
0x10ac   :  { %v2872_v44 = vmul.f32 1.442695, %v2870_v42  ;;  %v2871_v45 = vsub.f32 %v2863_v7, %v2869_v43 }
0x10ae   :  { %3836 = vpow2.f32 %v2872_v44  ;;  %v2874_v47 = vmul.f32 1.442695, %v2871_v45 }
0x10b0   :  { %3838 = vpow2.f32 %v2874_v47 }
0x10b8   :  { %v3837_v48 = vpop.eup %3836 }
0x10b9   :  { %2876 = vadd.xlane.f32.xlu0 %v3837_v48 }
0x10ba   :  { %v3839_v49 = vpop.eup %3838 }
0x10bb   :  { %2878 = vadd.xlane.f32.xlu1 %v3839_v49 }
0x10bc   :  { %3867 = shalt.err (!%p3864_p9)
}
0x10bd   :  { %s3868_s26 = scalar_lea.hbm %s4551_s19, 32 }
0x10be   :  { %p3869_p10 = scmp.ne.s32.totalorder %s4551_s19, %s3868_s26  ;;  %p3872_p11 = scmp.lt.u32.totalorder %s3868_s26, %s4551_s19 }
0x10c0   :  { %p3874_p12 = pnand %p3872_p11, %p3869_p10 }
0x10c2   :  { %3877 = shalt.err (!%p3874_p12)
}
0x10c3   :  { %2982 = dma.vmem_to_hbm [thread:$0]  %s2980_s17, 32, %s4551_s19, [#allocation9]  }
0x10c4   :  { %s3942_s11 = smov [#allocation6]  }
0x10c5   :  { %s2966_s28 = sshll.u32 %s3942_s11, 4  ;;  %s2967_s28 = int_to_ptr.vmem [resolvable:$true] %s2966_s28 }
0x10c6   :  { %s3878_s12 = scalar_lea.vmem %s2967_s28, 256  ;;  %p3883_p0 = scmp.lt.s32.totalorder %s2967_s28, %s2967_s28 }
0x10c7   :  { %p3879_p13 = scmp.ne.s32.totalorder %s2967_s28, %s3878_s12  ;;  %p3884_p1 = scmp.lt.s32.totalorder %s3878_s12, %s3878_s12 }
0x10c9   :  { %p3885_p2 = por %p3884_p1, %p3883_p0 }
0x10cb   :  { %p3886_p3 = pnand %p3885_p2, %p3879_p13 }
0x1146   :  { %v2877_v53 = vpop.xlane.xlu0 %2876 }
0x1147   :  { %3840 = vlog2.f32 %v2877_v53 }
0x1148   :  { %v2879_v54 = vpop.xlane.xlu1 %2878 }
0x1149   :  { %3842 = vlog2.f32 %v2879_v54 }
0x1151   :  { %v3841_v56 = vpop.eup %3840 }
0x1152   :  { %v2881_v57 = vmul.f32 0.6931472, %v3841_v56 }
0x1153   :  { %v3843_v38 = vpop.eup %3842 }
0x1154   :  { %v2884_v51 = vsub.f32 %v2870_v42, %v2881_v57  ;;  %v2883_v58 = vmul.f32 0.6931472, %v3843_v38 }
0x1156   :  { %2886 = vst [vmem:[#allocation6] sm:$0xff] %v2884_v51  ;;  %v2885_v59 = vsub.f32 %v2871_v45, %v2883_v58 }
0x1158   :  { %2887 = vst [vmem:[#allocation6 + $0x8] sm:$0xff] %v2885_v59 }
0x1159   :  { %3889 = shalt.err (!%p3886_p3)
}
0x115a   :  { %s3890_s0 = scalar_lea.hbm %s4550_s18, 256 }
0x115b   :  { %p3891_p4 = scmp.ne.s32.totalorder %s4550_s18, %s3890_s0  ;;  %p3894_p5 = scmp.lt.u32.totalorder %s3890_s0, %s4550_s18 }
0x115d   :  { %p3896_p6 = pnand %p3894_p5, %p3891_p4 }
0x115f   :  { %3899 = shalt.err (!%p3896_p6)
}
0x1160   :  { %s3943_s1 = smov 128   ;;  %s3944_s22 = smov 8  }
0x1161   :  { %2972 = dma.vmem_to_hbm [thread:$0]  %s2967_s28, 256, %s4550_s18, [#allocation7], %s3943_s1, %s3943_s1, %s3944_s22  }
0x1162   :  { %3934 = dma.done.wait [#allocation7], 256  }
0x1163   :  { %3935 = vsyncadd [#allocation7], 4294967040 }
0x1164   :  { %3936 = dma.done.wait [#allocation9], 32  }
0x1165   :  { %3937 = vsyncadd [#allocation9], 4294967264 }
0x1166   :  { %2989 = vsyncpa [#allocation7], 1 }
0x1167   :  { %2990 = vsyncpa [#allocation9], 1 }
0x1168   :  { %2991 = vsyncmov [#allocation3] }
0x116b   :  { %s2992_s14 = vpop.sfrf %2991 }
0x116c   :  { %p3435_p7 = scmp.ne.s32.totalorder %s2992_s14, 0 }
0x116e   :  { %2996 = shalt.err (%p3435_p7)  }
0x116f   :  { %2998 = vsyncmov [#allocation3 + $0x1] }
0x1172   :  { %s2999_s16 = vpop.sfrf %2998 }
0x1173   :  { %p3436_p8 = scmp.ne.s32.totalorder %s2999_s16, 0 }
0x1175   :  { %3003 = shalt.err (%p3436_p8)  }
0x1176   :  { %3005 = vsyncmov [#allocation3 + $0x2] }
0x1179   :  { %s3006_s24 = vpop.sfrf %3005 }
0x117a   :  { %p3437_p9 = scmp.ne.s32.totalorder %s3006_s24, 0 }
0x117c   :  { %3010 = shalt.err (%p3437_p9)  }
0x117d   :  { %3012 = vsyncmov [#allocation3 + $0x3] }
0x1180   :  { %s3013_s18 = vpop.sfrf %3012 }
0x1181   :  { %p3438_p10 = scmp.ne.s32.totalorder %s3013_s18, 0 }
0x1183   :  { %3017 = shalt.err (%p3438_p10)  }
0x1184   :  { %3019 = vsyncmov [#allocation3 + $0x4] }
0x1187   :  { %s3020_s5 = vpop.sfrf %3019 }
0x1188   :  { %p3439_p11 = scmp.ne.s32.totalorder %s3020_s5, 0 }
0x118a   :  { %3024 = shalt.err (%p3439_p11)  }
0x118b   :  { %3026 = vsyncmov [#allocation3 + $0x5] }
0x118e   :  { %s3027_s15 = vpop.sfrf %3026 }
0x118f   :  { %p3440_p12 = scmp.ne.s32.totalorder %s3027_s15, 0 }
0x1191   :  { %3031 = shalt.err (%p3440_p12)  }
0x1192   :  { %3033 = vsyncmov [#allocation3 + $0x6] }
0x1195   :  { %s3034_s17 = vpop.sfrf %3033 }
0x1196   :  { %p3441_p13 = scmp.ne.s32.totalorder %s3034_s17, 0 }
0x1198   :  { %3038 = shalt.err (%p3441_p13)  }
0x1199   :  { %3040 = vsyncmov [#allocation3 + $0x7] }
0x119c   :  { %s3041_s25 = vpop.sfrf %3040 }
0x119d   :  { %p3442_p0 = scmp.ne.s32.totalorder %s3041_s25, 0 }
0x119f   :  { %3045 = shalt.err (%p3442_p0)  }
0x11a0   :  { %3047 = vsyncmov [#allocation3 + $0x8] }
0x11a3   :  { %s3048_s3 = vpop.sfrf %3047 }
0x11a4   :  { %p3443_p1 = scmp.ne.s32.totalorder %s3048_s3, 0 }
0x11a6   :  { %3052 = shalt.err (%p3443_p1)  }
0x11a7   :  { %3054 = vsyncmov [#allocation3 + $0x9] }
0x11aa   :  { %s3055_s6 = vpop.sfrf %3054 }
0x11ab   :  { %p3444_p2 = scmp.ne.s32.totalorder %s3055_s6, 0 }
0x11ad   :  { %3059 = shalt.err (%p3444_p2)  }
0x11ae   :  { %3061 = vsyncmov [#allocation3 + $0xa] }
0x11b1   :  { %s3062_s26 = vpop.sfrf %3061 }
0x11b2   :  { %p3445_p3 = scmp.ne.s32.totalorder %s3062_s26, 0 }
0x11b4   :  { %3066 = shalt.err (%p3445_p3)  }
0x11b5   :  { %3068 = vsyncmov [#allocation3 + $0xb] }
0x11b8   :  { %s3069_s27 = vpop.sfrf %3068 }
0x11b9   :  { %p3446_p4 = scmp.ne.s32.totalorder %s3069_s27, 0 }
0x11bb   :  { %3073 = shalt.err (%p3446_p4)  }
0x11bc   :  { %3075 = vsyncmov [#allocation3 + $0xc] }
0x11bf   :  { %s3076_s4 = vpop.sfrf %3075 }
0x11c0   :  { %p3447_p5 = scmp.ne.s32.totalorder %s3076_s4, 0 }
0x11c2   :  { %3080 = shalt.err (%p3447_p5)  }
0x11c3   :  { %3082 = vsyncmov [#allocation3 + $0xd] }
0x11c6   :  { %s3083_s7 = vpop.sfrf %3082 }
0x11c7   :  { %p3448_p6 = scmp.ne.s32.totalorder %s3083_s7, 0 }
0x11c9   :  { %3087 = shalt.err (%p3448_p6)  }
0x11ca   :  { %3089 = vsyncmov [#allocation3 + $0xe] }
0x11cd   :  { %s3090_s13 = vpop.sfrf %3089 }
0x11ce   :  { %p3449_p7 = scmp.ne.s32.totalorder %s3090_s13, 0 }
0x11d0   :  { %3094 = shalt.err (%p3449_p7)  }
0x11d1   :  { %3096 = vsyncmov [#allocation3 + $0xf] }
0x11d4   :  { %s3097_s8 = vpop.sfrf %3096 }
0x11d5   :  { %p3450_p8 = scmp.ne.s32.totalorder %s3097_s8, 0 }
0x11d7   :  { %3101 = shalt.err (%p3450_p8)  }

</bundles_post_ra>
